<compile_context>
chip_gen: v7x
topology: tpu7x:2x2x1
jax: 0.10.0
libtpu: 0.0.40
codegen_flags: <defaults>
</compile_context>

<pallas_src>
import jax
import jax.numpy as jnp
from jax.experimental import pallas as pl
from jax.experimental.pallas import tpu as pltpu

# ----------------------------- config ---------------------------------------
PREFIX_LEN = 10          # prefix_length (module default)
SEQ_LEN    = 8           # token sequence length
BATCH      = 2
HIDDEN     = 32
NUM_HEADS  = 2
HEAD_DIM   = HIDDEN // NUM_HEADS
INTER      = 64          # intermediate (FFN) size
NUM_LAYERS = 2
VOCAB      = 50
MAX_POS    = 40
TYPE_VOCAB = 2
NUM_LABELS = 2
PAD_IDX    = 1           # RoBERTa padding_idx
LN_EPS     = 1e-5
MASK_NEG   = -1e9        # additive mask value (stand-in for finfo.min)


# ----------------------------- fused Pallas kernel ---------------------------
def _fused_forward_kernel(x_ref, bias_ref, embc_ref, sel_ref,
                          wattn_ref, wffn_ref, vecs_ref,
                          headw_ref, headv_ref, o_ref, ctx_scr):
    """Whole forward for the full (stacked) batch in one grid step.

    Shapes (B=2, T=18, H=32, I=64, L=2):
      x_ref     (B*T, H)      stacked prefix+token embeddings (pre first LN)
      bias_ref  (B*T, B*T)    block-diagonal additive attention bias
      embc_ref  (B*T, H)      pos2 + token_type (second embeddings pass)
      sel_ref   (B*T, 1)      1.0 on token rows, 0.0 on prefix rows
      wattn_ref (L, H, 4H)    [Wq*scale | Wk | Wv | Wo]
      wffn_ref  (L, H+I, I)   rows [:H] = Wi, rows [H:] = [Wo2 | 0]
      vecs_ref  (L, 3, 4H)    row0=[bq*s|bk|bv|bo] row1=[g1|b1|g2|b2] row2=[bi|bo2|0]
      headw_ref (H, 2H)       [cls_dense_w.T | cls_out_w.T padded]
      headv_ref (4, H)        [emb_ln_g, emb_ln_b, cls_dense_b, cls_out_b padded]
      o_ref     (B, NUM_LABELS)
      ctx_scr   (B*T, H)      VMEM scratch for the per-head contexts
    """
    BT = x_ref.shape[0]
    H = x_ref.shape[1]
    I = INTER
    L = wattn_ref.shape[0]
    T = BT // BATCH
    hd = H // NUM_HEADS

    def ln(v, g, b):
        mu = jnp.mean(v, axis=-1, keepdims=True)
        var = jnp.mean((v - mu) ** 2, axis=-1, keepdims=True)
        return (v - mu) * jax.lax.rsqrt(var + LN_EPS) * g + b

    g_e = headv_ref[0:1, :]                            # (1, H)
    b_e = headv_ref[1:2, :]                            # (1, H)

    # ---- RobertaEmbeddings(input_ids) LayerNorm, token rows only ----
    # prefix rows are the raw learned prefix (no LN before the concat in the
    # reference); token rows are word+pos+type sums that must be LN'd.
    x = x_ref[...]                                     # (BT, H)
    ln_all = ln(x, g_e, b_e)
    x = jnp.where(sel_ref[...] > 0.5, ln_all, x)

    # ---- RobertaEmbeddings(inputs_embeds=...): + pos2 + token_type, LN ----
    x = ln(x + embc_ref[...], g_e, b_e)

    bias = bias_ref[...]                               # (BT, BT) block-diag

    # ---- encoder layers ----
    for l in range(L):
        w_attn = wattn_ref[l]                          # (H, 4H)
        wqkv = w_attn[:, :3 * H]
        wo = w_attn[:, 3 * H:]
        vec = vecs_ref[l]                              # (3, 4H)
        bqkv = vec[0:1, :3 * H]
        bo = vec[0:1, 3 * H:4 * H]
        g1 = vec[1:2, 0:H]
        b1 = vec[1:2, H:2 * H]
        g2 = vec[1:2, 2 * H:3 * H]
        b2 = vec[1:2, 3 * H:4 * H]
        bi = vec[2:3, 0:I]
        bo2 = vec[2:3, I:I + H]

        # fused QKV projection on the whole stacked batch (scale pre-folded)
        qkv = jnp.dot(x, wqkv, preferred_element_type=jnp.float32) + bqkv  # (BT, 3H)

        for h in range(NUM_HEADS):
            q = qkv[:, h * hd:(h + 1) * hd]
            k = qkv[:, H + h * hd:H + (h + 1) * hd]
            v = qkv[:, 2 * H + h * hd:2 * H + (h + 1) * hd]
            s = jax.lax.dot_general(q, k, (((1,), (1,)), ((), ())),
                                    preferred_element_type=jnp.float32)   # (BT, BT)
            s = s + bias
            s = s - jnp.max(s, axis=-1, keepdims=True)
            p = jnp.exp(s)
            p = p / jnp.sum(p, axis=-1, keepdims=True)
            ctx_scr[:, h * hd:(h + 1) * hd] = jnp.dot(
                p, v, preferred_element_type=jnp.float32)                 # (BT, hd)

        # single output projection over all heads
        attn = jnp.dot(ctx_scr[...], wo,
                       preferred_element_type=jnp.float32) + bo
        x = ln(attn + x, g1, b1)

        wi = wffn_ref[l, :H, :]                        # (H, I)
        wo2 = wffn_ref[l, H:, :H]                      # (I, H)
        inter = jnp.dot(x, wi, preferred_element_type=jnp.float32) + bi
        # TODO(synk): HF "gelu" is erf-based; tanh-approx used for TPU lowering.
        inter = jax.nn.gelu(inter, approximate=True)
        ffn = jnp.dot(inter, wo2, preferred_element_type=jnp.float32) + bo2
        x = ln(ffn + x, g2, b2)

    # ---- RobertaClassificationHead: token 0 of each sequence ----
    cls = jnp.concatenate([x[b * T:b * T + 1, :] for b in range(BATCH)],
                          axis=0)                                         # (B, H)
    cw1 = headw_ref[:, :H]
    cw2 = headw_ref[:, H:H + NUM_LABELS]
    cb1 = headv_ref[2:3, :]
    cb2 = headv_ref[3:4, 0:NUM_LABELS]
    cls = jnp.tanh(jnp.dot(cls, cw1, preferred_element_type=jnp.float32) + cb1)
    o_ref[...] = jnp.dot(cls, cw2, preferred_element_type=jnp.float32) + cb2


# ----------------------------- forward (JAX glue + one pallas_call) ----------
def prefix_tuned_roberta_forward(params, fused, input_ids, attention_mask):
    """Forward pass of PrefixTunedRoberta; returns classification logits."""
    B, S = input_ids.shape
    H = HIDDEN
    T = S + PREFIX_LEN
    BT = B * T

    # RobertaEmbeddings(input_ids): word + position + token_type gathers (glue).
    pad_mask = (input_ids != PAD_IDX).astype(jnp.int32)
    position_ids = jnp.cumsum(pad_mask, axis=1) * pad_mask + PAD_IDX
    tok_raw = (params["word_emb"][input_ids]
               + params["pos_emb"][position_ids]
               + params["tok_emb"][0][None, None, :]).astype(jnp.float32)

    # prefix = prefix_embeddings.unsqueeze(0).repeat(batch, 1, 1); concat in front,
    # then stack the batch along the sublane axis -> (B*T, H).
    prefix = jnp.broadcast_to(params["prefix_embeddings"][None],
                              (B, PREFIX_LEN, H)).astype(jnp.float32)
    x_pre = jnp.concatenate([prefix, tok_raw], axis=1).reshape(BT, H)

    # block-diagonal additive attention bias (prefix mask = ones), (BT, BT)
    mask_full = jnp.concatenate(
        [jnp.ones((B, PREFIX_LEN), jnp.float32),
         attention_mask.astype(jnp.float32)], axis=1).reshape(1, BT)
    batch_ids = jnp.repeat(jnp.arange(B, dtype=jnp.int32), T)
    same_batch = batch_ids.reshape(BT, 1) == batch_ids.reshape(1, BT)
    bias = jnp.where(same_batch & (mask_full > 0.5), 0.0, MASK_NEG
                     ).astype(jnp.float32)

    operands = [x_pre, bias, fused["emb_const"], fused["tok_sel"],
                fused["w_attn"], fused["w_ffn"], fused["vecs"],
                fused["head_w"], fused["head_v"]]

    def full_spec(a):
        return pl.BlockSpec(a.shape, lambda i, _nd=a.ndim: (0,) * _nd)

    logits = pl.pallas_call(
        _fused_forward_kernel,
        out_shape=jax.ShapeDtypeStruct((B, NUM_LABELS), jnp.float32),
        grid=(1,),                                   # whole batch in one step
        in_specs=[full_spec(a) for a in operands],
        out_specs=pl.BlockSpec((B, NUM_LABELS), lambda i: (0, 0)),
        scratch_shapes=[pltpu.VMEM((BT, H), jnp.float32)],
        compiler_params=pltpu.CompilerParams(
            dimension_semantics=("arbitrary",)),
    )(*operands)
    return logits                                     # (B, NUM_LABELS)


# ----------------------------- parameter init --------------------------------
def init_params(key):
    """PyTorch-layout parameters (Linear weights are (out, in))."""
    keys = iter(jax.random.split(key, 8 + NUM_LAYERS * 16))

    def nrm(shape, scale=0.02):
        return (scale * jax.random.normal(next(keys), shape)).astype(jnp.float32)

    params = {
        "prefix_embeddings": nrm((PREFIX_LEN, HIDDEN), scale=1.0),  # torch.randn
        "word_emb": nrm((VOCAB, HIDDEN)),
        "pos_emb": nrm((MAX_POS, HIDDEN)),
        "tok_emb": nrm((TYPE_VOCAB, HIDDEN)),
        "emb_ln_g": jnp.ones((1, HIDDEN), jnp.float32),
        "emb_ln_b": jnp.zeros((1, HIDDEN), jnp.float32),
        "cls_dense_w": nrm((HIDDEN, HIDDEN)),
        "cls_dense_b": jnp.zeros((HIDDEN,), jnp.float32),
        "cls_out_w": nrm((NUM_LABELS, HIDDEN)),
        "cls_out_b": jnp.zeros((NUM_LABELS,), jnp.float32),
        "layers": [],
    }
    for _ in range(NUM_LAYERS):
        params["layers"].append({
            "q_w": nrm((HIDDEN, HIDDEN)), "q_b": jnp.zeros((HIDDEN,), jnp.float32),
            "k_w": nrm((HIDDEN, HIDDEN)), "k_b": jnp.zeros((HIDDEN,), jnp.float32),
            "v_w": nrm((HIDDEN, HIDDEN)), "v_b": jnp.zeros((HIDDEN,), jnp.float32),
            "ao_w": nrm((HIDDEN, HIDDEN)), "ao_b": jnp.zeros((HIDDEN,), jnp.float32),
            "ao_ln_g": jnp.ones((1, HIDDEN), jnp.float32),
            "ao_ln_b": jnp.zeros((1, HIDDEN), jnp.float32),
            "i_w": nrm((INTER, HIDDEN)), "i_b": jnp.zeros((INTER,), jnp.float32),
            "o_w": nrm((HIDDEN, INTER)), "o_b": jnp.zeros((HIDDEN,), jnp.float32),
            "o_ln_g": jnp.ones((1, HIDDEN), jnp.float32),
            "o_ln_b": jnp.zeros((1, HIDDEN), jnp.float32),
        })
    return params


def prepare_fused_params(params, batch=BATCH, seq_len=SEQ_LEN):
    """One-time prep: transpose to (in, out), fuse QKV+O, fold the attention
    scale into Q, stack layers, and pack biases/LN/classifier into a handful
    of dense arrays so the kernel has few, large DMA operands."""
    layers = params["layers"]
    H, I, P = HIDDEN, INTER, PREFIX_LEN
    T = seq_len + P
    scale = 1.0 / float(HEAD_DIM) ** 0.5

    def stack(fn):
        return jnp.stack([fn(lp) for lp in layers], axis=0)

    # attention blob: [Wq*scale | Wk | Wv | Wo]  -> (L, H, 4H)
    w_attn = stack(lambda lp: jnp.concatenate(
        [lp["q_w"].T * scale, lp["k_w"].T, lp["v_w"].T, lp["ao_w"].T], axis=1))

    # FFN blob: rows [:H] = Wi (H,I); rows [H:] = [Wo2 | 0] (I,I)  -> (L, H+I, I)
    w_ffn = stack(lambda lp: jnp.concatenate(
        [lp["i_w"].T, jnp.pad(lp["o_w"].T, ((0, 0), (0, I - H)))], axis=0))

    # per-layer bias / LN rows, packed into 4H=128 lanes -> (L, 3, 4H)
    def vec_rows(lp):
        r0 = jnp.concatenate([lp["q_b"] * scale, lp["k_b"], lp["v_b"], lp["ao_b"]])
        r1 = jnp.concatenate([lp["ao_ln_g"][0], lp["ao_ln_b"][0],
                              lp["o_ln_g"][0], lp["o_ln_b"][0]])
        r2 = jnp.concatenate([lp["i_b"], lp["o_b"],
                              jnp.zeros((4 * H - I - H,), jnp.float32)])
        return jnp.stack([r0, r1, r2], axis=0)
    vecs = stack(vec_rows)

    # classifier weights: [cls_dense_w.T | cls_out_w.T padded] -> (H, 2H)
    head_w = jnp.concatenate(
        [params["cls_dense_w"].T,
         jnp.pad(params["cls_out_w"].T, ((0, 0), (0, H - NUM_LABELS)))], axis=1)
    # small vectors: emb LN gamma/beta, cls biases -> (4, H)
    head_v = jnp.stack(
        [params["emb_ln_g"][0], params["emb_ln_b"][0], params["cls_dense_b"],
         jnp.pad(params["cls_out_b"], (0, H - NUM_LABELS))], axis=0)

    # second-embeddings-pass constant: pos(pad+1 .. pad+T) + token_type(0),
    # tiled over the batch -> (B*T, H)
    pos2 = params["pos_emb"][PAD_IDX + 1: T + PAD_IDX + 1]
    emb_const = jnp.tile(pos2 + params["tok_emb"][0:1], (batch, 1)).astype(jnp.float32)

    # token-row selector (1 on token rows, 0 on prefix rows) -> (B*T, 1)
    tok_sel = jnp.tile(
        jnp.concatenate([jnp.zeros((P,), jnp.float32),
                         jnp.ones((seq_len,), jnp.float32)]),
        (batch,)).reshape(batch * T, 1)

    return {"w_attn": w_attn, "w_ffn": w_ffn, "vecs": vecs,
            "head_w": head_w, "head_v": head_v,
            "emb_const": emb_const, "tok_sel": tok_sel}


# ----------------------------- main -------------------------------------------
if __name__ == "__main__":
    root = jax.random.PRNGKey(0)
    k_param, k_ids = jax.random.split(root)

    params = init_params(k_param)
    fused = prepare_fused_params(params)            # one-time weight prep

    input_ids = jax.random.randint(k_ids, (BATCH, SEQ_LEN), 0, VOCAB,
                                   dtype=jnp.int32)
    # second example has two padded positions masked out
    attention_mask = jnp.array(
        [[1] * SEQ_LEN,
         [1] * (SEQ_LEN - 2) + [0, 0]], dtype=jnp.int32)

    fwd = jax.jit(prefix_tuned_roberta_forward)
    logits = fwd(params, fused, input_ids, attention_mask)
    logits = jax.block_until_ready(logits)

    assert logits.shape == (BATCH, NUM_LABELS), logits.shape
    assert bool(jnp.all(jnp.isfinite(logits)))
    print("KERNEL_OK")
</pallas_src>

<mosaic_0001>
module attributes {stable_mosaic.version = 11 : i64} {
  func.func @_fused_forward_kernel(%arg0: i32, %arg1: memref<36x32xf32, #tpu.memory_space<vmem>>, %arg2: memref<36x36xf32, #tpu.memory_space<vmem>>, %arg3: memref<36x32xf32, #tpu.memory_space<vmem>>, %arg4: memref<36x1xf32, #tpu.memory_space<vmem>>, %arg5: memref<2x32x128xf32, #tpu.memory_space<vmem>>, %arg6: memref<2x96x64xf32, #tpu.memory_space<vmem>>, %arg7: memref<2x3x128xf32, #tpu.memory_space<vmem>>, %arg8: memref<32x64xf32, #tpu.memory_space<vmem>>, %arg9: memref<4x32xf32, #tpu.memory_space<vmem>>, %arg10: memref<2x2xf32, #tpu.memory_space<vmem>>, %arg11: memref<36x32xf32, #tpu.memory_space<vmem>>) attributes {dimension_semantics = [#tpu.dimension_semantics<arbitrary>], iteration_bounds = array<i64: 1>, scalar_prefetch = 0 : i64, scratch_operands = 1 : i64, tpu.core_type = #tpu.core_type<tc>, window_params = [{pipeline_mode = #tpu.pipeline_mode<synchronous>, transform_indices = @transform_0, window_bounds = array<i64: 36, 32>}, {pipeline_mode = #tpu.pipeline_mode<synchronous>, transform_indices = @transform_1, window_bounds = array<i64: 36, 36>}, {pipeline_mode = #tpu.pipeline_mode<synchronous>, transform_indices = @transform_2, window_bounds = array<i64: 36, 32>}, {pipeline_mode = #tpu.pipeline_mode<synchronous>, transform_indices = @transform_3, window_bounds = array<i64: 36, 1>}, {pipeline_mode = #tpu.pipeline_mode<synchronous>, transform_indices = @transform_4, window_bounds = array<i64: 2, 32, 128>}, {pipeline_mode = #tpu.pipeline_mode<synchronous>, transform_indices = @transform_5, window_bounds = array<i64: 2, 96, 64>}, {pipeline_mode = #tpu.pipeline_mode<synchronous>, transform_indices = @transform_6, window_bounds = array<i64: 2, 3, 128>}, {pipeline_mode = #tpu.pipeline_mode<synchronous>, transform_indices = @transform_7, window_bounds = array<i64: 32, 64>}, {pipeline_mode = #tpu.pipeline_mode<synchronous>, transform_indices = @transform_8, window_bounds = array<i64: 4, 32>}, {pipeline_mode = #tpu.pipeline_mode<synchronous>, transform_indices = @transform_9, window_bounds = array<i64: 2, 2>}]} {
    %c0 = arith.constant 0 : index
    %c0_0 = arith.constant 0 : index
    %0 = vector.load %arg9[%c0, %c0_0] : memref<4x32xf32, #tpu.memory_space<vmem>>, vector<1x32xf32>
    %c1 = arith.constant 1 : index
    %c0_1 = arith.constant 0 : index
    %1 = vector.load %arg9[%c1, %c0_1] : memref<4x32xf32, #tpu.memory_space<vmem>>, vector<1x32xf32>
    %c0_2 = arith.constant 0 : index
    %c0_3 = arith.constant 0 : index
    %2 = vector.load %arg1[%c0_2, %c0_3] : memref<36x32xf32, #tpu.memory_space<vmem>>, vector<36x32xf32>
    %cst = arith.constant dense<0.000000e+00> : vector<36xf32>
    %3 = vector.multi_reduction <add>, %2, %cst [1] : vector<36x32xf32> to vector<36xf32>
    %4 = vector.shape_cast %3 : vector<36xf32> to vector<36x1xf32>
    %cst_4 = arith.constant 3.200000e+01 : f32
    %5 = vector.broadcast %cst_4 : f32 to vector<36x1xf32>
    %6 = arith.divf %4, %5 : vector<36x1xf32>
    %7 = vector.broadcast %6 : vector<36x1xf32> to vector<36x32xf32>
    %8 = arith.subf %2, %7 : vector<36x32xf32>
    %9 = arith.mulf %8, %8 : vector<36x32xf32>
    %cst_5 = arith.constant dense<0.000000e+00> : vector<36xf32>
    %10 = vector.multi_reduction <add>, %9, %cst_5 [1] : vector<36x32xf32> to vector<36xf32>
    %11 = vector.shape_cast %10 : vector<36xf32> to vector<36x1xf32>
    %cst_6 = arith.constant 3.200000e+01 : f32
    %12 = vector.broadcast %cst_6 : f32 to vector<36x1xf32>
    %13 = arith.divf %11, %12 : vector<36x1xf32>
    %14 = vector.broadcast %6 : vector<36x1xf32> to vector<36x32xf32>
    %15 = arith.subf %2, %14 : vector<36x32xf32>
    %cst_7 = arith.constant 9.99999974E-6 : f32
    %16 = vector.broadcast %cst_7 : f32 to vector<36x1xf32>
    %17 = arith.addf %13, %16 : vector<36x1xf32>
    %18 = math.rsqrt %17 : vector<36x1xf32>
    %19 = vector.broadcast %18 : vector<36x1xf32> to vector<36x32xf32>
    %20 = arith.mulf %15, %19 : vector<36x32xf32>
    %21 = vector.broadcast %0 : vector<1x32xf32> to vector<36x32xf32>
    %22 = arith.mulf %20, %21 : vector<36x32xf32>
    %23 = vector.broadcast %1 : vector<1x32xf32> to vector<36x32xf32>
    %24 = arith.addf %22, %23 : vector<36x32xf32>
    %c0_8 = arith.constant 0 : index
    %c0_9 = arith.constant 0 : index
    %25 = vector.load %arg4[%c0_8, %c0_9] : memref<36x1xf32, #tpu.memory_space<vmem>>, vector<36x1xf32>
    %cst_10 = arith.constant 5.000000e-01 : f32
    %26 = vector.broadcast %cst_10 : f32 to vector<36x1xf32>
    %27 = arith.cmpf ogt, %25, %26 : vector<36x1xf32>
    %28 = vector.shape_cast %27 : vector<36x1xi1> to vector<36x1xi1>
    %29 = vector.broadcast %28 : vector<36x1xi1> to vector<36x32xi1>
    %30 = arith.select %29, %24, %2 : vector<36x32xi1>, vector<36x32xf32>
    %c0_11 = arith.constant 0 : index
    %c0_12 = arith.constant 0 : index
    %31 = vector.load %arg3[%c0_11, %c0_12] : memref<36x32xf32, #tpu.memory_space<vmem>>, vector<36x32xf32>
    %32 = arith.addf %30, %31 : vector<36x32xf32>
    %cst_13 = arith.constant dense<0.000000e+00> : vector<36xf32>
    %33 = vector.multi_reduction <add>, %32, %cst_13 [1] : vector<36x32xf32> to vector<36xf32>
    %34 = vector.shape_cast %33 : vector<36xf32> to vector<36x1xf32>
    %cst_14 = arith.constant 3.200000e+01 : f32
    %35 = vector.broadcast %cst_14 : f32 to vector<36x1xf32>
    %36 = arith.divf %34, %35 : vector<36x1xf32>
    %37 = vector.broadcast %36 : vector<36x1xf32> to vector<36x32xf32>
    %38 = arith.subf %32, %37 : vector<36x32xf32>
    %39 = arith.mulf %38, %38 : vector<36x32xf32>
    %cst_15 = arith.constant dense<0.000000e+00> : vector<36xf32>
    %40 = vector.multi_reduction <add>, %39, %cst_15 [1] : vector<36x32xf32> to vector<36xf32>
    %41 = vector.shape_cast %40 : vector<36xf32> to vector<36x1xf32>
    %cst_16 = arith.constant 3.200000e+01 : f32
    %42 = vector.broadcast %cst_16 : f32 to vector<36x1xf32>
    %43 = arith.divf %41, %42 : vector<36x1xf32>
    %44 = vector.broadcast %36 : vector<36x1xf32> to vector<36x32xf32>
    %45 = arith.subf %32, %44 : vector<36x32xf32>
    %cst_17 = arith.constant 9.99999974E-6 : f32
    %46 = vector.broadcast %cst_17 : f32 to vector<36x1xf32>
    %47 = arith.addf %43, %46 : vector<36x1xf32>
    %48 = math.rsqrt %47 : vector<36x1xf32>
    %49 = vector.broadcast %48 : vector<36x1xf32> to vector<36x32xf32>
    %50 = arith.mulf %45, %49 : vector<36x32xf32>
    %51 = vector.broadcast %0 : vector<1x32xf32> to vector<36x32xf32>
    %52 = arith.mulf %50, %51 : vector<36x32xf32>
    %53 = vector.broadcast %1 : vector<1x32xf32> to vector<36x32xf32>
    %54 = arith.addf %52, %53 : vector<36x32xf32>
    %c0_18 = arith.constant 0 : index
    %c0_19 = arith.constant 0 : index
    %55 = vector.load %arg2[%c0_18, %c0_19] : memref<36x36xf32, #tpu.memory_space<vmem>>, vector<36x36xf32>
    %c0_20 = arith.constant 0 : index
    %c0_21 = arith.constant 0 : index
    %c0_22 = arith.constant 0 : index
    %56 = vector.load %arg5[%c0_20, %c0_21, %c0_22] : memref<2x32x128xf32, #tpu.memory_space<vmem>>, vector<1x32x128xf32>
    %57 = vector.shape_cast %56 : vector<1x32x128xf32> to vector<32x128xf32>
    %58 = vector.extract_strided_slice %57 {offsets = [0, 0], sizes = [32, 96], strides = [1, 1]} : vector<32x128xf32> to vector<32x96xf32>
    %59 = vector.extract_strided_slice %57 {offsets = [0, 96], sizes = [32, 32], strides = [1, 1]} : vector<32x128xf32> to vector<32x32xf32>
    %c0_23 = arith.constant 0 : index
    %c0_24 = arith.constant 0 : index
    %c0_25 = arith.constant 0 : index
    %60 = vector.load %arg7[%c0_23, %c0_24, %c0_25] : memref<2x3x128xf32, #tpu.memory_space<vmem>>, vector<1x3x128xf32>
    %61 = vector.shape_cast %60 : vector<1x3x128xf32> to vector<3x128xf32>
    %62 = vector.extract_strided_slice %61 {offsets = [0, 0], sizes = [1, 96], strides = [1, 1]} : vector<3x128xf32> to vector<1x96xf32>
    %63 = vector.extract_strided_slice %61 {offsets = [0, 96], sizes = [1, 32], strides = [1, 1]} : vector<3x128xf32> to vector<1x32xf32>
    %64 = vector.extract_strided_slice %61 {offsets = [1, 0], sizes = [1, 32], strides = [1, 1]} : vector<3x128xf32> to vector<1x32xf32>
    %65 = vector.extract_strided_slice %61 {offsets = [1, 32], sizes = [1, 32], strides = [1, 1]} : vector<3x128xf32> to vector<1x32xf32>
    %66 = vector.extract_strided_slice %61 {offsets = [1, 64], sizes = [1, 32], strides = [1, 1]} : vector<3x128xf32> to vector<1x32xf32>
    %67 = vector.extract_strided_slice %61 {offsets = [1, 96], sizes = [1, 32], strides = [1, 1]} : vector<3x128xf32> to vector<1x32xf32>
    %68 = vector.extract_strided_slice %61 {offsets = [2, 0], sizes = [1, 64], strides = [1, 1]} : vector<3x128xf32> to vector<1x64xf32>
    %69 = vector.extract_strided_slice %61 {offsets = [2, 64], sizes = [1, 32], strides = [1, 1]} : vector<3x128xf32> to vector<1x32xf32>
    %cst_26 = arith.constant dense<0.000000e+00> : vector<36x96xf32>
    %70 = tpu.matmul %54, %58, %cst_26 {dimension_numbers = #tpu.dot_dimension_numbers<[1], [0], [0], [1], [0, 0, 1, 1], [], []>} : vector<36x32xf32>, vector<32x96xf32>, vector<36x96xf32> -> vector<36x96xf32>
    %71 = vector.broadcast %62 : vector<1x96xf32> to vector<36x96xf32>
    %72 = arith.addf %70, %71 : vector<36x96xf32>
    %73 = vector.extract_strided_slice %72 {offsets = [0, 0], sizes = [36, 16], strides = [1, 1]} : vector<36x96xf32> to vector<36x16xf32>
    %74 = vector.extract_strided_slice %72 {offsets = [0, 32], sizes = [36, 16], strides = [1, 1]} : vector<36x96xf32> to vector<36x16xf32>
    %75 = vector.extract_strided_slice %72 {offsets = [0, 64], sizes = [36, 16], strides = [1, 1]} : vector<36x96xf32> to vector<36x16xf32>
    %cst_27 = arith.constant dense<0.000000e+00> : vector<36x36xf32>
    %76 = tpu.matmul %73, %74, %cst_27 {dimension_numbers = #tpu.dot_dimension_numbers<[1], [1], [0], [0], [0, 0, 1, 0], [], []>} : vector<36x16xf32>, vector<36x16xf32>, vector<36x36xf32> -> vector<36x36xf32>
    %77 = arith.addf %76, %55 : vector<36x36xf32>
    %cst_28 = arith.constant dense<0xFF800000> : vector<36xf32>
    %78 = vector.multi_reduction <maximumf>, %77, %cst_28 [1] : vector<36x36xf32> to vector<36xf32>
    %79 = vector.shape_cast %78 : vector<36xf32> to vector<36x1xf32>
    %80 = vector.broadcast %79 : vector<36x1xf32> to vector<36x36xf32>
    %81 = arith.subf %77, %80 : vector<36x36xf32>
    %82 = math.exp %81 : vector<36x36xf32>
    %cst_29 = arith.constant dense<0.000000e+00> : vector<36xf32>
    %83 = vector.multi_reduction <add>, %82, %cst_29 [1] : vector<36x36xf32> to vector<36xf32>
    %84 = vector.shape_cast %83 : vector<36xf32> to vector<36x1xf32>
    %85 = vector.broadcast %84 : vector<36x1xf32> to vector<36x36xf32>
    %86 = arith.divf %82, %85 : vector<36x36xf32>
    %cst_30 = arith.constant dense<0.000000e+00> : vector<36x16xf32>
    %87 = tpu.matmul %86, %75, %cst_30 {dimension_numbers = #tpu.dot_dimension_numbers<[1], [0], [0], [1], [0, 0, 1, 1], [], []>} : vector<36x36xf32>, vector<36x16xf32>, vector<36x16xf32> -> vector<36x16xf32>
    %c0_31 = arith.constant 0 : index
    %c0_32 = arith.constant 0 : index
    %88 = vector.load %arg11[%c0_31, %c0_32] : memref<36x32xf32, #tpu.memory_space<vmem>>, vector<36x16xf32>
    tpu.vector_store %arg11[%c0_31, %c0_32], %87 {strides = array<i32>} : memref<36x32xf32, #tpu.memory_space<vmem>>, vector<36x16xf32>,
    %89 = vector.extract_strided_slice %72 {offsets = [0, 16], sizes = [36, 16], strides = [1, 1]} : vector<36x96xf32> to vector<36x16xf32>
    %90 = vector.extract_strided_slice %72 {offsets = [0, 48], sizes = [36, 16], strides = [1, 1]} : vector<36x96xf32> to vector<36x16xf32>
    %91 = vector.extract_strided_slice %72 {offsets = [0, 80], sizes = [36, 16], strides = [1, 1]} : vector<36x96xf32> to vector<36x16xf32>
    %cst_33 = arith.constant dense<0.000000e+00> : vector<36x36xf32>
    %92 = tpu.matmul %89, %90, %cst_33 {dimension_numbers = #tpu.dot_dimension_numbers<[1], [1], [0], [0], [0, 0, 1, 0], [], []>} : vector<36x16xf32>, vector<36x16xf32>, vector<36x36xf32> -> vector<36x36xf32>
    %93 = arith.addf %92, %55 : vector<36x36xf32>
    %cst_34 = arith.constant dense<0xFF800000> : vector<36xf32>
    %94 = vector.multi_reduction <maximumf>, %93, %cst_34 [1] : vector<36x36xf32> to vector<36xf32>
    %95 = vector.shape_cast %94 : vector<36xf32> to vector<36x1xf32>
    %96 = vector.broadcast %95 : vector<36x1xf32> to vector<36x36xf32>
    %97 = arith.subf %93, %96 : vector<36x36xf32>
    %98 = math.exp %97 : vector<36x36xf32>
    %cst_35 = arith.constant dense<0.000000e+00> : vector<36xf32>
    %99 = vector.multi_reduction <add>, %98, %cst_35 [1] : vector<36x36xf32> to vector<36xf32>
    %100 = vector.shape_cast %99 : vector<36xf32> to vector<36x1xf32>
    %101 = vector.broadcast %100 : vector<36x1xf32> to vector<36x36xf32>
    %102 = arith.divf %98, %101 : vector<36x36xf32>
    %cst_36 = arith.constant dense<0.000000e+00> : vector<36x16xf32>
    %103 = tpu.matmul %102, %91, %cst_36 {dimension_numbers = #tpu.dot_dimension_numbers<[1], [0], [0], [1], [0, 0, 1, 1], [], []>} : vector<36x36xf32>, vector<36x16xf32>, vector<36x16xf32> -> vector<36x16xf32>
    %c0_37 = arith.constant 0 : index
    %c16 = arith.constant 16 : index
    %104 = vector.load %arg11[%c0_37, %c16] : memref<36x32xf32, #tpu.memory_space<vmem>>, vector<36x16xf32>
    tpu.vector_store %arg11[%c0_37, %c16], %103 {strides = array<i32>} : memref<36x32xf32, #tpu.memory_space<vmem>>, vector<36x16xf32>,
    %c0_38 = arith.constant 0 : index
    %c0_39 = arith.constant 0 : index
    %105 = vector.load %arg11[%c0_38, %c0_39] : memref<36x32xf32, #tpu.memory_space<vmem>>, vector<36x32xf32>
    %cst_40 = arith.constant dense<0.000000e+00> : vector<36x32xf32>
    %106 = tpu.matmul %105, %59, %cst_40 {dimension_numbers = #tpu.dot_dimension_numbers<[1], [0], [0], [1], [0, 0, 1, 1], [], []>} : vector<36x32xf32>, vector<32x32xf32>, vector<36x32xf32> -> vector<36x32xf32>
    %107 = vector.broadcast %63 : vector<1x32xf32> to vector<36x32xf32>
    %108 = arith.addf %106, %107 : vector<36x32xf32>
    %109 = arith.addf %108, %54 : vector<36x32xf32>
    %cst_41 = arith.constant dense<0.000000e+00> : vector<36xf32>
    %110 = vector.multi_reduction <add>, %109, %cst_41 [1] : vector<36x32xf32> to vector<36xf32>
    %111 = vector.shape_cast %110 : vector<36xf32> to vector<36x1xf32>
    %cst_42 = arith.constant 3.200000e+01 : f32
    %112 = vector.broadcast %cst_42 : f32 to vector<36x1xf32>
    %113 = arith.divf %111, %112 : vector<36x1xf32>
    %114 = vector.broadcast %113 : vector<36x1xf32> to vector<36x32xf32>
    %115 = arith.subf %109, %114 : vector<36x32xf32>
    %116 = arith.mulf %115, %115 : vector<36x32xf32>
    %cst_43 = arith.constant dense<0.000000e+00> : vector<36xf32>
    %117 = vector.multi_reduction <add>, %116, %cst_43 [1] : vector<36x32xf32> to vector<36xf32>
    %118 = vector.shape_cast %117 : vector<36xf32> to vector<36x1xf32>
    %cst_44 = arith.constant 3.200000e+01 : f32
    %119 = vector.broadcast %cst_44 : f32 to vector<36x1xf32>
    %120 = arith.divf %118, %119 : vector<36x1xf32>
    %121 = vector.broadcast %113 : vector<36x1xf32> to vector<36x32xf32>
    %122 = arith.subf %109, %121 : vector<36x32xf32>
    %cst_45 = arith.constant 9.99999974E-6 : f32
    %123 = vector.broadcast %cst_45 : f32 to vector<36x1xf32>
    %124 = arith.addf %120, %123 : vector<36x1xf32>
    %125 = math.rsqrt %124 : vector<36x1xf32>
    %126 = vector.broadcast %125 : vector<36x1xf32> to vector<36x32xf32>
    %127 = arith.mulf %122, %126 : vector<36x32xf32>
    %128 = vector.broadcast %64 : vector<1x32xf32> to vector<36x32xf32>
    %129 = arith.mulf %127, %128 : vector<36x32xf32>
    %130 = vector.broadcast %65 : vector<1x32xf32> to vector<36x32xf32>
    %131 = arith.addf %129, %130 : vector<36x32xf32>
    %c0_46 = arith.constant 0 : index
    %c0_47 = arith.constant 0 : index
    %c0_48 = arith.constant 0 : index
    %132 = vector.load %arg6[%c0_46, %c0_47, %c0_48] : memref<2x96x64xf32, #tpu.memory_space<vmem>>, vector<1x32x64xf32>
    %133 = vector.shape_cast %132 : vector<1x32x64xf32> to vector<32x64xf32>
    %c0_49 = arith.constant 0 : index
    %c32 = arith.constant 32 : index
    %c0_50 = arith.constant 0 : index
    %134 = vector.load %arg6[%c0_49, %c32, %c0_50] : memref<2x96x64xf32, #tpu.memory_space<vmem>>, vector<1x64x32xf32>
    %135 = vector.shape_cast %134 : vector<1x64x32xf32> to vector<64x32xf32>
    %cst_51 = arith.constant dense<0.000000e+00> : vector<36x64xf32>
    %136 = tpu.matmul %131, %133, %cst_51 {dimension_numbers = #tpu.dot_dimension_numbers<[1], [0], [0], [1], [0, 0, 1, 1], [], []>} : vector<36x32xf32>, vector<32x64xf32>, vector<36x64xf32> -> vector<36x64xf32>
    %137 = vector.broadcast %68 : vector<1x64xf32> to vector<36x64xf32>
    %138 = arith.addf %136, %137 : vector<36x64xf32>
    %139 = arith.mulf %138, %138 : vector<36x64xf32>
    %140 = arith.mulf %138, %139 : vector<36x64xf32>
    %cst_52 = arith.constant 4.471500e-02 : f32
    %141 = vector.broadcast %cst_52 : f32 to vector<36x64xf32>
    %142 = arith.mulf %141, %140 : vector<36x64xf32>
    %143 = arith.addf %138, %142 : vector<36x64xf32>
    %cst_53 = arith.constant 0.797884583 : f32
    %144 = vector.broadcast %cst_53 : f32 to vector<36x64xf32>
    %145 = arith.mulf %144, %143 : vector<36x64xf32>
    %146 = math.tanh %145 : vector<36x64xf32>
    %cst_54 = arith.constant 1.000000e+00 : f32
    %147 = vector.broadcast %cst_54 : f32 to vector<36x64xf32>
    %148 = arith.addf %147, %146 : vector<36x64xf32>
    %cst_55 = arith.constant 5.000000e-01 : f32
    %149 = vector.broadcast %cst_55 : f32 to vector<36x64xf32>
    %150 = arith.mulf %149, %148 : vector<36x64xf32>
    %151 = arith.mulf %138, %150 : vector<36x64xf32>
    %cst_56 = arith.constant dense<0.000000e+00> : vector<36x32xf32>
    %152 = tpu.matmul %151, %135, %cst_56 {dimension_numbers = #tpu.dot_dimension_numbers<[1], [0], [0], [1], [0, 0, 1, 1], [], []>} : vector<36x64xf32>, vector<64x32xf32>, vector<36x32xf32> -> vector<36x32xf32>
    %153 = vector.broadcast %69 : vector<1x32xf32> to vector<36x32xf32>
    %154 = arith.addf %152, %153 : vector<36x32xf32>
    %155 = arith.addf %154, %131 : vector<36x32xf32>
    %cst_57 = arith.constant dense<0.000000e+00> : vector<36xf32>
    %156 = vector.multi_reduction <add>, %155, %cst_57 [1] : vector<36x32xf32> to vector<36xf32>
    %157 = vector.shape_cast %156 : vector<36xf32> to vector<36x1xf32>
    %cst_58 = arith.constant 3.200000e+01 : f32
    %158 = vector.broadcast %cst_58 : f32 to vector<36x1xf32>
    %159 = arith.divf %157, %158 : vector<36x1xf32>
    %160 = vector.broadcast %159 : vector<36x1xf32> to vector<36x32xf32>
    %161 = arith.subf %155, %160 : vector<36x32xf32>
    %162 = arith.mulf %161, %161 : vector<36x32xf32>
    %cst_59 = arith.constant dense<0.000000e+00> : vector<36xf32>
    %163 = vector.multi_reduction <add>, %162, %cst_59 [1] : vector<36x32xf32> to vector<36xf32>
    %164 = vector.shape_cast %163 : vector<36xf32> to vector<36x1xf32>
    %cst_60 = arith.constant 3.200000e+01 : f32
    %165 = vector.broadcast %cst_60 : f32 to vector<36x1xf32>
    %166 = arith.divf %164, %165 : vector<36x1xf32>
    %167 = vector.broadcast %159 : vector<36x1xf32> to vector<36x32xf32>
    %168 = arith.subf %155, %167 : vector<36x32xf32>
    %cst_61 = arith.constant 9.99999974E-6 : f32
    %169 = vector.broadcast %cst_61 : f32 to vector<36x1xf32>
    %170 = arith.addf %166, %169 : vector<36x1xf32>
    %171 = math.rsqrt %170 : vector<36x1xf32>
    %172 = vector.broadcast %171 : vector<36x1xf32> to vector<36x32xf32>
    %173 = arith.mulf %168, %172 : vector<36x32xf32>
    %174 = vector.broadcast %66 : vector<1x32xf32> to vector<36x32xf32>
    %175 = arith.mulf %173, %174 : vector<36x32xf32>
    %176 = vector.broadcast %67 : vector<1x32xf32> to vector<36x32xf32>
    %177 = arith.addf %175, %176 : vector<36x32xf32>
    %c1_62 = arith.constant 1 : index
    %c0_63 = arith.constant 0 : index
    %c0_64 = arith.constant 0 : index
    %178 = vector.load %arg5[%c1_62, %c0_63, %c0_64] : memref<2x32x128xf32, #tpu.memory_space<vmem>>, vector<1x32x128xf32>
    %179 = vector.shape_cast %178 : vector<1x32x128xf32> to vector<32x128xf32>
    %180 = vector.extract_strided_slice %179 {offsets = [0, 0], sizes = [32, 96], strides = [1, 1]} : vector<32x128xf32> to vector<32x96xf32>
    %181 = vector.extract_strided_slice %179 {offsets = [0, 96], sizes = [32, 32], strides = [1, 1]} : vector<32x128xf32> to vector<32x32xf32>
    %c1_65 = arith.constant 1 : index
    %c0_66 = arith.constant 0 : index
    %c0_67 = arith.constant 0 : index
    %182 = vector.load %arg7[%c1_65, %c0_66, %c0_67] : memref<2x3x128xf32, #tpu.memory_space<vmem>>, vector<1x3x128xf32>
    %183 = vector.shape_cast %182 : vector<1x3x128xf32> to vector<3x128xf32>
    %184 = vector.extract_strided_slice %183 {offsets = [0, 0], sizes = [1, 96], strides = [1, 1]} : vector<3x128xf32> to vector<1x96xf32>
    %185 = vector.extract_strided_slice %183 {offsets = [0, 96], sizes = [1, 32], strides = [1, 1]} : vector<3x128xf32> to vector<1x32xf32>
    %186 = vector.extract_strided_slice %183 {offsets = [1, 0], sizes = [1, 32], strides = [1, 1]} : vector<3x128xf32> to vector<1x32xf32>
    %187 = vector.extract_strided_slice %183 {offsets = [1, 32], sizes = [1, 32], strides = [1, 1]} : vector<3x128xf32> to vector<1x32xf32>
    %188 = vector.extract_strided_slice %183 {offsets = [1, 64], sizes = [1, 32], strides = [1, 1]} : vector<3x128xf32> to vector<1x32xf32>
    %189 = vector.extract_strided_slice %183 {offsets = [1, 96], sizes = [1, 32], strides = [1, 1]} : vector<3x128xf32> to vector<1x32xf32>
    %190 = vector.extract_strided_slice %183 {offsets = [2, 0], sizes = [1, 64], strides = [1, 1]} : vector<3x128xf32> to vector<1x64xf32>
    %191 = vector.extract_strided_slice %183 {offsets = [2, 64], sizes = [1, 32], strides = [1, 1]} : vector<3x128xf32> to vector<1x32xf32>
    %cst_68 = arith.constant dense<0.000000e+00> : vector<36x96xf32>
    %192 = tpu.matmul %177, %180, %cst_68 {dimension_numbers = #tpu.dot_dimension_numbers<[1], [0], [0], [1], [0, 0, 1, 1], [], []>} : vector<36x32xf32>, vector<32x96xf32>, vector<36x96xf32> -> vector<36x96xf32>
    %193 = vector.broadcast %184 : vector<1x96xf32> to vector<36x96xf32>
    %194 = arith.addf %192, %193 : vector<36x96xf32>
    %195 = vector.extract_strided_slice %194 {offsets = [0, 0], sizes = [36, 16], strides = [1, 1]} : vector<36x96xf32> to vector<36x16xf32>
    %196 = vector.extract_strided_slice %194 {offsets = [0, 32], sizes = [36, 16], strides = [1, 1]} : vector<36x96xf32> to vector<36x16xf32>
    %197 = vector.extract_strided_slice %194 {offsets = [0, 64], sizes = [36, 16], strides = [1, 1]} : vector<36x96xf32> to vector<36x16xf32>
    %cst_69 = arith.constant dense<0.000000e+00> : vector<36x36xf32>
    %198 = tpu.matmul %195, %196, %cst_69 {dimension_numbers = #tpu.dot_dimension_numbers<[1], [1], [0], [0], [0, 0, 1, 0], [], []>} : vector<36x16xf32>, vector<36x16xf32>, vector<36x36xf32> -> vector<36x36xf32>
    %199 = arith.addf %198, %55 : vector<36x36xf32>
    %cst_70 = arith.constant dense<0xFF800000> : vector<36xf32>
    %200 = vector.multi_reduction <maximumf>, %199, %cst_70 [1] : vector<36x36xf32> to vector<36xf32>
    %201 = vector.shape_cast %200 : vector<36xf32> to vector<36x1xf32>
    %202 = vector.broadcast %201 : vector<36x1xf32> to vector<36x36xf32>
    %203 = arith.subf %199, %202 : vector<36x36xf32>
    %204 = math.exp %203 : vector<36x36xf32>
    %cst_71 = arith.constant dense<0.000000e+00> : vector<36xf32>
    %205 = vector.multi_reduction <add>, %204, %cst_71 [1] : vector<36x36xf32> to vector<36xf32>
    %206 = vector.shape_cast %205 : vector<36xf32> to vector<36x1xf32>
    %207 = vector.broadcast %206 : vector<36x1xf32> to vector<36x36xf32>
    %208 = arith.divf %204, %207 : vector<36x36xf32>
    %cst_72 = arith.constant dense<0.000000e+00> : vector<36x16xf32>
    %209 = tpu.matmul %208, %197, %cst_72 {dimension_numbers = #tpu.dot_dimension_numbers<[1], [0], [0], [1], [0, 0, 1, 1], [], []>} : vector<36x36xf32>, vector<36x16xf32>, vector<36x16xf32> -> vector<36x16xf32>
    %c0_73 = arith.constant 0 : index
    %c0_74 = arith.constant 0 : index
    %210 = vector.load %arg11[%c0_73, %c0_74] : memref<36x32xf32, #tpu.memory_space<vmem>>, vector<36x16xf32>
    tpu.vector_store %arg11[%c0_73, %c0_74], %209 {strides = array<i32>} : memref<36x32xf32, #tpu.memory_space<vmem>>, vector<36x16xf32>,
    %211 = vector.extract_strided_slice %194 {offsets = [0, 16], sizes = [36, 16], strides = [1, 1]} : vector<36x96xf32> to vector<36x16xf32>
    %212 = vector.extract_strided_slice %194 {offsets = [0, 48], sizes = [36, 16], strides = [1, 1]} : vector<36x96xf32> to vector<36x16xf32>
    %213 = vector.extract_strided_slice %194 {offsets = [0, 80], sizes = [36, 16], strides = [1, 1]} : vector<36x96xf32> to vector<36x16xf32>
    %cst_75 = arith.constant dense<0.000000e+00> : vector<36x36xf32>
    %214 = tpu.matmul %211, %212, %cst_75 {dimension_numbers = #tpu.dot_dimension_numbers<[1], [1], [0], [0], [0, 0, 1, 0], [], []>} : vector<36x16xf32>, vector<36x16xf32>, vector<36x36xf32> -> vector<36x36xf32>
    %215 = arith.addf %214, %55 : vector<36x36xf32>
    %cst_76 = arith.constant dense<0xFF800000> : vector<36xf32>
    %216 = vector.multi_reduction <maximumf>, %215, %cst_76 [1] : vector<36x36xf32> to vector<36xf32>
    %217 = vector.shape_cast %216 : vector<36xf32> to vector<36x1xf32>
    %218 = vector.broadcast %217 : vector<36x1xf32> to vector<36x36xf32>
    %219 = arith.subf %215, %218 : vector<36x36xf32>
    %220 = math.exp %219 : vector<36x36xf32>
    %cst_77 = arith.constant dense<0.000000e+00> : vector<36xf32>
    %221 = vector.multi_reduction <add>, %220, %cst_77 [1] : vector<36x36xf32> to vector<36xf32>
    %222 = vector.shape_cast %221 : vector<36xf32> to vector<36x1xf32>
    %223 = vector.broadcast %222 : vector<36x1xf32> to vector<36x36xf32>
    %224 = arith.divf %220, %223 : vector<36x36xf32>
    %cst_78 = arith.constant dense<0.000000e+00> : vector<36x16xf32>
    %225 = tpu.matmul %224, %213, %cst_78 {dimension_numbers = #tpu.dot_dimension_numbers<[1], [0], [0], [1], [0, 0, 1, 1], [], []>} : vector<36x36xf32>, vector<36x16xf32>, vector<36x16xf32> -> vector<36x16xf32>
    %c0_79 = arith.constant 0 : index
    %c16_80 = arith.constant 16 : index
    %226 = vector.load %arg11[%c0_79, %c16_80] : memref<36x32xf32, #tpu.memory_space<vmem>>, vector<36x16xf32>
    tpu.vector_store %arg11[%c0_79, %c16_80], %225 {strides = array<i32>} : memref<36x32xf32, #tpu.memory_space<vmem>>, vector<36x16xf32>,
    %c0_81 = arith.constant 0 : index
    %c0_82 = arith.constant 0 : index
    %227 = vector.load %arg11[%c0_81, %c0_82] : memref<36x32xf32, #tpu.memory_space<vmem>>, vector<36x32xf32>
    %cst_83 = arith.constant dense<0.000000e+00> : vector<36x32xf32>
    %228 = tpu.matmul %227, %181, %cst_83 {dimension_numbers = #tpu.dot_dimension_numbers<[1], [0], [0], [1], [0, 0, 1, 1], [], []>} : vector<36x32xf32>, vector<32x32xf32>, vector<36x32xf32> -> vector<36x32xf32>
    %229 = vector.broadcast %185 : vector<1x32xf32> to vector<36x32xf32>
    %230 = arith.addf %228, %229 : vector<36x32xf32>
    %231 = arith.addf %230, %177 : vector<36x32xf32>
    %cst_84 = arith.constant dense<0.000000e+00> : vector<36xf32>
    %232 = vector.multi_reduction <add>, %231, %cst_84 [1] : vector<36x32xf32> to vector<36xf32>
    %233 = vector.shape_cast %232 : vector<36xf32> to vector<36x1xf32>
    %cst_85 = arith.constant 3.200000e+01 : f32
    %234 = vector.broadcast %cst_85 : f32 to vector<36x1xf32>
    %235 = arith.divf %233, %234 : vector<36x1xf32>
    %236 = vector.broadcast %235 : vector<36x1xf32> to vector<36x32xf32>
    %237 = arith.subf %231, %236 : vector<36x32xf32>
    %238 = arith.mulf %237, %237 : vector<36x32xf32>
    %cst_86 = arith.constant dense<0.000000e+00> : vector<36xf32>
    %239 = vector.multi_reduction <add>, %238, %cst_86 [1] : vector<36x32xf32> to vector<36xf32>
    %240 = vector.shape_cast %239 : vector<36xf32> to vector<36x1xf32>
    %cst_87 = arith.constant 3.200000e+01 : f32
    %241 = vector.broadcast %cst_87 : f32 to vector<36x1xf32>
    %242 = arith.divf %240, %241 : vector<36x1xf32>
    %243 = vector.broadcast %235 : vector<36x1xf32> to vector<36x32xf32>
    %244 = arith.subf %231, %243 : vector<36x32xf32>
    %cst_88 = arith.constant 9.99999974E-6 : f32
    %245 = vector.broadcast %cst_88 : f32 to vector<36x1xf32>
    %246 = arith.addf %242, %245 : vector<36x1xf32>
    %247 = math.rsqrt %246 : vector<36x1xf32>
    %248 = vector.broadcast %247 : vector<36x1xf32> to vector<36x32xf32>
    %249 = arith.mulf %244, %248 : vector<36x32xf32>
    %250 = vector.broadcast %186 : vector<1x32xf32> to vector<36x32xf32>
    %251 = arith.mulf %249, %250 : vector<36x32xf32>
    %252 = vector.broadcast %187 : vector<1x32xf32> to vector<36x32xf32>
    %253 = arith.addf %251, %252 : vector<36x32xf32>
    %c1_89 = arith.constant 1 : index
    %c0_90 = arith.constant 0 : index
    %c0_91 = arith.constant 0 : index
    %254 = vector.load %arg6[%c1_89, %c0_90, %c0_91] : memref<2x96x64xf32, #tpu.memory_space<vmem>>, vector<1x32x64xf32>
    %255 = vector.shape_cast %254 : vector<1x32x64xf32> to vector<32x64xf32>
    %c1_92 = arith.constant 1 : index
    %c32_93 = arith.constant 32 : index
    %c0_94 = arith.constant 0 : index
    %256 = vector.load %arg6[%c1_92, %c32_93, %c0_94] : memref<2x96x64xf32, #tpu.memory_space<vmem>>, vector<1x64x32xf32>
    %257 = vector.shape_cast %256 : vector<1x64x32xf32> to vector<64x32xf32>
    %cst_95 = arith.constant dense<0.000000e+00> : vector<36x64xf32>
    %258 = tpu.matmul %253, %255, %cst_95 {dimension_numbers = #tpu.dot_dimension_numbers<[1], [0], [0], [1], [0, 0, 1, 1], [], []>} : vector<36x32xf32>, vector<32x64xf32>, vector<36x64xf32> -> vector<36x64xf32>
    %259 = vector.broadcast %190 : vector<1x64xf32> to vector<36x64xf32>
    %260 = arith.addf %258, %259 : vector<36x64xf32>
    %261 = arith.mulf %260, %260 : vector<36x64xf32>
    %262 = arith.mulf %260, %261 : vector<36x64xf32>
    %cst_96 = arith.constant 4.471500e-02 : f32
    %263 = vector.broadcast %cst_96 : f32 to vector<36x64xf32>
    %264 = arith.mulf %263, %262 : vector<36x64xf32>
    %265 = arith.addf %260, %264 : vector<36x64xf32>
    %cst_97 = arith.constant 0.797884583 : f32
    %266 = vector.broadcast %cst_97 : f32 to vector<36x64xf32>
    %267 = arith.mulf %266, %265 : vector<36x64xf32>
    %268 = math.tanh %267 : vector<36x64xf32>
    %cst_98 = arith.constant 1.000000e+00 : f32
    %269 = vector.broadcast %cst_98 : f32 to vector<36x64xf32>
    %270 = arith.addf %269, %268 : vector<36x64xf32>
    %cst_99 = arith.constant 5.000000e-01 : f32
    %271 = vector.broadcast %cst_99 : f32 to vector<36x64xf32>
    %272 = arith.mulf %271, %270 : vector<36x64xf32>
    %273 = arith.mulf %260, %272 : vector<36x64xf32>
    %cst_100 = arith.constant dense<0.000000e+00> : vector<36x32xf32>
    %274 = tpu.matmul %273, %257, %cst_100 {dimension_numbers = #tpu.dot_dimension_numbers<[1], [0], [0], [1], [0, 0, 1, 1], [], []>} : vector<36x64xf32>, vector<64x32xf32>, vector<36x32xf32> -> vector<36x32xf32>
    %275 = vector.broadcast %191 : vector<1x32xf32> to vector<36x32xf32>
    %276 = arith.addf %274, %275 : vector<36x32xf32>
    %277 = arith.addf %276, %253 : vector<36x32xf32>
    %cst_101 = arith.constant dense<0.000000e+00> : vector<36xf32>
    %278 = vector.multi_reduction <add>, %277, %cst_101 [1] : vector<36x32xf32> to vector<36xf32>
    %279 = vector.shape_cast %278 : vector<36xf32> to vector<36x1xf32>
    %cst_102 = arith.constant 3.200000e+01 : f32
    %280 = vector.broadcast %cst_102 : f32 to vector<36x1xf32>
    %281 = arith.divf %279, %280 : vector<36x1xf32>
    %282 = vector.broadcast %281 : vector<36x1xf32> to vector<36x32xf32>
    %283 = arith.subf %277, %282 : vector<36x32xf32>
    %284 = arith.mulf %283, %283 : vector<36x32xf32>
    %cst_103 = arith.constant dense<0.000000e+00> : vector<36xf32>
    %285 = vector.multi_reduction <add>, %284, %cst_103 [1] : vector<36x32xf32> to vector<36xf32>
    %286 = vector.shape_cast %285 : vector<36xf32> to vector<36x1xf32>
    %cst_104 = arith.constant 3.200000e+01 : f32
    %287 = vector.broadcast %cst_104 : f32 to vector<36x1xf32>
    %288 = arith.divf %286, %287 : vector<36x1xf32>
    %289 = vector.broadcast %281 : vector<36x1xf32> to vector<36x32xf32>
    %290 = arith.subf %277, %289 : vector<36x32xf32>
    %cst_105 = arith.constant 9.99999974E-6 : f32
    %291 = vector.broadcast %cst_105 : f32 to vector<36x1xf32>
    %292 = arith.addf %288, %291 : vector<36x1xf32>
    %293 = math.rsqrt %292 : vector<36x1xf32>
    %294 = vector.broadcast %293 : vector<36x1xf32> to vector<36x32xf32>
    %295 = arith.mulf %290, %294 : vector<36x32xf32>
    %296 = vector.broadcast %188 : vector<1x32xf32> to vector<36x32xf32>
    %297 = arith.mulf %295, %296 : vector<36x32xf32>
    %298 = vector.broadcast %189 : vector<1x32xf32> to vector<36x32xf32>
    %299 = arith.addf %297, %298 : vector<36x32xf32>
    %300 = vector.extract_strided_slice %299 {offsets = [0, 0], sizes = [1, 32], strides = [1, 1]} : vector<36x32xf32> to vector<1x32xf32>
    %301 = vector.extract_strided_slice %299 {offsets = [18, 0], sizes = [1, 32], strides = [1, 1]} : vector<36x32xf32> to vector<1x32xf32>
    %302 = tpu.concatenate %300, %301 in 0 : vector<1x32xf32>, vector<1x32xf32> -> vector<2x32xf32>
    %c0_106 = arith.constant 0 : index
    %c0_107 = arith.constant 0 : index
    %303 = vector.load %arg8[%c0_106, %c0_107] : memref<32x64xf32, #tpu.memory_space<vmem>>, vector<32x32xf32>
    %c0_108 = arith.constant 0 : index
    %c32_109 = arith.constant 32 : index
    %304 = vector.load %arg8[%c0_108, %c32_109] : memref<32x64xf32, #tpu.memory_space<vmem>>, vector<32x2xf32>
    %c2 = arith.constant 2 : index
    %c0_110 = arith.constant 0 : index
    %305 = vector.load %arg9[%c2, %c0_110] : memref<4x32xf32, #tpu.memory_space<vmem>>, vector<1x32xf32>
    %c3 = arith.constant 3 : index
    %c0_111 = arith.constant 0 : index
    %306 = vector.load %arg9[%c3, %c0_111] : memref<4x32xf32, #tpu.memory_space<vmem>>, vector<1x2xf32>
    %cst_112 = arith.constant dense<0.000000e+00> : vector<2x32xf32>
    %307 = tpu.matmul %302, %303, %cst_112 {dimension_numbers = #tpu.dot_dimension_numbers<[1], [0], [0], [1], [0, 0, 1, 1], [], []>} : vector<2x32xf32>, vector<32x32xf32>, vector<2x32xf32> -> vector<2x32xf32>
    %308 = vector.broadcast %305 : vector<1x32xf32> to vector<2x32xf32>
    %309 = arith.addf %307, %308 : vector<2x32xf32>
    %310 = math.tanh %309 : vector<2x32xf32>
    %cst_113 = arith.constant dense<0.000000e+00> : vector<2x2xf32>
    %311 = tpu.matmul %310, %304, %cst_113 {dimension_numbers = #tpu.dot_dimension_numbers<[1], [0], [0], [1], [0, 0, 1, 1], [], []>} : vector<2x32xf32>, vector<32x2xf32>, vector<2x2xf32> -> vector<2x2xf32>
    %312 = vector.broadcast %306 : vector<1x2xf32> to vector<2x2xf32>
    %313 = arith.addf %311, %312 : vector<2x2xf32>
    %c0_114 = arith.constant 0 : index
    %c0_115 = arith.constant 0 : index
    %314 = vector.load %arg10[%c0_114, %c0_115] : memref<2x2xf32, #tpu.memory_space<vmem>>, vector<2x2xf32>
    tpu.vector_store %arg10[%c0_114, %c0_115], %313 {strides = array<i32>} : memref<2x2xf32, #tpu.memory_space<vmem>>, vector<2x2xf32>,
    return
  }
  func.func @transform_0(%arg0: i32) -> (i32, i32) {
    %c0_i32 = arith.constant 0 : i32
    %c0_i32_0 = arith.constant 0 : i32
    %c0_i32_1 = arith.constant 0 : i32
    return %c0_i32, %c0_i32_0 : i32, i32
  }
  func.func @transform_1(%arg0: i32) -> (i32, i32) {
    %c0_i32 = arith.constant 0 : i32
    %c0_i32_0 = arith.constant 0 : i32
    %c0_i32_1 = arith.constant 0 : i32
    return %c0_i32, %c0_i32_0 : i32, i32
  }
  func.func @transform_2(%arg0: i32) -> (i32, i32) {
    %c0_i32 = arith.constant 0 : i32
    %c0_i32_0 = arith.constant 0 : i32
    %c0_i32_1 = arith.constant 0 : i32
    return %c0_i32, %c0_i32_0 : i32, i32
  }
  func.func @transform_3(%arg0: i32) -> (i32, i32) {
    %c0_i32 = arith.constant 0 : i32
    %c0_i32_0 = arith.constant 0 : i32
    %c0_i32_1 = arith.constant 0 : i32
    return %c0_i32, %c0_i32_0 : i32, i32
  }
  func.func @transform_4(%arg0: i32) -> (i32, i32, i32) {
    %c0_i32 = arith.constant 0 : i32
    %c0_i32_0 = arith.constant 0 : i32
    %c0_i32_1 = arith.constant 0 : i32
    %c0_i32_2 = arith.constant 0 : i32
    return %c0_i32, %c0_i32_0, %c0_i32_1 : i32, i32, i32
  }
  func.func @transform_5(%arg0: i32) -> (i32, i32, i32) {
    %c0_i32 = arith.constant 0 : i32
    %c0_i32_0 = arith.constant 0 : i32
    %c0_i32_1 = arith.constant 0 : i32
    %c0_i32_2 = arith.constant 0 : i32
    return %c0_i32, %c0_i32_0, %c0_i32_1 : i32, i32, i32
  }
  func.func @transform_6(%arg0: i32) -> (i32, i32, i32) {
    %c0_i32 = arith.constant 0 : i32
    %c0_i32_0 = arith.constant 0 : i32
    %c0_i32_1 = arith.constant 0 : i32
    %c0_i32_2 = arith.constant 0 : i32
    return %c0_i32, %c0_i32_0, %c0_i32_1 : i32, i32, i32
  }
  func.func @transform_7(%arg0: i32) -> (i32, i32) {
    %c0_i32 = arith.constant 0 : i32
    %c0_i32_0 = arith.constant 0 : i32
    %c0_i32_1 = arith.constant 0 : i32
    return %c0_i32, %c0_i32_0 : i32, i32
  }
  func.func @transform_8(%arg0: i32) -> (i32, i32) {
    %c0_i32 = arith.constant 0 : i32
    %c0_i32_0 = arith.constant 0 : i32
    %c0_i32_1 = arith.constant 0 : i32
    return %c0_i32, %c0_i32_0 : i32, i32
  }
  func.func @transform_9(%arg0: i32) -> (i32, i32) {
    %c0_i32 = arith.constant 0 : i32
    %c0_i32_0 = arith.constant 0 : i32
    %c0_i32_1 = arith.constant 0 : i32
    return %c0_i32, %c0_i32_0 : i32, i32
  }
}

</mosaic_0001>

<bundles_post_ra>
// kernel: eq.8
= control target key start
LH: loop header
LB: loop body
LE: loop exit
PB: predicated region body
PF: predicated region fallthrough
CT: control target
= control target key end

     0   :  { %vm7_vm0 = vcmask 146432   ;;  %vm13_vm1 = vcmask 294032   ;;  %s39_s0 = inlined_call_operand.vmem [shape: s32[2,18], index: 0, kind: input, shape index: {}]   ;;  %s40_s1 = inlined_call_operand.vmem [shape: s32[36], index: 1, kind: output, shape index: {}]  }
   0x1   :  { %v4_v0 = vld [vmem:[%s39_s0] sm:$0x3]  ;;  %s22_s0 = smov 18  }
   0x2   :  { %5 = vst [vmem:[#allocation1] sm:$0x3] %v4_v0 }
   0x9   :  { %v10_v1 = vld [vmem:[#allocation1 + $0x1] sm:$0x1]   ;;  %v6_v2 = vld [vmem:[#allocation1] sm:$0x1]  }
   0xa   :  { %11 = vrot.lane.b32.xlu0 %v10_v1, %s22_s0  ;;  %8 = vst.msk [vmem:[#allocation0] sm:$0x1] %vm7_vm0, %v6_v2  }
  0x7c   :  { %v12_v3 = vpop.permute.xlu0 %11  }
  0x7d   :  { %14 = vst.msk [vmem:[#allocation0] sm:$0x1] %vm13_vm1, %v12_v3  }
  0x84   :  { %v18_v4 = vld [vmem:[#allocation0] sm:$0x1] }
  0x85   :  { %20 = vst [vmem:[%s40_s1] sm:$0x1] %v18_v4 }

// kernel: prefix_tuned_roberta_forward.1
= control target key start
LH: loop header
LB: loop body
LE: loop exit
PB: predicated region body
PF: predicated region fallthrough
CT: control target
= control target key end

     0   :  { %vm40_vm0 = vcmask 261120   ;;  %s5440_s0 = inlined_call_operand.vmem [shape: f32[36,32], index: 0, kind: input, shape index: {}]   ;;  %s5441_s1 = inlined_call_operand.vmem [shape: f32[36,36], index: 1, kind: input, shape index: {}]   ;;  %s5442_s2 = inlined_call_operand.vmem [shape: f32[36,32], index: 2, kind: input, shape index: {}]   ;;  %s5443_s3 = inlined_call_operand.vmem [shape: f32[36,1], index: 3, kind: input, shape index: {}]   ;;  %s5444_s4 = inlined_call_operand.vmem [shape: f32[2,32,128], index: 4, kind: input, shape index: {}]   ;;  %s5445_s5 = inlined_call_operand.vmem [shape: f32[2,96,64], index: 5, kind: input, shape index: {}]   ;;  %s5446_s6 = inlined_call_operand.vmem [shape: f32[2,3,128], index: 6, kind: input, shape index: {}]   ;;  %s5447_s7 = inlined_call_operand.vmem [shape: f32[32,64], index: 7, kind: input, shape index: {}]   ;;  %s5448_s8 = inlined_call_operand.vmem [shape: f32[4,32], index: 8, kind: input, shape index: {}]   ;;  %s5449_s9 = inlined_call_operand.hbm [shape: f32[2,2], index: 9, kind: output, shape index: {}]  }
   0x1   :  { %v4295_v0 = vld [vmem:[%s5440_s0] sm:$0xff]  ;;  %v4300_v1 = vld [vmem:[%s5440_s0 + $0x10] sm:$0xff]  ;;  %v4305_v2 = vld [vmem:[%s5440_s0 + $0x8] sm:$0xff] }
   0x2   :  { %v41_v3 = vsel %vm40_vm0, %v4295_v0, 0.0  ;;  %v47_v4 = vsel %vm40_vm0, %v4300_v1, 0.0  ;;  %v4314_v5 = vld [vmem:[%s5440_s0 + $0x18] sm:$0xff] }
   0x3   :  { %42 = vadd.xlane.f32.xlu0 %v41_v3  ;;  %48 = vadd.xlane.f32.xlu1 %v47_v4 }
   0x4   :  { %14 = vsyncpa [#allocation4], 0  ;;  %v44_v6 = vsel %vm40_vm0, %v4305_v2, 0.0  ;;  %v50_v7 = vsel %vm40_vm0, %v4314_v5, 0.0  ;;  %v4323_v8 = vld [vmem:[%s5440_s0 + $0x20] sm:$0xf] }
   0x5   :  { %vm53_vm1 = vcmask 257024   ;;  %v4230_v10 = vmov 0   ;;  %v127_v31 = vld [vmem:[%s5443_s3 + $0x8] sm:$0xff]  ;;  %v128_v32 = vld [vmem:[%s5443_s3 + $0x10] sm:$0xff]  ;;  %v129_v34 = vld [vmem:[%s5443_s3 + $0x18] sm:$0xff]  ;;  %vm4232_vm12 = vmmov 0  }
   0x6   :  { %v54_v9 = vsel %vm53_vm1, %v4323_v8, 0.0  ;;  %3934 = vset.pattern.permute.xlu1 %v4230_v10  ;;  %3933 = vset.pattern.permute.xlu0 %v4230_v10  ;;  %vm132_vm2 = vcmp.gt.f32.partialorder %v127_v31, 0.5  ;;  %vm133_vm3 = vcmp.gt.f32.partialorder %v128_v32, 0.5  ;;  %v126_v35 = vld [vmem:[%s5443_s3] sm:$0xff]  ;;  %vm134_vm4 = vcmp.gt.f32.partialorder %v129_v34, 0.5  ;;  %s4235_s28 = smov 80  }
   0x7   :  { %45 = vadd.xlane.f32.xlu0 %v44_v6  ;;  %51 = vadd.xlane.f32.xlu1 %v50_v7  ;;  %v137_v33 = vsel %vm132_vm2, 1, %v4230_v10  ;;  %v138_v36 = vsel %vm133_vm3, 1, %v4230_v10  ;;  %vm131_vm5 = vcmp.gt.f32.partialorder %v126_v35, 0.5  ;;  %v139_v37 = vsel %vm134_vm4, 1, %v4230_v10  ;;  %v130_v44 = vld [vmem:[%s5443_s3 + $0x20] sm:$0xf] }
   0x8   :  { %v136_v38 = vsel %vm131_vm5, 1, %v4230_v10  ;;  %vm135_vm6 = vcmp.gt.f32.partialorder %v130_v44, 0.5  ;;  %v4375_v60 = vld [vmem:[%s5448_s8] ss:$0 sm:$0xff]  ;;  %v4381_v63 = vld [vmem:[%s5448_s8 + $0x1] ss:$0 sm:$0xff] }
   0x9   :  { %v140_v45 = vsel %vm135_vm6, 1, %v4230_v10  ;;  %v166_v10 = vld [vmem:[%s5442_s2] sm:$0xff]  ;;  %s4234_s3 = smov 96   ;;  %s4236_s29 = smov 112   ;;  %vm385_vm13 = vcmask 130048   ;;  %vm496_vm15 = vcmask 293888  }
   0xa   :  { %s4237_s30 = smov 64   ;;  %vm4557_vm14 = vmpackc.low %vm385_vm13, %vm385_vm13  ;;  %vm509_vm2 = vcmask 289792   ;;  %vm582_vm3 = vcmask 1043456   ;;  %s4239_s19 = smov 32   ;;  %vm679_vm4 = vcmask 125952   ;;  %vm1007_vm5 = vcmask 261248  }
   0xb   :  { %55 = vadd.xlane.f32.xlu0 %v54_v9  ;;  %s4240_s20 = smov 16   ;;  %vm1012_vm6 = vcmask 257152   ;;  %s4241_s14 = smov [#allocation3]  }
   0xc   :  { %s3066_s15 = sshll.u32 %s4241_s14, 4  ;;  %s3067_s15 = int_to_ptr.vmem [resolvable:$true] %s3066_s15 }
   0xd   :  { %s4206_s16 = scalar_lea.vmem %s3067_s15, 32  ;;  %p4211_p1 = scmp.lt.s32.totalorder %s3067_s15, %s3067_s15 }
   0xe   :  { %p4207_p0 = scmp.ne.s32.totalorder %s3067_s15, %s4206_s16  ;;  %p4212_p2 = scmp.lt.s32.totalorder %s4206_s16, %s4206_s16 }
  0x10   :  { %p4213_p3 = por %p4212_p2, %p4211_p1 }
  0x12   :  { %p4214_p4 = pnand %p4213_p3, %p4207_p0 }
  0x90   :  { %v43_v11 = vpop.xlane.xlu0 %42  ;;  %v49_v12 = vpop.xlane.xlu1 %48 }
  0x91   :  { %v58_v13 = vmul.f32 0.03125, %v43_v11  ;;  %v60_v14 = vmul.f32 0.03125, %v49_v12 }
  0x93   :  { %v4328_v15 = vsub.f32 %v4295_v0, %v58_v13  ;;  %v4331_v16 = vsub.f32 %v4300_v1, %v60_v14 }
  0x94   :  { %v46_v17 = vpop.xlane.xlu0 %45  ;;  %v52_v18 = vpop.xlane.xlu1 %51 }
  0x95   :  { %v59_v19 = vmul.f32 0.03125, %v46_v17  ;;  %v61_v20 = vmul.f32 0.03125, %v52_v18  ;;  %v68_v21 = vmul.f32 %v4328_v15, %v4328_v15  ;;  %v70_v22 = vmul.f32 %v4331_v16, %v4331_v16 }
  0x97   :  { %v4338_v23 = vsub.f32 %v4305_v2, %v59_v19  ;;  %v4341_v24 = vsub.f32 %v4314_v5, %v61_v20  ;;  %v73_v25 = vsel %vm40_vm0, %v68_v21, 0.0  ;;  %v79_v26 = vsel %vm40_vm0, %v70_v22, 0.0  ;;  %v168_v20 = vld [vmem:[%s5442_s2 + $0x10] sm:$0xff] }
  0x98   :  { %74 = vadd.xlane.f32.xlu1 %v73_v25  ;;  %v56_v39 = vpop.xlane.xlu0 %55 }
  0x99   :  { %v69_v27 = vmul.f32 %v4338_v23, %v4338_v23  ;;  %v71_v28 = vmul.f32 %v4341_v24, %v4341_v24  ;;  %v62_v40 = vmul.f32 0.03125, %v56_v39 }
  0x9b   :  { %v76_v29 = vsel %vm40_vm0, %v69_v27, 0.0  ;;  %v82_v30 = vsel %vm40_vm0, %v71_v28, 0.0  ;;  %v4364_v41 = vsub.f32 %v4323_v8, %v62_v40 }
  0x9c   :  { %80 = vadd.xlane.f32.xlu1 %v79_v26  ;;  %77 = vadd.xlane.f32.xlu0 %v76_v29 }
  0x9d   :  { %v72_v42 = vmul.f32 %v4364_v41, %v4364_v41 }
  0x9f   :  { %v85_v43 = vsel %vm53_vm1, %v72_v42, 0.0 }
  0xa0   :  { %83 = vadd.xlane.f32.xlu0 %v82_v30  ;;  %v169_v30 = vld [vmem:[%s5442_s2 + $0x18] sm:$0xff] }
  0xad   :  { %145 = vperm.xlu1 %3934, %v137_v33  }
  0xb1   :  { %148 = vperm.xlu1 %3934, %v138_v36  }
  0xb5   :  { %151 = vperm.xlu1 %3934, %v139_v37  }
  0xb6   :  { %142 = vperm.xlu0 %3933, %v136_v38  }
  0xd9   :  { %86 = vadd.xlane.f32.xlu1 %v85_v43 }
  0xea   :  { %154 = vperm.xlu1 %3934, %v140_v45  }
 0x125   :  { %v75_v46 = vpop.xlane.xlu1 %74 }
 0x126   :  { %v88_v47 = vmul.f32 0.03125, %v75_v46 }
 0x128   :  { %v93_v48 = vadd.f32 1e-05, %v88_v47 }
 0x129   :  { %v81_v49 = vpop.xlane.xlu1 %80  ;;  %v78_v50 = vpop.xlane.xlu0 %77 }
 0x12a   :  { %4045 = vrsqrt.f32 %v93_v48  ;;  %v90_v51 = vmul.f32 0.03125, %v81_v49  ;;  %v89_v52 = vmul.f32 0.03125, %v78_v50 }
 0x12c   :  { %v95_v53 = vadd.f32 1e-05, %v90_v51  ;;  %v94_v54 = vadd.f32 1e-05, %v89_v52 }
 0x12d   :  { %v84_v55 = vpop.xlane.xlu0 %83  ;;  %v146_v58 = vpop.permute.xlu1 %145 }
 0x12e   :  { %4047 = vrsqrt.f32 %v95_v53  ;;  %v91_v56 = vmul.f32 0.03125, %v84_v55  ;;  %vm157_vm9 = vcmp.eq.s32.totalorder %v146_v58, 1 }
 0x12f   :  { %4049 = vrsqrt.f32 %v94_v54 }
 0x130   :  { %v96_v57 = vadd.f32 1e-05, %v91_v56 }
 0x131   :  { %v149_v7 = vpop.permute.xlu1 %148 }
 0x132   :  { %4051 = vrsqrt.f32 %v96_v57  ;;  %vm158_vm8 = vcmp.eq.s32.totalorder %v149_v7, 1  ;;  %v4442_v7 = vld [vmem:[%s5444_s4 + $0x8] sm:$0xff] }
 0x134   :  { %v4046_v59 = vpop.eup %4045 }
 0x135   :  { %v143_v61 = vpop.permute.xlu0 %142  ;;  %v103_v62 = vmul.f32 %v4046_v59, %v4328_v15 }
 0x136   :  { %vm156_vm7 = vcmp.eq.s32.totalorder %v143_v61, 1 }
 0x137   :  { %v112_v3 = vmul.f32 %v4375_v60, %v103_v62 }
 0x138   :  { %v4048_v4 = vpop.eup %4047 }
 0x139   :  { %v4050_v6 = vpop.eup %4049  ;;  %v121_v9 = vadd.f32 %v4381_v63, %v112_v3  ;;  %v105_v11 = vmul.f32 %v4048_v4, %v4331_v16 }
 0x13a   :  { %v104_v12 = vmul.f32 %v4050_v6, %v4338_v23  ;;  %v152_v23 = vpop.permute.xlu1 %151  ;;  %v4437_v6 = vld [vmem:[%s5444_s4] sm:$0xff] }
 0x13b   :  { %v161_v13 = vsel %vm156_vm7, %v121_v9, %v4295_v0  ;;  %v114_v14 = vmul.f32 %v4375_v60, %v105_v11  ;;  %v167_v0 = vld [vmem:[%s5442_s2 + $0x8] sm:$0xff]  ;;  %vm159_vm10 = vcmp.eq.s32.totalorder %v152_v23, 1  ;;  %v3975_v9 = vpack.i.bf16 %v4442_v7, %v4437_v6  ;;  %v4451_v11 = vld [vmem:[%s5444_s4 + $0x10] sm:$0xff] }
 0x13c   :  { %v4052_v15 = vpop.eup %4051  ;;  %v171_v17 = vadd.f32 %v166_v10, %v161_v13  ;;  %v113_v18 = vmul.f32 %v4375_v60, %v104_v12  ;;  %v3794_v10 = vpack.c.bf16 %v4442_v7, %v4437_v6  ;;  %v4456_v12 = vld [vmem:[%s5444_s4 + $0x18] sm:$0xff]  ;;  %v4231_v13 = vmov 0.0|0.0  }
 0x13d   :  { %v123_v19 = vadd.f32 %v4381_v63, %v114_v14  ;;  %v106_v21 = vmul.f32 %v4052_v15, %v4341_v24  ;;  %3793 = vmatprep.subr.bf16.mxu0 %v4231_v13  ;;  %3799 = vmatprep.subr.bf16.mxu1 %v4231_v13  ;;  %v3797_v14 = vpack.c.bf16 %v4456_v12, %v4451_v11  ;;  %v4233_v15 = vmov 0.0  }
 0x13e   :  { %v176_v16 = vsel %vm40_vm0, %v171_v17, 0.0  ;;  %v122_v22 = vadd.f32 %v4381_v63, %v113_v18  ;;  %3795 = vmatpush3.bf16.msra.mxu0 %v3794_v10  ;;  %3379 = vmatprep.mubr.msk.f32.mxu0 %vm4232_vm12, %v4233_v15  ;;  %vm1402_vm7 = vcmask 523264  }
 0x13f   :  { %177 = vadd.xlane.f32.xlu1 %v176_v16  ;;  %v163_v25 = vsel %vm158_vm8, %v123_v19, %v4300_v1  ;;  %v115_v26 = vmul.f32 %v4375_v60, %v106_v21  ;;  %3796 = vmatprep.subr.bf16.mxu0 %v4231_v13  ;;  %vm3058_vm8 = vcmask 9216  }
 0x140   :  { %v162_v27 = vsel %vm157_vm9, %v122_v22, %v4305_v2  ;;  %v173_v28 = vadd.f32 %v168_v20, %v163_v25  ;;  %3404 = vmatprep.mubr.msk.f32.mxu1 %vm4232_vm12, %v4233_v15 }
 0x141   :  { %v172_v24 = vadd.f32 %v167_v0, %v162_v27  ;;  %v124_v29 = vadd.f32 %v4381_v63, %v115_v26 }
 0x142   :  { %v182_v31 = vsel %vm40_vm0, %v173_v28, 0.0  ;;  %3798 = vmatpush3.bf16.msra.mxu0 %v3797_v14 }
 0x143   :  { %v179_v32 = vsel %vm40_vm0, %v172_v24, 0.0  ;;  %183 = vadd.xlane.f32.xlu1 %v182_v31  ;;  %v164_v1 = vsel %vm159_vm10, %v124_v29, %v4314_v5  ;;  %v170_v5 = vld [vmem:[%s5442_s2 + $0x20] sm:$0xf]  ;;  %3807 = vmatprep.subr.bf16.mxu0 %v4231_v13  ;;  %s4238_s2 = smov 48  }
 0x144   :  { %180 = vadd.xlane.f32.xlu0 %v179_v32  ;;  %v174_v33 = vadd.f32 %v169_v30, %v164_v1 }
 0x146   :  { %v185_v2 = vsel %vm40_vm0, %v174_v33, 0.0 }
 0x147   :  { %186 = vadd.xlane.f32.xlu1 %v185_v2 }
 0x166   :  { %v87_v34 = vpop.xlane.xlu1 %86 }
 0x167   :  { %v92_v35 = vmul.f32 0.03125, %v87_v34 }
 0x169   :  { %v97_v36 = vadd.f32 1e-05, %v92_v35 }
 0x16a   :  { %v155_v39 = vpop.permute.xlu1 %154 }
 0x16b   :  { %4053 = vrsqrt.f32 %v97_v36  ;;  %vm160_vm11 = vcmp.eq.s32.totalorder %v155_v39, 1 }
 0x175   :  { %v4054_v37 = vpop.eup %4053 }
 0x176   :  { %v107_v38 = vmul.f32 %v4054_v37, %v4364_v41 }
 0x178   :  { %v116_v40 = vmul.f32 %v4375_v60, %v107_v38 }
 0x17a   :  { %v125_v42 = vadd.f32 %v4381_v63, %v116_v40 }
 0x17c   :  { %v165_v43 = vsel %vm160_vm11, %v125_v42, %v4323_v8 }
 0x17d   :  { %v175_v44 = vadd.f32 %v170_v5, %v165_v43 }
 0x17f   :  { %v188_v45 = vsel %vm53_vm1, %v175_v44, 0.0 }
 0x180   :  { %189 = vadd.xlane.f32.xlu1 %v188_v45 }
 0x1cc   :  { %v178_v46 = vpop.xlane.xlu1 %177 }
 0x1cd   :  { %v191_v47 = vmul.f32 0.03125, %v178_v46 }
 0x1cf   :  { %v4422_v48 = vsub.f32 %v171_v17, %v191_v47 }
 0x1d0   :  { %v184_v41 = vpop.xlane.xlu1 %183 }
 0x1d1   :  { %v181_v49 = vpop.xlane.xlu0 %180  ;;  %v193_v50 = vmul.f32 0.03125, %v184_v41  ;;  %v201_v51 = vmul.f32 %v4422_v48, %v4422_v48 }
 0x1d2   :  { %v192_v52 = vmul.f32 0.03125, %v181_v49 }
 0x1d3   :  { %v4426_v53 = vsub.f32 %v173_v28, %v193_v50  ;;  %v206_v54 = vsel %vm40_vm0, %v201_v51, 0.0 }
 0x1d4   :  { %v197_v8 = vsub.f32 %v172_v24, %v192_v52  ;;  %207 = vadd.xlane.f32.xlu0 %v206_v54  ;;  %v187_v55 = vpop.xlane.xlu1 %186  ;;  %v261_v52 = vlaneseq }
 0x1d5   :  { %v194_v56 = vmul.f32 0.03125, %v187_v55  ;;  %v203_v57 = vmul.f32 %v4426_v53, %v4426_v53 }
 0x1d6   :  { %v202_v58 = vmul.f32 %v197_v8, %v197_v8 }
 0x1d7   :  { %v199_v59 = vsub.f32 %v174_v33, %v194_v56  ;;  %v212_v61 = vsel %vm40_vm0, %v203_v57, 0.0 }
 0x1d8   :  { %v209_v62 = vsel %vm40_vm0, %v202_v58, 0.0  ;;  %213 = vadd.xlane.f32.xlu0 %v212_v61 }
 0x1d9   :  { %210 = vadd.xlane.f32.xlu1 %v209_v62  ;;  %v204_v3 = vmul.f32 %v199_v59, %v199_v59 }
 0x1db   :  { %v215_v4 = vsel %vm40_vm0, %v204_v3, 0.0 }
 0x1dd   :  { %216 = vadd.xlane.f32.xlu1 %v215_v4 }
 0x20d   :  { %v190_v17 = vpop.xlane.xlu1 %189 }
 0x20e   :  { %v195_v18 = vmul.f32 0.03125, %v190_v17 }
 0x210   :  { %v200_v19 = vsub.f32 %v175_v44, %v195_v18 }
 0x212   :  { %v205_v20 = vmul.f32 %v200_v19, %v200_v19 }
 0x214   :  { %v218_v21 = vsel %vm53_vm1, %v205_v20, 0.0 }
 0x215   :  { %219 = vadd.xlane.f32.xlu0 %v218_v21 }
 0x261   :  { %v208_v16 = vpop.xlane.xlu0 %207 }
 0x262   :  { %v221_v22 = vmul.f32 0.03125, %v208_v16 }
 0x264   :  { %v226_v0 = vadd.f32 1e-05, %v221_v22 }
 0x265   :  { %v214_v23 = vpop.xlane.xlu0 %213 }
 0x266   :  { %4055 = vrsqrt.f32 %v226_v0  ;;  %v223_v25 = vmul.f32 0.03125, %v214_v23  ;;  %v211_v26 = vpop.xlane.xlu1 %210 }
 0x267   :  { %v222_v27 = vmul.f32 0.03125, %v211_v26 }
 0x268   :  { %v228_v28 = vadd.f32 1e-05, %v223_v25 }
 0x269   :  { %v227_v24 = vadd.f32 1e-05, %v222_v27 }
 0x26a   :  { %4057 = vrsqrt.f32 %v228_v28  ;;  %v217_v29 = vpop.xlane.xlu1 %216 }
 0x26b   :  { %4059 = vrsqrt.f32 %v227_v24  ;;  %v224_v30 = vmul.f32 0.03125, %v217_v29 }
 0x26d   :  { %v229_v31 = vadd.f32 1e-05, %v224_v30 }
 0x26f   :  { %4061 = vrsqrt.f32 %v229_v31 }
 0x270   :  { %v4056_v32 = vpop.eup %4055 }
 0x271   :  { %v236_v1 = vmul.f32 %v4056_v32, %v4422_v48 }
 0x273   :  { %v241_v33 = vmul.f32 %v4375_v60, %v236_v1 }
 0x274   :  { %v4058_v2 = vpop.eup %4057 }
 0x275   :  { %v4060_v34 = vpop.eup %4059  ;;  %v4472_v35 = vadd.f32 %v4381_v63, %v241_v33  ;;  %v238_v37 = vmul.f32 %v4058_v2, %v4426_v53  ;;  %v4511_v53 = vshrl.u32 %v261_v52, 7 }
 0x276   :  { %v237_v36 = vmul.f32 %v4060_v34, %v197_v8  ;;  %v4517_v8 = vld [vmem:[%s5446_s6] sm:$0x7] }
 0x277   :  { %3380 = vmatmul.mubr.msk.f32.vlgmr.msra.gmra.mrb[0].mxu0 %vm40_vm0, %v4472_v35  ;;  %v243_v42 = vmul.f32 %v4375_v60, %v238_v37  ;;  %v263_v54 = vsub.s32 0, %v4511_v53 }
 0x278   :  { %3382 = vmatprep.mubr.msk.f32.mxu0 %vm4232_vm12, %v4233_v15  ;;  %v242_v38 = vmul.f32 %v4375_v60, %v237_v36 }
 0x279   :  { %v4062_v39 = vpop.eup %4061  ;;  %v4489_v43 = vadd.f32 %v4381_v63, %v243_v42 }
 0x27a   :  { %v4481_v40 = vadd.f32 %v4381_v63, %v242_v38  ;;  %v239_v5 = vmul.f32 %v4062_v39, %v199_v59 }
 0x27c   :  { %3383 = vmatmul.mubr.msk.f32.gmra.mrb[2].mxu0 %vm40_vm0, %v4481_v40  ;;  %v244_v44 = vmul.f32 %v4375_v60, %v239_v5 }
 0x27d   :  { %3385 = vmatprep.mubr.msk.f32.mxu0 %vm4232_vm12, %v4233_v15 }
 0x27e   :  { %v4497_v45 = vadd.f32 %v4381_v63, %v244_v44 }
 0x280   :  { %3386 = vmatmul.mubr.msk.f32.gmra.mrb[4].mxu0 %vm40_vm0, %v4489_v43 }
 0x281   :  { %3388 = vmatprep.mubr.msk.f32.mxu0 %vm4232_vm12, %v4233_v15 }
 0x284   :  { %3389 = vmatmul.mubr.msk.f32.gmra.mrb[6].mxu0 %vm40_vm0, %v4497_v45 }
 0x285   :  { %3391 = vmatprep.mubr.msk.f32.mxu0 %vm4232_vm12, %v4233_v15 }
 0x2a2   :  { %v220_v46 = vpop.xlane.xlu0 %219 }
 0x2a3   :  { %v225_v47 = vmul.f32 0.03125, %v220_v46 }
 0x2a5   :  { %v230_v48 = vadd.f32 1e-05, %v225_v47 }
 0x2a7   :  { %4063 = vrsqrt.f32 %v230_v48 }
 0x2b1   :  { %v4064_v41 = vpop.eup %4063 }
 0x2b2   :  { %v240_v49 = vmul.f32 %v4064_v41, %v200_v19 }
 0x2b4   :  { %v245_v50 = vmul.f32 %v4375_v60, %v240_v49  ;;  %v251_v49 = vld [vmem:[%s5441_s1] sm:$0xff] }
 0x2b6   :  { %v4505_v51 = vadd.f32 %v4381_v63, %v245_v50  ;;  %v4522_v63 = vrot.slane %v4517_v8, %v263_v54 }
 0x2b8   :  { %3392 = vmatmul.mubr.msk.f32.gmra.mrb[8].mxu0 %vm40_vm0, %v4505_v51 }
 0x2b9   :  { %3429 = vmatprep.mubr.msk.f32.mxu0 %vm4232_vm12, %v4233_v15 }
 0x34a   :  { %v346_v60 = vpop.f32.mrb[0].mxu0 }
 0x34b   :  { %v3381_v55 = vpop.f32.mrb[1].mxu0  ;;  %v347_v57 = vadd.f32 %v346_v60, %v4522_v63 }
 0x34c   :  { %v252_v55 = vld [vmem:[%s5441_s1 + $0x8] sm:$0xff] }
 0x34f   :  { %v351_v56 = vpop.f32.mrb[2].mxu0 }
 0x350   :  { %v352_v58 = vadd.f32 %v351_v56, %v4522_v63  ;;  %v3384_v59 = vpop.f32.mrb[3].mxu0 }
 0x352   :  { %v4526_v61 = vpack.i.bf16 %v352_v58, %v347_v57 }
 0x353   :  { %v356_v62 = vpop.f32.mrb[4].mxu0 }
 0x354   :  { %3936 = vrot.lane.b32.xlu1 %v4526_v61, %s4234_s3  ;;  %v3387_v3 = vpop.f32.mrb[5].mxu0  ;;  %v357_v10 = vadd.f32 %v356_v62, %v4522_v63  ;;  %v253_v62 = vld [vmem:[%s5441_s1 + $0x10] sm:$0xff] }
 0x357   :  { %v361_v4 = vpop.f32.mrb[6].mxu0 }
 0x358   :  { %v362_v14 = vadd.f32 %v361_v4, %v4522_v63  ;;  %v3390_v17 = vpop.f32.mrb[7].mxu0 }
 0x359   :  { %v254_v17 = vld [vmem:[%s5441_s1 + $0x18] sm:$0xff] }
 0x35a   :  { %v4532_v18 = vpack.i.bf16 %v362_v14, %v357_v10 }
 0x35c   :  { %3941 = vrot.lane.b32.xlu0 %v4532_v18, %s4234_s3 }
 0x360   :  { %3951 = vrot.lane.b32.xlu0 %v4532_v18, %s4235_s28 }
 0x364   :  { %681 = vrot.lane.b32.xlu0 %v347_v57, %s4236_s29 }
 0x368   :  { %685 = vrot.lane.b32.xlu0 %v357_v10, %s4236_s29 }
 0x38b   :  { %v366_v19 = vpop.f32.mrb[8].mxu0 }
 0x38c   :  { %v4541_v20 = vadd.f32 %v366_v19, %v4522_v63  ;;  %v3393_v21 = vpop.f32.mrb[9].mxu0 }
 0x38e   :  { %689 = vrot.lane.b32.xlu0 %v4541_v20, %s4236_s29  ;;  %383 = vrot.lane.b32.xlu1 %v4541_v20, %s4234_s3 }
 0x392   :  { %3946 = vrot.lane.b32.xlu1 %v4526_v61, %s4235_s28 }
 0x396   :  { %699 = vrot.lane.b32.xlu1 %v4541_v20, %s4235_s28 }
 0x39a   :  { %683 = vrot.lane.b32.xlu1 %v352_v58, %s4236_s29 }
 0x39e   :  { %687 = vrot.lane.b32.xlu1 %v362_v14, %s4236_s29 }
 0x3a2   :  { %3956 = vrot.lane.b32.xlu1 %v4526_v61, %s4237_s30 }
 0x3c6   :  { %v3937_v16 = vpop.permute.xlu1 %3936 }
 0x3c7   :  { %v3939_v22 = vunpack.i.h.bf16 %v3937_v16  ;;  %v3938_v0 = vunpack.i.l.bf16 %v3937_v16 }
 0x3c9   :  { %v3800_v25 = vpack.c.bf16 %v3939_v22, %v3938_v0  ;;  %v255_v0 = vld [vmem:[%s5441_s1 + $0x20] sm:$0xf] }
 0x3cb   :  { %3802 = vmatpush3.bf16.xpose.msk.msra.mxu1 %vm4557_vm14, %v3800_v25 }
 0x3cc   :  { %3803 = vmatprep.subr.bf16.mxu1 %v4231_v13 }
 0x3ce   :  { %v3942_v26 = vpop.permute.xlu0 %3941 }
 0x3cf   :  { %v3944_v27 = vunpack.i.h.bf16 %v3942_v26  ;;  %v3943_v28 = vunpack.i.l.bf16 %v3942_v26 }
 0x3d1   :  { %v3804_v24 = vpack.c.bf16 %v3944_v27, %v3943_v28 }
 0x3d2   :  { %v3952_v33 = vpop.permute.xlu0 %3951 }
 0x3d3   :  { %3806 = vmatpush3.bf16.xpose.msk.msra.mxu1 %vm4557_vm14, %v3804_v24  ;;  %v3954_v34 = vunpack.i.h.bf16 %v3952_v33  ;;  %v3953_v36 = vunpack.i.l.bf16 %v3952_v33 }
 0x3d4   :  { %3402 = vmatprep.subr.mxu1 %v4233_v15 }
 0x3d5   :  { %v3818_v38 = vpack.c.bf16 %v3954_v34, %v3953_v36 }
 0x3d6   :  { %v682_v47 = vpop.permute.xlu0 %681 }
 0x3da   :  { %v686_v48 = vpop.permute.xlu0 %685 }
 0x400   :  { %v384_v29 = vpop.permute.xlu1 %383  ;;  %v690_v41 = vpop.permute.xlu0 %689 }
 0x401   :  { %3403 = vmatpush3.xpose.msk.msra.mxu1 %vm385_vm13, %v384_v29 }
 0x402   :  { %3813 = vmatprep.subr.bf16.mxu1 %v4231_v13 }
 0x404   :  { %v3947_v30 = vpop.permute.xlu1 %3946  ;;  %3405 = vmatmul.mubr.msk.f32.vlgmr.msra.gmra.mrb[0].mxu1 %vm385_vm13, %v347_v57 }
 0x405   :  { %v3949_v31 = vunpack.i.h.bf16 %v3947_v30  ;;  %v3948_v32 = vunpack.i.l.bf16 %v3947_v30  ;;  %3407 = vmatprep.mubr.msk.f32.mxu1 %vm4232_vm12, %v4233_v15 }
 0x407   :  { %v3814_v1 = vpack.c.bf16 %v3949_v31, %v3948_v32 }
 0x408   :  { %v700_v2 = vpop.permute.xlu1 %699  ;;  %3408 = vmatmul.mubr.msk.f32.gmra.mrb[2].mxu1 %vm385_vm13, %v352_v58 }
 0x409   :  { %3816 = vmatpush3.bf16.xpose.msk.msra.mxu1 %vm4557_vm14, %v3814_v1  ;;  %3410 = vmatprep.mubr.msk.f32.mxu1 %vm4232_vm12, %v4233_v15 }
 0x40a   :  { %3817 = vmatprep.subr.bf16.mxu1 %v4231_v13 }
 0x40c   :  { %v684_v37 = vpop.permute.xlu1 %683  ;;  %3411 = vmatmul.mubr.msk.f32.gmra.mrb[4].mxu1 %vm385_vm13, %v357_v10 }
 0x40d   :  { %3413 = vmatprep.mubr.msk.f32.mxu1 %vm4232_vm12, %v4233_v15 }
 0x410   :  { %v688_v39 = vpop.permute.xlu1 %687  ;;  %3414 = vmatmul.mubr.msk.f32.gmra.mrb[6].mxu1 %vm385_vm13, %v362_v14 }
 0x411   :  { %3820 = vmatpush3.bf16.xpose.msk.msra.mxu1 %vm4557_vm14, %v3818_v38  ;;  %3416 = vmatprep.mubr.msk.f32.mxu1 %vm4232_vm12, %v4233_v15 }
 0x412   :  { %3452 = vmatprep.subr.mxu1 %v4233_v15 }
 0x414   :  { %v3957_v42 = vpop.permute.xlu1 %3956  ;;  %3417 = vmatmul.mubr.msk.f32.gmra.mrb[8].mxu1 %vm385_vm13, %v4541_v20 }
 0x415   :  { %v3959_v5 = vunpack.i.h.bf16 %v3957_v42  ;;  %v3958_v44 = vunpack.i.l.bf16 %v3957_v42  ;;  %3454 = vmatprep.mubr.msk.f32.mxu1 %vm4232_vm12, %v4233_v15 }
 0x417   :  { %v3808_v46 = vpack.c.bf16 %v3959_v5, %v3958_v44 }
 0x419   :  { %3809 = vmatpush3.bf16.msra.mxu0 %v3808_v46  ;;  %3453 = vmatpush3.xpose.msk.msra.mxu1 %vm385_vm13, %v700_v2 }
 0x41a   :  { %3810 = vmatprep.subr.bf16.mxu0 %v4231_v13  ;;  %3827 = vmatprep.subr.bf16.mxu1 %v4231_v13 }
 0x41c   :  { %3455 = vmatmul.mubr.msk.f32.vlgmr.msra.gmra.mrb[10].mxu1 %vm385_vm13, %v682_v47 }
 0x41d   :  { %3457 = vmatprep.mubr.msk.f32.mxu1 %vm4232_vm12, %v4233_v15 }
 0x420   :  { %3458 = vmatmul.mubr.msk.f32.gmra.mrb[12].mxu1 %vm385_vm13, %v684_v37 }
 0x421   :  { %3460 = vmatprep.mubr.msk.f32.mxu1 %vm4232_vm12, %v4233_v15 }
 0x424   :  { %3461 = vmatmul.mubr.msk.f32.gmra.mrb[14].mxu1 %vm385_vm13, %v686_v48 }
 0x425   :  { %3463 = vmatprep.mubr.msk.f32.mxu1 %vm4232_vm12, %v4233_v15 }
 0x428   :  { %3464 = vmatmul.mubr.msk.f32.gmra.mrb[16].mxu1 %vm385_vm13, %v688_v39 }
 0x429   :  { %3466 = vmatprep.mubr.msk.f32.mxu1 %vm4232_vm12, %v4233_v15 }
 0x42c   :  { %3467 = vmatmul.mubr.msk.f32.gmra.mrb[18].mxu1 %vm385_vm13, %v690_v41 }
 0x42d   :  { %3502 = vmatprep.mubr.msk.f32.mxu1 %vm4232_vm12, %v4233_v15 }
 0x4d7   :  { %v472_v50 = vpop.f32.mrb[0].mxu1 }
 0x4d8   :  { %v473_v52 = vadd.f32 %v472_v50, %v251_v49  ;;  %v3406_v60 = vpop.f32.mrb[1].mxu1 }
 0x4da   :  { %v497_v56 = vsel %vm496_vm15, %v473_v52, -inf }
 0x4db   :  { %498 = vmax.xlane.f32.xlu1 %v497_v56  ;;  %v477_v57 = vpop.f32.mrb[2].mxu1 }
 0x4dc   :  { %v478_v58 = vadd.f32 %v477_v57, %v252_v55  ;;  %v3409_v59 = vpop.f32.mrb[3].mxu1 }
 0x4de   :  { %v500_v3 = vsel %vm496_vm15, %v478_v58, -inf }
 0x4df   :  { %501 = vmax.xlane.f32.xlu0 %v500_v3  ;;  %v482_v4 = vpop.f32.mrb[4].mxu1 }
 0x4e0   :  { %v483_v10 = vadd.f32 %v482_v4, %v253_v62  ;;  %v3412_v14 = vpop.f32.mrb[5].mxu1 }
 0x4e2   :  { %v503_v19 = vsel %vm496_vm15, %v483_v10, -inf }
 0x4e3   :  { %504 = vmax.xlane.f32.xlu0 %v503_v19  ;;  %v487_v21 = vpop.f32.mrb[6].mxu1 }
 0x4e4   :  { %v488_v16 = vadd.f32 %v487_v21, %v254_v17  ;;  %v3415_v22 = vpop.f32.mrb[7].mxu1 }
 0x4e6   :  { %v506_v25 = vsel %vm496_vm15, %v488_v16, -inf }
 0x4e7   :  { %507 = vmax.xlane.f32.xlu1 %v506_v25  ;;  %v492_v26 = vpop.f32.mrb[8].mxu1 }
 0x4e8   :  { %v493_v27 = vadd.f32 %v492_v26, %v255_v0  ;;  %v3418_v28 = vpop.f32.mrb[9].mxu1 }
 0x4ea   :  { %v510_v24 = vsel %vm509_vm2, %v493_v27, -inf }
 0x4eb   :  { %511 = vmax.xlane.f32.xlu0 %v510_v24 }
 0x4ef   :  { %v787_v29 = vpop.f32.mrb[10].mxu1 }
 0x4f0   :  { %v788_v30 = vadd.f32 %v787_v29, %v251_v49  ;;  %v3456_v31 = vpop.f32.mrb[11].mxu1 }
 0x4f2   :  { %v811_v32 = vsel %vm496_vm15, %v788_v30, -inf }
 0x4f3   :  { %812 = vmax.xlane.f32.xlu1 %v811_v32  ;;  %v792_v1 = vpop.f32.mrb[12].mxu1 }
 0x4f4   :  { %v793_v33 = vadd.f32 %v792_v1, %v252_v55  ;;  %v3459_v2 = vpop.f32.mrb[13].mxu1 }
 0x4f6   :  { %v814_v34 = vsel %vm496_vm15, %v793_v33, -inf }
 0x4f7   :  { %815 = vmax.xlane.f32.xlu0 %v814_v34  ;;  %v797_v36 = vpop.f32.mrb[14].mxu1 }
 0x4f8   :  { %v4631_v37 = vadd.f32 %v797_v36, %v253_v62  ;;  %v3462_v38 = vpop.f32.mrb[15].mxu1 }
 0x4fa   :  { %v817_v39 = vsel %vm496_vm15, %v4631_v37, -inf }
 0x4fb   :  { %818 = vmax.xlane.f32.xlu1 %v817_v39  ;;  %v802_v42 = vpop.f32.mrb[16].mxu1 }
 0x4fc   :  { %v3465_v5 = vpop.f32.mrb[17].mxu1  ;;  %v4643_v41 = vadd.f32 %v802_v42, %v254_v17 }
 0x4fe   :  { %v820_v49 = vsel %vm496_vm15, %v4643_v41, -inf }
 0x4ff   :  { %v807_v44 = vpop.f32.mrb[18].mxu1 }
 0x500   :  { %v4635_v46 = vadd.f32 %v807_v44, %v255_v0  ;;  %v3468_v47 = vpop.f32.mrb[19].mxu1 }
 0x502   :  { %v823_v48 = vsel %vm509_vm2, %v4635_v46, -inf }
 0x503   :  { %824 = vmax.xlane.f32.xlu1 %v823_v48 }
 0x50d   :  { %3961 = vrot.lane.b32.xlu0 %v4532_v18, %s4237_s30 }
 0x514   :  { %561 = vrot.lane.b32.xlu1 %v4541_v20, %s4237_s30 }
 0x52c   :  { %821 = vmax.xlane.f32.xlu0 %v820_v49 }
 0x542   :  { %3966 = vrot.lane.b32.xlu0 %v4526_v61, %s4238_s2 }
 0x568   :  { %v499_v50 = vpop.xlane.xlu1 %498 }
 0x569   :  { %v513_v60 = vsub.f32 %v473_v52, %v499_v50 }
 0x56b   :  { %v518_v55 = vmul.f32 1.442695, %v513_v60 }
 0x56c   :  { %v502_v56 = vpop.xlane.xlu0 %501 }
 0x56d   :  { %4065 = vpow2.f32 %v518_v55  ;;  %v514_v57 = vsub.f32 %v478_v58, %v502_v56 }
 0x56f   :  { %v520_v59 = vmul.f32 1.442695, %v514_v57 }
 0x570   :  { %v505_v62 = vpop.xlane.xlu0 %504 }
 0x571   :  { %4067 = vpow2.f32 %v520_v59  ;;  %v515_v3 = vsub.f32 %v483_v10, %v505_v62 }
 0x573   :  { %v522_v4 = vmul.f32 1.442695, %v515_v3 }
 0x574   :  { %v508_v14 = vpop.xlane.xlu1 %507 }
 0x575   :  { %4069 = vpow2.f32 %v522_v4  ;;  %v516_v17 = vsub.f32 %v488_v16, %v508_v14 }
 0x577   :  { %v4649_v19 = vpop.eup %4065  ;;  %v524_v21 = vmul.f32 1.442695, %v516_v17 }
 0x578   :  { %v512_v22 = vpop.xlane.xlu0 %511  ;;  %v528_v61 = vsel %vm496_vm15, %v4649_v19, 0.0 }
 0x579   :  { %4071 = vpow2.f32 %v524_v21  ;;  %v517_v52 = vsub.f32 %v493_v27, %v512_v22  ;;  %529 = vadd.xlane.f32.xlu0 %v528_v61 }
 0x57b   :  { %v4653_v0 = vpop.eup %4067  ;;  %v526_v58 = vmul.f32 1.442695, %v517_v52 }
 0x57c   :  { %v531_v10 = vsel %vm496_vm15, %v4653_v0, 0.0 }
 0x57d   :  { %4073 = vpow2.f32 %v526_v58  ;;  %532 = vadd.xlane.f32.xlu1 %v531_v10 }
 0x57f   :  { %v4657_v25 = vpop.eup %4069 }
 0x580   :  { %v813_v16 = vpop.xlane.xlu1 %812  ;;  %v534_v26 = vsel %vm496_vm15, %v4657_v25, 0.0 }
 0x581   :  { %v826_v28 = vsub.f32 %v788_v30, %v813_v16  ;;  %535 = vadd.xlane.f32.xlu0 %v534_v26 }
 0x583   :  { %v4661_v24 = vpop.eup %4071  ;;  %v831_v27 = vmul.f32 1.442695, %v826_v28 }
 0x584   :  { %v816_v29 = vpop.xlane.xlu0 %815  ;;  %v537_v31 = vsel %vm496_vm15, %v4661_v24, 0.0 }
 0x585   :  { %4075 = vpow2.f32 %v831_v27  ;;  %v827_v32 = vsub.f32 %v793_v33, %v816_v29  ;;  %538 = vadd.xlane.f32.xlu1 %v537_v31 }
 0x587   :  { %v4665_v1 = vpop.eup %4073  ;;  %v833_v2 = vmul.f32 1.442695, %v827_v32 }
 0x588   :  { %v3962_v34 = vpop.permute.xlu0 %3961  ;;  %v819_v36 = vpop.xlane.xlu1 %818  ;;  %v540_v38 = vsel %vm509_vm2, %v4665_v1, 0.0 }
 0x589   :  { %4077 = vpow2.f32 %v833_v2  ;;  %v3964_v30 = vunpack.i.h.bf16 %v3962_v34  ;;  %v3963_v39 = vunpack.i.l.bf16 %v3962_v34  ;;  %v828_v42 = vsub.f32 %v4631_v37, %v819_v36  ;;  %541 = vadd.xlane.f32.xlu0 %v540_v38 }
 0x58b   :  { %v3811_v5 = vpack.c.bf16 %v3964_v30, %v3963_v39  ;;  %v835_v44 = vmul.f32 1.442695, %v828_v42 }
 0x58d   :  { %4079 = vpow2.f32 %v835_v44  ;;  %3812 = vmatpush3.bf16.msra.mxu0 %v3811_v5 }
 0x58e   :  { %3427 = vmatprep.subr.mxu0 %v4233_v15 }
 0x58f   :  { %v4671_v33 = vpop.eup %4075 }
 0x590   :  { %v825_v47 = vpop.xlane.xlu1 %824  ;;  %v841_v48 = vsel %vm496_vm15, %v4671_v33, 0.0 }
 0x591   :  { %842 = vadd.xlane.f32.xlu1 %v841_v48  ;;  %v830_v56 = vsub.f32 %v4635_v46, %v825_v47 }
 0x593   :  { %v4675_v49 = vpop.eup %4077  ;;  %v839_v57 = vmul.f32 1.442695, %v830_v56 }
 0x594   :  { %v562_v50 = vpop.permute.xlu1 %561  ;;  %v844_v37 = vsel %vm496_vm15, %v4675_v49, 0.0 }
 0x595   :  { %845 = vadd.xlane.f32.xlu0 %v844_v37  ;;  %3428 = vmatpush3.msk.msra.mxu0 %vm582_vm3, %v562_v50  ;;  %4081 = vpow2.f32 %v839_v57 }
 0x596   :  { %3821 = vmatprep.subr.bf16.mxu0 %v4231_v13 }
 0x597   :  { %v4681_v60 = vpop.eup %4079 }
 0x598   :  { %v847_v55 = vsel %vm496_vm15, %v4681_v60, 0.0 }
 0x599   :  { %848 = vadd.xlane.f32.xlu0 %v847_v55 }
 0x59f   :  { %v4689_v4 = vpop.eup %4081 }
 0x5a0   :  { %v853_v14 = vsel %vm509_vm2, %v4689_v4, 0.0 }
 0x5a2   :  { %3971 = vrot.lane.b32.xlu1 %v4532_v18, %s4238_s2 }
 0x5b9   :  { %v822_v59 = vpop.xlane.xlu0 %821 }
 0x5ba   :  { %v829_v62 = vsub.f32 %v4643_v41, %v822_v59 }
 0x5bc   :  { %v837_v3 = vmul.f32 1.442695, %v829_v62 }
 0x5bd   :  { %v3967_v46 = vpop.permute.xlu0 %3966 }
 0x5be   :  { %4083 = vpow2.f32 %v837_v3  ;;  %v3969_v61 = vunpack.i.h.bf16 %v3967_v46  ;;  %v3968_v52 = vunpack.i.l.bf16 %v3967_v46 }
 0x5c0   :  { %v3822_v26 = vpack.c.bf16 %v3969_v61, %v3968_v52 }
 0x5c6   :  { %854 = vadd.xlane.f32.xlu1 %v853_v14 }
 0x5c8   :  { %v4693_v17 = vpop.eup %4083 }
 0x5c9   :  { %v850_v18 = vsel %vm496_vm15, %v4693_v17, 0.0 }
 0x5ca   :  { %851 = vadd.xlane.f32.xlu0 %v850_v18 }
 0x5e0   :  { %874 = vrot.lane.b32.xlu0 %v4541_v20, %s4238_s2 }
 0x5e4   :  { %3976 = vrot.lane.b32.xlu0 %v3975_v9, %s4239_s19 }
 0x606   :  { %v530_v21 = vpop.xlane.xlu0 %529 }
 0x607   :  { %4085 = vrcp.f32 %v530_v21 }
 0x60a   :  { %v533_v41 = vpop.xlane.xlu1 %532 }
 0x60b   :  { %4087 = vrcp.f32 %v533_v41 }
 0x60e   :  { %v536_v22 = vpop.xlane.xlu0 %535 }
 0x60f   :  { %4089 = vrcp.f32 %v536_v22 }
 0x611   :  { %v4086_v58 = vpop.eup %4085 }
 0x612   :  { %v544_v10 = vmul.f32 %v4086_v58, %v4649_v19  ;;  %v539_v16 = vpop.xlane.xlu1 %538 }
 0x613   :  { %4091 = vrcp.f32 %v539_v16 }
 0x614   :  { %3430 = vmatmul.mubr.msk.f32.vlgmr.msra.gmra.mrb[10].mxu0 %vm496_vm15, %v544_v10 }
 0x615   :  { %v4088_v28 = vpop.eup %4087  ;;  %3823 = vmatpush3.bf16.msra.mxu0 %v3822_v26  ;;  %3432 = vmatprep.mubr.msk.f32.mxu0 %vm4232_vm12, %v4233_v15 }
 0x616   :  { %v542_v20 = vpop.xlane.xlu0 %541  ;;  %v546_v27 = vmul.f32 %v4088_v28, %v4653_v0  ;;  %3824 = vmatprep.subr.bf16.mxu0 %v4231_v13 }
 0x617   :  { %4093 = vrcp.f32 %v542_v20 }
 0x618   :  { %3433 = vmatmul.mubr.msk.f32.gmra.mrb[12].mxu0 %vm496_vm15, %v546_v27 }
 0x619   :  { %v4090_v29 = vpop.eup %4089  ;;  %3435 = vmatprep.mubr.msk.f32.mxu0 %vm4232_vm12, %v4233_v15 }
 0x61a   :  { %v548_v19 = vmul.f32 %v4090_v29, %v4657_v25 }
 0x61c   :  { %3436 = vmatmul.mubr.msk.f32.gmra.mrb[14].mxu0 %vm496_vm15, %v548_v19 }
 0x61d   :  { %v4092_v31 = vpop.eup %4091  ;;  %3438 = vmatprep.mubr.msk.f32.mxu0 %vm4232_vm12, %v4233_v15 }
 0x61e   :  { %v843_v32 = vpop.xlane.xlu1 %842  ;;  %v550_v0 = vmul.f32 %v4092_v31, %v4661_v24 }
 0x61f   :  { %4095 = vrcp.f32 %v843_v32 }
 0x620   :  { %3439 = vmatmul.mubr.msk.f32.gmra.mrb[16].mxu0 %vm496_vm15, %v550_v0 }
 0x621   :  { %v4094_v2 = vpop.eup %4093  ;;  %3441 = vmatprep.mubr.msk.f32.mxu0 %vm4232_vm12, %v4233_v15 }
 0x622   :  { %v3972_v34 = vpop.permute.xlu1 %3971  ;;  %v552_v36 = vmul.f32 %v4094_v2, %v4665_v1  ;;  %v846_v24 = vpop.xlane.xlu0 %845 }
 0x623   :  { %v3974_v38 = vunpack.i.h.bf16 %v3972_v34  ;;  %v3973_v25 = vunpack.i.l.bf16 %v3972_v34  ;;  %4097 = vrcp.f32 %v846_v24 }
 0x624   :  { %3442 = vmatmul.mubr.msk.f32.gmra.mrb[18].mxu0 %vm496_vm15, %v552_v36 }
 0x625   :  { %v3825_v30 = vpack.c.bf16 %v3974_v38, %v3973_v25  ;;  %3479 = vmatprep.mubr.msk.f32.mxu0 %vm4232_vm12, %v4233_v15 }
 0x626   :  { %v849_v39 = vpop.xlane.xlu0 %848 }
 0x627   :  { %3826 = vmatpush3.bf16.msra.mxu0 %v3825_v30  ;;  %4099 = vrcp.f32 %v849_v39 }
 0x628   :  { %3477 = vmatprep.subr.mxu0 %v4233_v15 }
 0x629   :  { %v4096_v5 = vpop.eup %4095 }
 0x62a   :  { %v857_v1 = vmul.f32 %v4096_v5, %v4671_v33 }
 0x62d   :  { %v4098_v48 = vpop.eup %4097 }
 0x62e   :  { %v859_v50 = vmul.f32 %v4098_v48, %v4675_v49 }
 0x631   :  { %v4100_v37 = vpop.eup %4099 }
 0x632   :  { %v861_v33 = vmul.f32 %v4100_v37, %v4681_v60  ;;  %v3980_v60 = vpack.i.bf16 %v4456_v12, %v4451_v11 }
 0x634   :  { %3981 = vrot.lane.b32.xlu0 %v3980_v60, %s4239_s19 }
 0x653   :  { %v855_v44 = vpop.xlane.xlu1 %854 }
 0x657   :  { %v852_v42 = vpop.xlane.xlu0 %851 }
 0x658   :  { %4101 = vrcp.f32 %v852_v42 }
 0x659   :  { %4103 = vrcp.f32 %v855_v44 }
 0x65b   :  { %v875_v47 = vpop.permute.xlu0 %874 }
 0x65c   :  { %3478 = vmatpush3.msk.msra.mxu0 %vm582_vm3, %v875_v47 }
 0x65d   :  { %3480 = vmatmul.mubr.msk.f32.vlgmr.msra.gmra.mrb[20].mxu0 %vm496_vm15, %v857_v1  ;;  %3833 = vmatprep.subr.bf16.mxu0 %v4231_v13 }
 0x65e   :  { %3482 = vmatprep.mubr.msk.f32.mxu0 %vm4232_vm12, %v4233_v15 }
 0x661   :  { %3483 = vmatmul.mubr.msk.f32.gmra.mrb[22].mxu0 %vm496_vm15, %v859_v50 }
 0x662   :  { %3485 = vmatprep.mubr.msk.f32.mxu0 %vm4232_vm12, %v4233_v15  ;;  %v4102_v55 = vpop.eup %4101 }
 0x663   :  { %v863_v56 = vmul.f32 %v4102_v55, %v4693_v17  ;;  %v4104_v57 = vpop.eup %4103 }
 0x664   :  { %v865_v49 = vmul.f32 %v4104_v57, %v4689_v4  ;;  %v3977_v4 = vpop.permute.xlu0 %3976 }
 0x665   :  { %3486 = vmatmul.mubr.msk.f32.gmra.mrb[24].mxu0 %vm496_vm15, %v861_v33  ;;  %v3979_v17 = vunpack.i.h.bf16 %v3977_v4  ;;  %v3978_v18 = vunpack.i.l.bf16 %v3977_v4 }
 0x666   :  { %3488 = vmatprep.mubr.msk.f32.mxu0 %vm4232_vm12, %v4233_v15 }
 0x667   :  { %v3828_v46 = vpack.c.bf16 %v3979_v17, %v3978_v18 }
 0x669   :  { %3489 = vmatmul.mubr.msk.f32.gmra.mrb[26].mxu0 %vm496_vm15, %v863_v56  ;;  %3829 = vmatpush3.bf16.msra.mxu1 %v3828_v46 }
 0x66a   :  { %3491 = vmatprep.mubr.msk.f32.mxu0 %vm4232_vm12, %v4233_v15  ;;  %3830 = vmatprep.subr.bf16.mxu1 %v4231_v13 }
 0x66d   :  { %3492 = vmatmul.mubr.msk.f32.gmra.mrb[28].mxu0 %vm496_vm15, %v865_v49 }
 0x66e   :  { %3525 = vmatprep.mubr.msk.f32.mxu0 %vm4232_vm12, %v4233_v15 }
 0x6a6   :  { %v3982_v6 = vpop.permute.xlu0 %3981 }
 0x6a7   :  { %v3984_v9 = vunpack.i.h.bf16 %v3982_v6  ;;  %v3983_v11 = vunpack.i.l.bf16 %v3982_v6 }
 0x6a9   :  { %v3831_v12 = vpack.c.bf16 %v3984_v9, %v3983_v11 }
 0x6ab   :  { %3832 = vmatpush3.bf16.msra.mxu1 %v3831_v12 }
 0x6ac   :  { %3839 = vmatprep.subr.bf16.mxu1 %v4231_v13 }
 0x6e7   :  { %v651_v59 = vpop.f32.mrb[10].mxu0 }
 0x6e8   :  { %675 = vst.msk [vmem:[#allocation2] sm:$0xff] %vm385_vm13, %v651_v59  ;;  %v3431_v62 = vpop.f32.mrb[11].mxu0 }
 0x6eb   :  { %v656_v3 = vpop.f32.mrb[12].mxu0 }
 0x6ec   :  { %676 = vst.msk [vmem:[#allocation2 + $0x8] sm:$0xff] %vm385_vm13, %v656_v3  ;;  %v3434_v14 = vpop.f32.mrb[13].mxu0 }
 0x6ef   :  { %v661_v21 = vpop.f32.mrb[14].mxu0 }
 0x6f0   :  { %677 = vst.msk [vmem:[#allocation2 + $0x10] sm:$0xff] %vm385_vm13, %v661_v21  ;;  %v3437_v7 = vpop.f32.mrb[15].mxu0 }
 0x6f3   :  { %v666_v41 = vpop.f32.mrb[16].mxu0 }
 0x6f4   :  { %678 = vst.msk [vmem:[#allocation2 + $0x18] sm:$0xff] %vm385_vm13, %v666_v41  ;;  %v3440_v22 = vpop.f32.mrb[17].mxu0 }
 0x6f7   :  { %v671_v61 = vpop.f32.mrb[18].mxu0 }
 0x6f8   :  { %680 = vst.msk [vmem:[#allocation2 + $0x20] sm:$0xf] %vm679_vm4, %v671_v61  ;;  %v3443_v52 = vpop.f32.mrb[19].mxu0 }
 0x730   :  { %v963_v58 = vpop.f32.mrb[20].mxu0 }
 0x731   :  { %992 = vrot.lane.b32.xlu0 %v963_v58, %s4240_s20  ;;  %v3481_v10 = vpop.f32.mrb[21].mxu0 }
 0x734   :  { %v968_v16 = vpop.f32.mrb[22].mxu0 }
 0x735   :  { %994 = vrot.lane.b32.xlu0 %v968_v16, %s4240_s20  ;;  %v3484_v26 = vpop.f32.mrb[23].mxu0 }
 0x738   :  { %v973_v28 = vpop.f32.mrb[24].mxu0 }
 0x739   :  { %996 = vrot.lane.b32.xlu0 %v973_v28, %s4240_s20  ;;  %v3487_v20 = vpop.f32.mrb[25].mxu0 }
 0x73c   :  { %v978_v27 = vpop.f32.mrb[26].mxu0 }
 0x73d   :  { %998 = vrot.lane.b32.xlu0 %v978_v27, %s4240_s20  ;;  %v3490_v29 = vpop.f32.mrb[27].mxu0 }
 0x740   :  { %v983_v19 = vpop.f32.mrb[28].mxu0 }
 0x741   :  { %1000 = vrot.lane.b32.xlu1 %v983_v19, %s4240_s20  ;;  %v3493_v31 = vpop.f32.mrb[29].mxu0  ;;  %1036 = vrot.lane.b32.xlu0 %v4522_v63, %s4239_s19 }
 0x7a3   :  { %v993_v32 = vpop.permute.xlu0 %992 }
 0x7a4   :  { %1008 = vst.msk [vmem:[#allocation2] sm:$0xff] %vm1007_vm5, %v993_v32 }
 0x7a7   :  { %v995_v0 = vpop.permute.xlu0 %994 }
 0x7a8   :  { %1009 = vst.msk [vmem:[#allocation2 + $0x8] sm:$0xff] %vm1007_vm5, %v995_v0 }
 0x7ab   :  { %v997_v2 = vpop.permute.xlu0 %996  ;;  %v1014_v34 = vld [vmem:[#allocation2] sm:$0xff] }
 0x7ac   :  { %1010 = vst.msk [vmem:[#allocation2 + $0x10] sm:$0xff] %vm1007_vm5, %v997_v2  ;;  %3503 = vmatmul.mubr.msk.f32.vlgmr.msra.gmra.mrb[20].mxu1 %vm40_vm0, %v1014_v34  ;;  %v1216_v34 = vsub.s32 1, %v4511_v53 }
 0x7ad   :  { %3505 = vmatprep.mubr.msk.f32.mxu1 %vm4232_vm12, %v4233_v15 }
 0x7af   :  { %v999_v36 = vpop.permute.xlu0 %998  ;;  %v1015_v38 = vld [vmem:[#allocation2 + $0x8] sm:$0xff] }
 0x7b0   :  { %1011 = vst.msk [vmem:[#allocation2 + $0x18] sm:$0xff] %vm1007_vm5, %v999_v36  ;;  %3506 = vmatmul.mubr.msk.f32.gmra.mrb[22].mxu1 %vm40_vm0, %v1015_v38  ;;  %v4819_v36 = vrot.slane %v4517_v8, %v1216_v34  ;;  %v1232_v38 = vld [vmem:[%s5445_s5] sm:$0xff] }
 0x7b1   :  { %3508 = vmatprep.mubr.msk.f32.mxu1 %vm4232_vm12, %v4233_v15 }
 0x7b3   :  { %v1001_v63 = vpop.permute.xlu1 %1000  ;;  %v1016_v25 = vld [vmem:[#allocation2 + $0x10] sm:$0xff]  ;;  %v1037_v39 = vpop.permute.xlu0 %1036 }
 0x7b4   :  { %1013 = vst.msk [vmem:[#allocation2 + $0x20] sm:$0xf] %vm1012_vm6, %v1001_v63  ;;  %3509 = vmatmul.mubr.msk.f32.gmra.mrb[24].mxu1 %vm40_vm0, %v1016_v25  ;;  %v1233_v63 = vld [vmem:[%s5445_s5 + $0x8] sm:$0xff] }
 0x7b5   :  { %3511 = vmatprep.mubr.msk.f32.mxu1 %vm4232_vm12, %v4233_v15  ;;  %v3834_v25 = vpack.c.bf16 %v1233_v63, %v1232_v38 }
 0x7b7   :  { %v1017_v30 = vld [vmem:[#allocation2 + $0x18] sm:$0xff]  ;;  %3835 = vmatpush3.bf16.msra.mxu0 %v3834_v25 }
 0x7b8   :  { %3512 = vmatmul.mubr.msk.f32.gmra.mrb[26].mxu1 %vm40_vm0, %v1017_v30  ;;  %3836 = vmatprep.subr.bf16.mxu0 %v4231_v13  ;;  %v1234_v30 = vld [vmem:[%s5445_s5 + $0x10] sm:$0xff] }
 0x7b9   :  { %3514 = vmatprep.mubr.msk.f32.mxu1 %vm4232_vm12, %v4233_v15 }
 0x7bb   :  { %v1018_v24 = vld [vmem:[#allocation2 + $0x20] sm:$0xf] }
 0x7bc   :  { %3515 = vmatmul.mubr.msk.f32.gmra.mrb[28].mxu1 %vm40_vm0, %v1018_v24  ;;  %v1235_v24 = vld [vmem:[%s5445_s5 + $0x18] sm:$0xff] }
 0x7bd   :  { %3556 = vmatprep.mubr.msk.f32.mxu1 %vm4232_vm12, %v4233_v15 }
 0x87f   :  { %v1120_v42 = vpop.f32.mrb[20].mxu1 }
 0x880   :  { %v1121_v5 = vadd.f32 %v1120_v42, %v1037_v39  ;;  %v3504_v1 = vpop.f32.mrb[21].mxu1  ;;  %v1246_v42 = vsub.s32 2, %v4511_v53  ;;  %v3180_v53 = vld [vmem:[%s5445_s5 + $0x88] sm:$0xff] }
 0x882   :  { %v1144_v44 = vadd.f32 %v1121_v5, %v4472_v35  ;;  %v4841_v5 = vrot.slane %v4517_v8, %v1246_v42 }
 0x883   :  { %v1125_v47 = vpop.f32.mrb[22].mxu1 }
 0x884   :  { %v1126_v48 = vadd.f32 %v1125_v47, %v1037_v39  ;;  %v3507_v50 = vpop.f32.mrb[23].mxu1  ;;  %v1149_v37 = vsel %vm40_vm0, %v1144_v44, 0.0 }
 0x885   :  { %1150 = vadd.xlane.f32.xlu0 %v1149_v37 }
 0x886   :  { %v1145_v33 = vadd.f32 %v1126_v48, %v4481_v40 }
 0x887   :  { %v1130_v55 = vpop.f32.mrb[24].mxu1 }
 0x888   :  { %v1131_v56 = vadd.f32 %v1130_v55, %v1037_v39  ;;  %v3510_v57 = vpop.f32.mrb[25].mxu1  ;;  %v1152_v49 = vsel %vm40_vm0, %v1145_v33, 0.0 }
 0x889   :  { %1153 = vadd.xlane.f32.xlu1 %v1152_v49 }
 0x88a   :  { %v1146_v60 = vadd.f32 %v1131_v56, %v4489_v43 }
 0x88b   :  { %v1135_v59 = vpop.f32.mrb[26].mxu1 }
 0x88c   :  { %v1136_v62 = vadd.f32 %v1135_v59, %v1037_v39  ;;  %v3513_v3 = vpop.f32.mrb[27].mxu1  ;;  %v1155_v35 = vsel %vm40_vm0, %v1146_v60, 0.0 }
 0x88d   :  { %1156 = vadd.xlane.f32.xlu0 %v1155_v35 }
 0x88e   :  { %v1147_v4 = vadd.f32 %v1136_v62, %v4497_v45 }
 0x88f   :  { %v1140_v14 = vpop.f32.mrb[28].mxu1 }
 0x890   :  { %v1141_v17 = vadd.f32 %v1140_v14, %v1037_v39  ;;  %v3516_v18 = vpop.f32.mrb[29].mxu1  ;;  %v1158_v40 = vsel %vm40_vm0, %v1147_v4, 0.0  ;;  %v3837_v39 = vpack.c.bf16 %v1235_v24, %v1234_v30 }
 0x891   :  { %1159 = vadd.xlane.f32.xlu0 %v1158_v40 }
 0x892   :  { %v1148_v46 = vadd.f32 %v1141_v17, %v4505_v51  ;;  %3838 = vmatpush3.bf16.msra.mxu0 %v3837_v39 }
 0x893   :  { %3851 = vmatprep.subr.bf16.mxu0 %v4231_v13 }
 0x894   :  { %v1161_v21 = vsel %vm53_vm1, %v1148_v46, 0.0 }
 0x895   :  { %1162 = vadd.xlane.f32.xlu0 %v1161_v21 }
 0x912   :  { %v1151_v43 = vpop.xlane.xlu0 %1150 }
 0x913   :  { %v1164_v6 = vmul.f32 0.03125, %v1151_v43 }
 0x915   :  { %v1169_v7 = vsub.f32 %v1144_v44, %v1164_v6 }
 0x916   :  { %v1154_v9 = vpop.xlane.xlu1 %1153 }
 0x917   :  { %v1165_v11 = vmul.f32 0.03125, %v1154_v9  ;;  %v1174_v12 = vmul.f32 %v1169_v7, %v1169_v7 }
 0x919   :  { %v4794_v41 = vsub.f32 %v1145_v33, %v1165_v11  ;;  %v1179_v45 = vsel %vm40_vm0, %v1174_v12, 0.0 }
 0x91a   :  { %v1157_v22 = vpop.xlane.xlu0 %1156  ;;  %1180 = vadd.xlane.f32.xlu0 %v1179_v45 }
 0x91b   :  { %v1166_v61 = vmul.f32 0.03125, %v1157_v22  ;;  %v1175_v52 = vmul.f32 %v4794_v41, %v4794_v41 }
 0x91d   :  { %v4799_v51 = vsub.f32 %v1146_v60, %v1166_v61  ;;  %v1182_v58 = vsel %vm40_vm0, %v1175_v52, 0.0 }
 0x91e   :  { %1183 = vadd.xlane.f32.xlu1 %v1182_v58  ;;  %v1160_v10 = vpop.xlane.xlu0 %1159  ;;  %v1236_v58 = vld [vmem:[%s5445_s5 + $0x20] sm:$0xff] }
 0x91f   :  { %v1167_v16 = vmul.f32 0.03125, %v1160_v10  ;;  %v1176_v26 = vmul.f32 %v4799_v51, %v4799_v51  ;;  %v1237_v10 = vld [vmem:[%s5445_s5 + $0x28] sm:$0xff] }
 0x921   :  { %v4804_v28 = vsub.f32 %v1147_v4, %v1167_v16  ;;  %v1185_v20 = vsel %vm40_vm0, %v1176_v26, 0.0  ;;  %v3840_v16 = vpack.c.bf16 %v1237_v10, %v1236_v58  ;;  %v1238_v26 = vld [vmem:[%s5445_s5 + $0x30] sm:$0xff] }
 0x922   :  { %1186 = vadd.xlane.f32.xlu0 %v1185_v20  ;;  %v1163_v27 = vpop.xlane.xlu0 %1162 }
 0x923   :  { %v1168_v29 = vmul.f32 0.03125, %v1163_v27  ;;  %v1177_v19 = vmul.f32 %v4804_v28, %v4804_v28  ;;  %3841 = vmatpush3.bf16.msra.mxu1 %v3840_v16  ;;  %v1240_v27 = vld [vmem:[%s5445_s5 + $0x40] sm:$0xff] }
 0x924   :  { %3842 = vmatprep.subr.bf16.mxu1 %v4231_v13 }
 0x925   :  { %v4809_v31 = vsub.f32 %v1148_v46, %v1168_v29  ;;  %v1188_v32 = vsel %vm40_vm0, %v1177_v19, 0.0  ;;  %v1241_v29 = vld [vmem:[%s5445_s5 + $0x48] sm:$0xff] }
 0x926   :  { %1189 = vadd.xlane.f32.xlu1 %v1188_v32  ;;  %v3846_v19 = vpack.c.bf16 %v1241_v29, %v1240_v27  ;;  %v1243_v32 = vld [vmem:[%s5445_s5 + $0x58] sm:$0xff] }
 0x927   :  { %v1178_v0 = vmul.f32 %v4809_v31, %v4809_v31 }
 0x929   :  { %v1191_v2 = vsel %vm53_vm1, %v1178_v0, 0.0 }
 0x92a   :  { %1192 = vadd.xlane.f32.xlu0 %v1191_v2 }
 0x937   :  { %1224 = vrot.lane.b32.xlu1 %v4819_v36, %s4234_s3 }
 0x940   :  { %1399 = vrot.lane.b32.xlu0 %v4841_v5, %s4237_s30 }
 0x9a7   :  { %v1181_v1 = vpop.xlane.xlu0 %1180 }
 0x9a8   :  { %v1194_v44 = vmul.f32 0.03125, %v1181_v1 }
 0x9aa   :  { %v1199_v47 = vadd.f32 1e-05, %v1194_v44 }
 0x9ab   :  { %v1184_v48 = vpop.xlane.xlu1 %1183 }
 0x9ac   :  { %4105 = vrsqrt.f32 %v1199_v47  ;;  %v1195_v50 = vmul.f32 0.03125, %v1184_v48 }
 0x9ae   :  { %v1200_v37 = vadd.f32 1e-05, %v1195_v50 }
 0x9af   :  { %v1187_v33 = vpop.xlane.xlu0 %1186 }
 0x9b0   :  { %4107 = vrsqrt.f32 %v1200_v37  ;;  %v1196_v55 = vmul.f32 0.03125, %v1187_v33 }
 0x9b2   :  { %v1201_v56 = vadd.f32 1e-05, %v1196_v55 }
 0x9b3   :  { %v1190_v57 = vpop.xlane.xlu1 %1189 }
 0x9b4   :  { %4109 = vrsqrt.f32 %v1201_v56  ;;  %v1197_v49 = vmul.f32 0.03125, %v1190_v57 }
 0x9b6   :  { %v4106_v60 = vpop.eup %4105  ;;  %v1202_v8 = vadd.f32 1e-05, %v1197_v49 }
 0x9b7   :  { %v1193_v59 = vpop.xlane.xlu0 %1192  ;;  %v1209_v62 = vmul.f32 %v4106_v60, %v1169_v7  ;;  %v1225_v35 = vpop.permute.xlu1 %1224 }
 0x9b8   :  { %4111 = vrsqrt.f32 %v1202_v8  ;;  %v1198_v3 = vmul.f32 0.03125, %v1193_v59 }
 0x9b9   :  { %v1218_v4 = vmul.f32 %v4819_v36, %v1209_v62 }
 0x9ba   :  { %v4108_v14 = vpop.eup %4107  ;;  %v1203_v17 = vadd.f32 1e-05, %v1198_v3 }
 0x9bb   :  { %v4846_v18 = vadd.f32 %v1225_v35, %v1218_v4  ;;  %v1210_v40 = vmul.f32 %v4108_v14, %v4794_v41 }
 0x9bc   :  { %4113 = vrsqrt.f32 %v1203_v17 }
 0x9bd   :  { %3526 = vmatmul.mubr.msk.f32.vlgmr.msra.gmra.mrb[30].mxu0 %vm40_vm0, %v4846_v18  ;;  %v1219_v46 = vmul.f32 %v4819_v36, %v1210_v40 }
 0x9be   :  { %v4110_v21 = vpop.eup %4109  ;;  %3528 = vmatprep.mubr.msk.f32.mxu0 %vm4232_vm12, %v4233_v15 }
 0x9bf   :  { %v4854_v43 = vadd.f32 %v1225_v35, %v1219_v46  ;;  %v1211_v6 = vmul.f32 %v4110_v21, %v4799_v51 }
 0x9c1   :  { %3529 = vmatmul.mubr.msk.f32.gmra.mrb[32].mxu0 %vm40_vm0, %v4854_v43  ;;  %v1220_v7 = vmul.f32 %v4819_v36, %v1211_v6 }
 0x9c2   :  { %v4112_v9 = vpop.eup %4111  ;;  %3531 = vmatprep.mubr.msk.f32.mxu0 %vm4232_vm12, %v4233_v15 }
 0x9c3   :  { %v4862_v11 = vadd.f32 %v1225_v35, %v1220_v7  ;;  %v1212_v12 = vmul.f32 %v4112_v9, %v4804_v28  ;;  %v1239_v28 = vld [vmem:[%s5445_s5 + $0x38] sm:$0xff] }
 0x9c4   :  { %v3843_v20 = vpack.c.bf16 %v1239_v28, %v1238_v26 }
 0x9c5   :  { %3532 = vmatmul.mubr.msk.f32.gmra.mrb[34].mxu0 %vm40_vm0, %v4862_v11  ;;  %v1221_v41 = vmul.f32 %v4819_v36, %v1212_v12 }
 0x9c6   :  { %v4114_v45 = vpop.eup %4113  ;;  %3534 = vmatprep.mubr.msk.f32.mxu0 %vm4232_vm12, %v4233_v15  ;;  %3844 = vmatpush3.bf16.msra.mxu1 %v3843_v20 }
 0x9c7   :  { %v4870_v22 = vadd.f32 %v1225_v35, %v1221_v41  ;;  %v1213_v61 = vmul.f32 %v4114_v45, %v4809_v31  ;;  %3845 = vmatprep.subr.bf16.mxu1 %v4231_v13  ;;  %v1242_v31 = vld [vmem:[%s5445_s5 + $0x50] sm:$0xff] }
 0x9c8   :  { %v3849_v0 = vpack.c.bf16 %v1243_v32, %v1242_v31 }
 0x9c9   :  { %3535 = vmatmul.mubr.msk.f32.gmra.mrb[36].mxu0 %vm40_vm0, %v4870_v22  ;;  %v1222_v52 = vmul.f32 %v4819_v36, %v1213_v61 }
 0x9ca   :  { %3537 = vmatprep.mubr.msk.f32.mxu0 %vm4232_vm12, %v4233_v15  ;;  %3847 = vmatpush3.bf16.msra.mxu1 %v3846_v19 }
 0x9cb   :  { %v4878_v51 = vadd.f32 %v1225_v35, %v1222_v52  ;;  %3848 = vmatprep.subr.bf16.mxu1 %v4231_v13 }
 0x9cd   :  { %3538 = vmatmul.mubr.msk.f32.gmra.mrb[38].mxu0 %vm40_vm0, %v4878_v51 }
 0x9ce   :  { %3579 = vmatprep.mubr.msk.f32.mxu0 %vm4232_vm12, %v4233_v15  ;;  %3850 = vmatpush3.bf16.msra.mxu1 %v3849_v0 }
 0x9cf   :  { %3857 = vmatprep.subr.bf16.mxu1 %v4231_v13 }
 0xa90   :  { %v1329_v2 = vpop.f32.mrb[30].mxu0 }
 0xa91   :  { %v1330_v38 = vadd.f32 %v1329_v2, %v4841_v5  ;;  %v3527_v63 = vpop.f32.mrb[31].mxu0 }
 0xa93   :  { %v1353_v25 = vmul.f32 %v1330_v38, %v1330_v38 }
 0xa94   :  { %v1334_v30 = vpop.f32.mrb[32].mxu0 }
 0xa95   :  { %v1358_v24 = vmul.f32 %v1353_v25, %v1330_v38  ;;  %v1335_v39 = vadd.f32 %v1334_v30, %v4841_v5  ;;  %v3530_v1 = vpop.f32.mrb[33].mxu0 }
 0xa97   :  { %v1363_v44 = vmul.f32 0.044715, %v1358_v24  ;;  %v1354_v47 = vmul.f32 %v1335_v39, %v1335_v39 }
 0xa98   :  { %v1339_v48 = vpop.f32.mrb[34].mxu0 }
 0xa99   :  { %v1368_v50 = vadd.f32 %v1363_v44, %v1330_v38  ;;  %v1359_v37 = vmul.f32 %v1354_v47, %v1335_v39  ;;  %v1340_v33 = vadd.f32 %v1339_v48, %v4841_v5  ;;  %v3533_v55 = vpop.f32.mrb[35].mxu0  ;;  %v1400_v47 = vpop.permute.xlu0 %1399 }
 0xa9b   :  { %v1373_v56 = vmul.f32 0.7978846, %v1368_v50  ;;  %v1364_v57 = vmul.f32 0.044715, %v1359_v37  ;;  %v1355_v49 = vmul.f32 %v1340_v33, %v1340_v33 }
 0xa9c   :  { %v1344_v60 = vpop.f32.mrb[36].mxu0 }
 0xa9d   :  { %4115 = vtanh.f32 %v1373_v56  ;;  %v1369_v8 = vadd.f32 %v1364_v57, %v1335_v39  ;;  %v1360_v59 = vmul.f32 %v1355_v49, %v1340_v33  ;;  %v1345_v62 = vadd.f32 %v1344_v60, %v4841_v5  ;;  %v3536_v3 = vpop.f32.mrb[37].mxu0 }
 0xa9f   :  { %v1374_v35 = vmul.f32 0.7978846, %v1369_v8  ;;  %v1365_v4 = vmul.f32 0.044715, %v1360_v59  ;;  %v1356_v14 = vmul.f32 %v1345_v62, %v1345_v62 }
 0xaa0   :  { %v1349_v17 = vpop.f32.mrb[38].mxu0 }
 0xaa1   :  { %4117 = vtanh.f32 %v1374_v35  ;;  %v1370_v40 = vadd.f32 %v1365_v4, %v1340_v33  ;;  %v1361_v46 = vmul.f32 %v1356_v14, %v1345_v62  ;;  %v1350_v21 = vadd.f32 %v1349_v17, %v4841_v5  ;;  %v3539_v6 = vpop.f32.mrb[39].mxu0 }
 0xaa3   :  { %v1375_v7 = vmul.f32 0.7978846, %v1370_v40  ;;  %v1366_v9 = vmul.f32 0.044715, %v1361_v46  ;;  %v1357_v12 = vmul.f32 %v1350_v21, %v1350_v21 }
 0xaa5   :  { %4119 = vtanh.f32 %v1375_v7  ;;  %v1371_v41 = vadd.f32 %v1366_v9, %v1345_v62  ;;  %v1362_v45 = vmul.f32 %v1357_v12, %v1350_v21 }
 0xaa7   :  { %v4116_v61 = vpop.eup %4115  ;;  %v1376_v52 = vmul.f32 0.7978846, %v1371_v41  ;;  %v1367_v58 = vmul.f32 0.044715, %v1362_v45 }
 0xaa8   :  { %v1383_v10 = vadd.f32 1.0, %v4116_v61 }
 0xaa9   :  { %4121 = vtanh.f32 %v1376_v52  ;;  %v1372_v16 = vadd.f32 %v1367_v58, %v1350_v21 }
 0xaaa   :  { %v1388_v26 = vmul.f32 0.5, %v1383_v10 }
 0xaab   :  { %v4118_v28 = vpop.eup %4117  ;;  %v1377_v20 = vmul.f32 0.7978846, %v1372_v16 }
 0xaac   :  { %v1393_v27 = vmul.f32 %v1388_v26, %v1330_v38  ;;  %v1384_v29 = vadd.f32 1.0, %v4118_v28 }
 0xaad   :  { %4123 = vtanh.f32 %v1377_v20 }
 0xaae   :  { %3557 = vmatmul.mubr.msk.f32.vlgmr.msra.gmra.mrb[30].mxu1 %vm1402_vm7, %v1393_v27  ;;  %v1389_v5 = vmul.f32 0.5, %v1384_v29 }
 0xaaf   :  { %v4120_v19 = vpop.eup %4119  ;;  %3559 = vmatprep.mubr.msk.f32.mxu1 %vm4232_vm12, %v4233_v15 }
 0xab0   :  { %v1394_v31 = vmul.f32 %v1389_v5, %v1335_v39  ;;  %v1385_v32 = vadd.f32 1.0, %v4120_v19 }
 0xab2   :  { %3560 = vmatmul.mubr.msk.f32.gmra.mrb[32].mxu1 %vm1402_vm7, %v1394_v31  ;;  %v1390_v0 = vmul.f32 0.5, %v1385_v32 }
 0xab3   :  { %v4122_v2 = vpop.eup %4121  ;;  %3562 = vmatprep.mubr.msk.f32.mxu1 %vm4232_vm12, %v4233_v15 }
 0xab4   :  { %v1395_v63 = vmul.f32 %v1390_v0, %v1340_v33  ;;  %v1386_v38 = vadd.f32 1.0, %v4122_v2 }
 0xab6   :  { %3563 = vmatmul.mubr.msk.f32.gmra.mrb[34].mxu1 %vm1402_vm7, %v1395_v63  ;;  %v1391_v25 = vmul.f32 0.5, %v1386_v38 }
 0xab7   :  { %v4124_v30 = vpop.eup %4123  ;;  %3565 = vmatprep.mubr.msk.f32.mxu1 %vm4232_vm12, %v4233_v15 }
 0xab8   :  { %v1396_v24 = vmul.f32 %v1391_v25, %v1345_v62  ;;  %v1387_v1 = vadd.f32 1.0, %v4124_v30  ;;  %v4950_v30 = vld [vmem:[%s5444_s4 + $0x20] sm:$0xff] }
 0xaba   :  { %3566 = vmatmul.mubr.msk.f32.gmra.mrb[36].mxu1 %vm1402_vm7, %v1396_v24  ;;  %v1392_v39 = vmul.f32 0.5, %v1387_v1  ;;  %v4955_v24 = vld [vmem:[%s5444_s4 + $0x28] sm:$0xff] }
 0xabb   :  { %3568 = vmatprep.mubr.msk.f32.mxu1 %vm4232_vm12, %v4233_v15  ;;  %v3852_v1 = vpack.c.bf16 %v4955_v24, %v4950_v30 }
 0xabc   :  { %v1397_v44 = vmul.f32 %v1392_v39, %v1350_v21  ;;  %v4965_v39 = vld [vmem:[%s5444_s4 + $0x30] sm:$0xff] }
 0xabd   :  { %3853 = vmatpush3.bf16.msra.mxu0 %v3852_v1 }
 0xabe   :  { %3569 = vmatmul.mubr.msk.f32.gmra.mrb[38].mxu1 %vm1402_vm7, %v1397_v44  ;;  %3854 = vmatprep.subr.bf16.mxu0 %v4231_v13  ;;  %v4970_v44 = vld [vmem:[%s5444_s4 + $0x38] sm:$0xff] }
 0xabf   :  { %3604 = vmatprep.mubr.msk.f32.mxu1 %vm4232_vm12, %v4233_v15 }
 0xb81   :  { %v1484_v48 = vpop.f32.mrb[30].mxu1 }
 0xb82   :  { %v1485_v50 = vadd.f32 %v1484_v48, %v1400_v47  ;;  %v3558_v37 = vpop.f32.mrb[31].mxu1 }
 0xb84   :  { %v1508_v33 = vadd.f32 %v1485_v50, %v4846_v18 }
 0xb85   :  { %v1489_v55 = vpop.f32.mrb[32].mxu1 }
 0xb86   :  { %v1490_v56 = vadd.f32 %v1489_v55, %v1400_v47  ;;  %v3561_v57 = vpop.f32.mrb[33].mxu1  ;;  %v1513_v49 = vsel %vm40_vm0, %v1508_v33, 0.0 }
 0xb87   :  { %1514 = vadd.xlane.f32.xlu1 %v1513_v49 }
 0xb88   :  { %v1509_v60 = vadd.f32 %v1490_v56, %v4854_v43 }
 0xb89   :  { %v1494_v8 = vpop.f32.mrb[34].mxu1 }
 0xb8a   :  { %v1495_v59 = vadd.f32 %v1494_v8, %v1400_v47  ;;  %v3564_v62 = vpop.f32.mrb[35].mxu1  ;;  %v1516_v3 = vsel %vm40_vm0, %v1509_v60, 0.0 }
 0xb8b   :  { %1517 = vadd.xlane.f32.xlu0 %v1516_v3 }
 0xb8c   :  { %v1510_v35 = vadd.f32 %v1495_v59, %v4862_v11 }
 0xb8d   :  { %v1499_v4 = vpop.f32.mrb[36].mxu1 }
 0xb8e   :  { %v1500_v14 = vadd.f32 %v1499_v4, %v1400_v47  ;;  %v3567_v17 = vpop.f32.mrb[37].mxu1  ;;  %v1519_v18 = vsel %vm40_vm0, %v1510_v35, 0.0 }
 0xb8f   :  { %1520 = vadd.xlane.f32.xlu1 %v1519_v18 }
 0xb90   :  { %v1511_v40 = vadd.f32 %v1500_v14, %v4870_v22 }
 0xb91   :  { %v1504_v46 = vpop.f32.mrb[38].mxu1 }
 0xb92   :  { %v1505_v21 = vadd.f32 %v1504_v46, %v1400_v47  ;;  %v3570_v6 = vpop.f32.mrb[39].mxu1  ;;  %v1522_v43 = vsel %vm40_vm0, %v1511_v40, 0.0  ;;  %v3855_v47 = vpack.c.bf16 %v4970_v44, %v4965_v39 }
 0xb93   :  { %1523 = vadd.xlane.f32.xlu0 %v1522_v43 }
 0xb94   :  { %v1512_v7 = vadd.f32 %v1505_v21, %v4878_v51  ;;  %3856 = vmatpush3.bf16.msra.mxu0 %v3855_v47 }
 0xb95   :  { %3865 = vmatprep.subr.bf16.mxu0 %v4231_v13 }
 0xb96   :  { %v1525_v9 = vsel %vm53_vm1, %v1512_v7, 0.0 }
 0xb97   :  { %1526 = vadd.xlane.f32.xlu1 %v1525_v9 }
 0xc14   :  { %v1515_v11 = vpop.xlane.xlu1 %1514 }
 0xc15   :  { %v1528_v12 = vmul.f32 0.03125, %v1515_v11 }
 0xc17   :  { %v1533_v41 = vsub.f32 %v1508_v33, %v1528_v12 }
 0xc18   :  { %v1518_v45 = vpop.xlane.xlu0 %1517 }
 0xc19   :  { %v1529_v61 = vmul.f32 0.03125, %v1518_v45  ;;  %v1538_v52 = vmul.f32 %v1533_v41, %v1533_v41 }
 0xc1b   :  { %v1534_v58 = vsub.f32 %v1509_v60, %v1529_v61  ;;  %v1543_v22 = vsel %vm40_vm0, %v1538_v52, 0.0 }
 0xc1c   :  { %v1521_v10 = vpop.xlane.xlu1 %1520  ;;  %1544 = vadd.xlane.f32.xlu0 %v1543_v22 }
 0xc1d   :  { %v1530_v16 = vmul.f32 0.03125, %v1521_v10  ;;  %v1539_v26 = vmul.f32 %v1534_v58, %v1534_v58 }
 0xc1f   :  { %v1535_v28 = vsub.f32 %v1510_v35, %v1530_v16  ;;  %v1546_v20 = vsel %vm40_vm0, %v1539_v26, 0.0 }
 0xc20   :  { %v1524_v51 = vpop.xlane.xlu0 %1523  ;;  %1547 = vadd.xlane.f32.xlu1 %v1546_v20 }
 0xc21   :  { %v1531_v27 = vmul.f32 0.03125, %v1524_v51  ;;  %v1540_v29 = vmul.f32 %v1535_v28, %v1535_v28 }
 0xc23   :  { %v1536_v5 = vsub.f32 %v1511_v40, %v1531_v27  ;;  %v1549_v19 = vsel %vm40_vm0, %v1540_v29, 0.0 }
 0xc24   :  { %1550 = vadd.xlane.f32.xlu0 %v1549_v19  ;;  %v1527_v31 = vpop.xlane.xlu1 %1526 }
 0xc25   :  { %v1532_v32 = vmul.f32 0.03125, %v1527_v31  ;;  %v1541_v0 = vmul.f32 %v1536_v5, %v1536_v5 }
 0xc27   :  { %v1537_v2 = vsub.f32 %v1512_v7, %v1532_v32  ;;  %v1552_v63 = vsel %vm40_vm0, %v1541_v0, 0.0 }
 0xc28   :  { %1553 = vadd.xlane.f32.xlu1 %v1552_v63 }
 0xc29   :  { %v1542_v38 = vmul.f32 %v1537_v2, %v1537_v2 }
 0xc2b   :  { %v1555_v25 = vsel %vm53_vm1, %v1542_v38, 0.0 }
 0xc2c   :  { %1556 = vadd.xlane.f32.xlu0 %v1555_v25 }
 0xc39   :  { %1578 = vrot.lane.b32.xlu1 %v4819_v36, %s4237_s30 }
 0xc42   :  { %1586 = vrot.lane.b32.xlu0 %v4819_v36, %s4239_s19 }
 0xca9   :  { %v1545_v48 = vpop.xlane.xlu0 %1544 }
 0xcaa   :  { %v1558_v50 = vmul.f32 0.03125, %v1545_v48 }
 0xcac   :  { %v1563_v37 = vadd.f32 1e-05, %v1558_v50 }
 0xcad   :  { %v1548_v33 = vpop.xlane.xlu1 %1547 }
 0xcae   :  { %4125 = vrsqrt.f32 %v1563_v37  ;;  %v1559_v55 = vmul.f32 0.03125, %v1548_v33 }
 0xcb0   :  { %v1564_v56 = vadd.f32 1e-05, %v1559_v55 }
 0xcb1   :  { %v1551_v57 = vpop.xlane.xlu0 %1550 }
 0xcb2   :  { %4127 = vrsqrt.f32 %v1564_v56  ;;  %v1560_v49 = vmul.f32 0.03125, %v1551_v57 }
 0xcb4   :  { %v1565_v60 = vadd.f32 1e-05, %v1560_v49 }
 0xcb5   :  { %v1554_v8 = vpop.xlane.xlu1 %1553 }
 0xcb6   :  { %4129 = vrsqrt.f32 %v1565_v60  ;;  %v1561_v59 = vmul.f32 0.03125, %v1554_v8 }
 0xcb8   :  { %v4126_v62 = vpop.eup %4125  ;;  %v1566_v3 = vadd.f32 1e-05, %v1561_v59 }
 0xcb9   :  { %v1557_v35 = vpop.xlane.xlu0 %1556  ;;  %v1573_v4 = vmul.f32 %v4126_v62, %v1533_v41  ;;  %v1579_v14 = vpop.permute.xlu1 %1578 }
 0xcba   :  { %4131 = vrsqrt.f32 %v1566_v3  ;;  %v1562_v36 = vmul.f32 0.03125, %v1557_v35 }
 0xcbb   :  { %v1581_v17 = vmul.f32 %v1579_v14, %v1573_v4 }
 0xcbc   :  { %v4128_v18 = vpop.eup %4127  ;;  %v1567_v40 = vadd.f32 1e-05, %v1562_v36 }
 0xcbd   :  { %v1574_v46 = vmul.f32 %v4128_v18, %v1534_v58  ;;  %v1587_v21 = vpop.permute.xlu0 %1586 }
 0xcbe   :  { %4133 = vrsqrt.f32 %v1567_v40  ;;  %v4977_v6 = vadd.f32 %v1587_v21, %v1581_v17 }
 0xcbf   :  { %v1582_v43 = vmul.f32 %v1579_v14, %v1574_v46 }
 0xcc0   :  { %v4130_v7 = vpop.eup %4129  ;;  %3580 = vmatmul.mubr.msk.f32.vlgmr.msra.gmra.mrb[40].mxu0 %vm40_vm0, %v4977_v6 }
 0xcc1   :  { %v1575_v9 = vmul.f32 %v4130_v7, %v1535_v28  ;;  %3582 = vmatprep.mubr.msk.f32.mxu0 %vm4232_vm12, %v4233_v15  ;;  %v4983_v11 = vadd.f32 %v1587_v21, %v1582_v43  ;;  %v5010_v28 = vld [vmem:[%s5446_s6 + $0x4] sm:$0x7] }
 0xcc2   :  { %v5015_v51 = vrot.slane %v5010_v28, %v263_v54  ;;  %v4201_v7 = vld [vmem:[%s5441_s1] sm:$0xff] }
 0xcc3   :  { %v1583_v12 = vmul.f32 %v1579_v14, %v1575_v9 }
 0xcc4   :  { %v4132_v41 = vpop.eup %4131  ;;  %3583 = vmatmul.mubr.msk.f32.gmra.mrb[42].mxu0 %vm40_vm0, %v4983_v11 }
 0xcc5   :  { %v1576_v45 = vmul.f32 %v4132_v41, %v1536_v5  ;;  %3585 = vmatprep.mubr.msk.f32.mxu0 %vm4232_vm12, %v4233_v15  ;;  %v4989_v61 = vadd.f32 %v1587_v21, %v1583_v12 }
 0xcc7   :  { %v1584_v52 = vmul.f32 %v1579_v14, %v1576_v45 }
 0xcc8   :  { %v4134_v58 = vpop.eup %4133  ;;  %3586 = vmatmul.mubr.msk.f32.gmra.mrb[44].mxu0 %vm40_vm0, %v4989_v61 }
 0xcc9   :  { %v1577_v22 = vmul.f32 %v4134_v58, %v1537_v2  ;;  %3588 = vmatprep.mubr.msk.f32.mxu0 %vm4232_vm12, %v4233_v15  ;;  %v4995_v10 = vadd.f32 %v1587_v21, %v1584_v52  ;;  %v4202_v52 = vld [vmem:[%s5441_s1 + $0x8] sm:$0xff] }
 0xccb   :  { %v1585_v16 = vmul.f32 %v1579_v14, %v1577_v22 }
 0xccc   :  { %3589 = vmatmul.mubr.msk.f32.gmra.mrb[46].mxu0 %vm40_vm0, %v4995_v10 }
 0xccd   :  { %3591 = vmatprep.mubr.msk.f32.mxu0 %vm4232_vm12, %v4233_v15  ;;  %v5001_v26 = vadd.f32 %v1587_v21, %v1585_v16 }
 0xcd0   :  { %3592 = vmatmul.mubr.msk.f32.gmra.mrb[48].mxu0 %vm40_vm0, %v5001_v26 }
 0xcd1   :  { %3629 = vmatprep.mubr.msk.f32.mxu0 %vm4232_vm12, %v4233_v15 }
 0xd93   :  { %v1686_v20 = vpop.f32.mrb[40].mxu0 }
 0xd94   :  { %v3581_v27 = vpop.f32.mrb[41].mxu0  ;;  %v1687_v5 = vadd.f32 %v1686_v20, %v5015_v51 }
 0xd95   :  { %v4203_v27 = vld [vmem:[%s5441_s1 + $0x10] sm:$0xff] }
 0xd97   :  { %v1691_v29 = vpop.f32.mrb[42].mxu0 }
 0xd98   :  { %v1692_v19 = vadd.f32 %v1691_v29, %v5015_v51  ;;  %v3584_v31 = vpop.f32.mrb[43].mxu0 }
 0xd9a   :  { %v5019_v32 = vpack.i.bf16 %v1692_v19, %v1687_v5 }
 0xd9b   :  { %v1696_v0 = vpop.f32.mrb[44].mxu0 }
 0xd9c   :  { %3986 = vrot.lane.b32.xlu1 %v5019_v32, %s4234_s3  ;;  %v3587_v2 = vpop.f32.mrb[45].mxu0  ;;  %v1697_v38 = vadd.f32 %v1696_v0, %v5015_v51  ;;  %v5103_v0 = vld [vmem:[%s5441_s1 + $0x18] sm:$0xff] }
 0xd9f   :  { %v1701_v63 = vpop.f32.mrb[46].mxu0 }
 0xda0   :  { %v5025_v54 = vadd.f32 %v1701_v63, %v5015_v51  ;;  %v3590_v25 = vpop.f32.mrb[47].mxu0 }
 0xda2   :  { %v5028_v1 = vpack.i.bf16 %v5025_v54, %v1697_v38 }
 0xda3   :  { %v1706_v47 = vpop.f32.mrb[48].mxu0 }
 0xda4   :  { %v5031_v48 = vadd.f32 %v1706_v47, %v5015_v51  ;;  %3991 = vrot.lane.b32.xlu1 %v5028_v1, %s4234_s3  ;;  %v3593_v50 = vpop.f32.mrb[49].mxu0  ;;  %v5110_v47 = vld [vmem:[%s5441_s1 + $0x20] sm:$0xf] }
 0xda6   :  { %1723 = vrot.lane.b32.xlu0 %v5031_v48, %s4234_s3 }
 0xda8   :  { %3996 = vrot.lane.b32.xlu1 %v5019_v32, %s4235_s28 }
 0xdaa   :  { %4001 = vrot.lane.b32.xlu0 %v5028_v1, %s4235_s28 }
 0xdac   :  { %2034 = vrot.lane.b32.xlu1 %v5031_v48, %s4235_s28 }
 0xdae   :  { %2016 = vrot.lane.b32.xlu0 %v1687_v5, %s4236_s29 }
 0xdb0   :  { %2018 = vrot.lane.b32.xlu1 %v1692_v19, %s4236_s29 }
 0xdb2   :  { %2020 = vrot.lane.b32.xlu0 %v1697_v38, %s4236_s29 }
 0xe0e   :  { %v3987_v37 = vpop.permute.xlu1 %3986 }
 0xe0f   :  { %v3989_v33 = vunpack.i.h.bf16 %v3987_v37  ;;  %v3988_v55 = vunpack.i.l.bf16 %v3987_v37 }
 0xe11   :  { %v3858_v56 = vpack.c.bf16 %v3989_v33, %v3988_v55 }
 0xe13   :  { %3860 = vmatpush3.bf16.xpose.msk.msra.mxu1 %vm4557_vm14, %v3858_v56 }
 0xe14   :  { %3861 = vmatprep.subr.bf16.mxu1 %v4231_v13 }
 0xe16   :  { %v3992_v57 = vpop.permute.xlu1 %3991 }
 0xe17   :  { %v3994_v49 = vunpack.i.h.bf16 %v3992_v57  ;;  %v3993_v60 = vunpack.i.l.bf16 %v3992_v57 }
 0xe18   :  { %v1724_v62 = vpop.permute.xlu0 %1723 }
 0xe19   :  { %v3862_v8 = vpack.c.bf16 %v3994_v49, %v3993_v60 }
 0xe1a   :  { %v3997_v59 = vpop.permute.xlu1 %3996 }
 0xe1b   :  { %3864 = vmatpush3.bf16.xpose.msk.msra.mxu1 %vm4557_vm14, %v3862_v8  ;;  %v3999_v3 = vunpack.i.h.bf16 %v3997_v59  ;;  %v3998_v35 = vunpack.i.l.bf16 %v3997_v59 }
 0xe1c   :  { %3602 = vmatprep.subr.mxu1 %v4233_v15  ;;  %v4002_v14 = vpop.permute.xlu0 %4001 }
 0xe1d   :  { %v3872_v4 = vpack.c.bf16 %v3999_v3, %v3998_v35  ;;  %v4004_v36 = vunpack.i.h.bf16 %v4002_v14  ;;  %v4003_v17 = vunpack.i.l.bf16 %v4002_v14 }
 0xe1e   :  { %v2035_v40 = vpop.permute.xlu1 %2034 }
 0xe1f   :  { %v3876_v18 = vpack.c.bf16 %v4004_v36, %v4003_v17 }
 0xe20   :  { %v2017_v23 = vpop.permute.xlu0 %2016 }
 0xe22   :  { %v2019_v46 = vpop.permute.xlu1 %2018 }
 0xe23   :  { %3603 = vmatpush3.xpose.msk.msra.mxu1 %vm385_vm13, %v1724_v62 }
 0xe24   :  { %3871 = vmatprep.subr.bf16.mxu1 %v4231_v13  ;;  %v2021_v21 = vpop.permute.xlu0 %2020 }
 0xe26   :  { %3605 = vmatmul.mubr.msk.f32.vlgmr.msra.gmra.mrb[40].mxu1 %vm385_vm13, %v1687_v5 }
 0xe27   :  { %3874 = vmatpush3.bf16.xpose.msk.msra.mxu1 %vm4557_vm14, %v3872_v4  ;;  %3607 = vmatprep.mubr.msk.f32.mxu1 %vm4232_vm12, %v4233_v15 }
 0xe28   :  { %3875 = vmatprep.subr.bf16.mxu1 %v4231_v13 }
 0xe2a   :  { %3608 = vmatmul.mubr.msk.f32.gmra.mrb[42].mxu1 %vm385_vm13, %v1692_v19 }
 0xe2b   :  { %3610 = vmatprep.mubr.msk.f32.mxu1 %vm4232_vm12, %v4233_v15 }
 0xe2e   :  { %3611 = vmatmul.mubr.msk.f32.gmra.mrb[44].mxu1 %vm385_vm13, %v1697_v38 }
 0xe2f   :  { %3878 = vmatpush3.bf16.xpose.msk.msra.mxu1 %vm4557_vm14, %v3876_v18  ;;  %3613 = vmatprep.mubr.msk.f32.mxu1 %vm4232_vm12, %v4233_v15 }
 0xe30   :  { %3652 = vmatprep.subr.mxu1 %v4233_v15 }
 0xe32   :  { %3614 = vmatmul.mubr.msk.f32.gmra.mrb[46].mxu1 %vm385_vm13, %v5025_v54 }
 0xe33   :  { %3616 = vmatprep.mubr.msk.f32.mxu1 %vm4232_vm12, %v4233_v15 }
 0xe36   :  { %3617 = vmatmul.mubr.msk.f32.gmra.mrb[48].mxu1 %vm385_vm13, %v5031_v48 }
 0xe37   :  { %3653 = vmatpush3.xpose.msk.msra.mxu1 %vm385_vm13, %v2035_v40  ;;  %3654 = vmatprep.mubr.msk.f32.mxu1 %vm4232_vm12, %v4233_v15 }
 0xe38   :  { %3885 = vmatprep.subr.bf16.mxu1 %v4231_v13 }
 0xe3a   :  { %3655 = vmatmul.mubr.msk.f32.vlgmr.msra.gmra.mrb[50].mxu1 %vm385_vm13, %v2017_v23 }
 0xe3b   :  { %3657 = vmatprep.mubr.msk.f32.mxu1 %vm4232_vm12, %v4233_v15 }
 0xe3e   :  { %3658 = vmatmul.mubr.msk.f32.gmra.mrb[52].mxu1 %vm385_vm13, %v2019_v46 }
 0xe3f   :  { %3660 = vmatprep.mubr.msk.f32.mxu1 %vm4232_vm12, %v4233_v15 }
 0xe42   :  { %3661 = vmatmul.mubr.msk.f32.gmra.mrb[54].mxu1 %vm385_vm13, %v2021_v21 }
 0xe43   :  { %3663 = vmatprep.mubr.msk.f32.mxu1 %vm4232_vm12, %v4233_v15 }
 0xef9   :  { %v1811_v43 = vpop.f32.mrb[40].mxu1 }
 0xefa   :  { %v1812_v9 = vadd.f32 %v4201_v7, %v1811_v43  ;;  %v3606_v12 = vpop.f32.mrb[41].mxu1 }
 0xefc   :  { %v1835_v41 = vsel %vm496_vm15, %v1812_v9, -inf }
 0xefd   :  { %1836 = vmax.xlane.f32.xlu1 %v1835_v41  ;;  %v1816_v45 = vpop.f32.mrb[42].mxu1 }
 0xefe   :  { %v1817_v58 = vadd.f32 %v4202_v52, %v1816_v45  ;;  %v3609_v22 = vpop.f32.mrb[43].mxu1 }
 0xf00   :  { %v1838_v16 = vsel %vm496_vm15, %v1817_v58, -inf }
 0xf01   :  { %1839 = vmax.xlane.f32.xlu0 %v1838_v16  ;;  %v1821_v20 = vpop.f32.mrb[44].mxu1 }
 0xf02   :  { %v1822_v29 = vadd.f32 %v4203_v27, %v1821_v20  ;;  %v3612_v5 = vpop.f32.mrb[45].mxu1 }
 0xf04   :  { %v1841_v19 = vsel %vm496_vm15, %v1822_v29, -inf }
 0xf05   :  { %1842 = vmax.xlane.f32.xlu0 %v1841_v19  ;;  %v1826_v31 = vpop.f32.mrb[46].mxu1 }
 0xf06   :  { %v1827_v2 = vadd.f32 %v5103_v0, %v1826_v31  ;;  %v3615_v63 = vpop.f32.mrb[47].mxu1 }
 0xf08   :  { %v1844_v38 = vsel %vm496_vm15, %v1827_v2, -inf }
 0xf09   :  { %1845 = vmax.xlane.f32.xlu1 %v1844_v38  ;;  %v1831_v25 = vpop.f32.mrb[48].mxu1 }
 0xf0a   :  { %v1832_v50 = vadd.f32 %v5110_v47, %v1831_v25  ;;  %v3618_v37 = vpop.f32.mrb[49].mxu1 }
 0xf0c   :  { %v1847_v33 = vsel %vm509_vm2, %v1832_v50, -inf }
 0xf0d   :  { %1848 = vmax.xlane.f32.xlu0 %v1847_v33  ;;  %v2122_v55 = vpop.f32.mrb[50].mxu1 }
 0xf0e   :  { %v2123_v56 = vadd.f32 %v4201_v7, %v2122_v55  ;;  %v3656_v57 = vpop.f32.mrb[51].mxu1 }
 0xf10   :  { %v2146_v49 = vsel %vm496_vm15, %v2123_v56, -inf }
 0xf11   :  { %2147 = vmax.xlane.f32.xlu1 %v2146_v49  ;;  %v2127_v60 = vpop.f32.mrb[52].mxu1 }
 0xf12   :  { %v2128_v8 = vadd.f32 %v4202_v52, %v2127_v60  ;;  %v3659_v59 = vpop.f32.mrb[53].mxu1 }
 0xf14   :  { %v2149_v62 = vsel %vm496_vm15, %v2128_v8, -inf }
 0xf15   :  { %2150 = vmax.xlane.f32.xlu0 %v2149_v62  ;;  %v2132_v3 = vpop.f32.mrb[54].mxu1 }
 0xf16   :  { %v2133_v35 = vadd.f32 %v4203_v27, %v2132_v3  ;;  %v3662_v4 = vpop.f32.mrb[55].mxu1 }
 0xf18   :  { %v2152_v14 = vsel %vm496_vm15, %v2133_v35, -inf }
 0xf19   :  { %2153 = vmax.xlane.f32.xlu1 %v2152_v14 }
 0xf2a   :  { %4006 = vrot.lane.b32.xlu1 %v5019_v32, %s4237_s30 }
 0xf2b   :  { %4011 = vrot.lane.b32.xlu0 %v5028_v1, %s4237_s30 }
 0xf2e   :  { %1898 = vrot.lane.b32.xlu1 %v5031_v48, %s4237_s30 }
 0xf8a   :  { %v1837_v36 = vpop.xlane.xlu1 %1836 }
 0xf8b   :  { %v1850_v17 = vsub.f32 %v1812_v9, %v1837_v36 }
 0xf8d   :  { %v1855_v18 = vmul.f32 1.442695, %v1850_v17 }
 0xf8e   :  { %v1840_v40 = vpop.xlane.xlu0 %1839 }
 0xf8f   :  { %4135 = vpow2.f32 %v1855_v18  ;;  %v1851_v23 = vsub.f32 %v1817_v58, %v1840_v40 }
 0xf91   :  { %v1857_v46 = vmul.f32 1.442695, %v1851_v23 }
 0xf92   :  { %v1843_v21 = vpop.xlane.xlu0 %1842 }
 0xf93   :  { %4137 = vpow2.f32 %v1857_v46  ;;  %v1852_v43 = vsub.f32 %v1822_v29, %v1843_v21 }
 0xf95   :  { %v1859_v7 = vmul.f32 1.442695, %v1852_v43 }
 0xf96   :  { %v1846_v12 = vpop.xlane.xlu1 %1845 }
 0xf97   :  { %4139 = vpow2.f32 %v1859_v7  ;;  %v1853_v41 = vsub.f32 %v1827_v2, %v1846_v12 }
 0xf99   :  { %v5123_v45 = vpop.eup %4135  ;;  %v1861_v52 = vmul.f32 1.442695, %v1853_v41 }
 0xf9a   :  { %v1849_v22 = vpop.xlane.xlu0 %1848  ;;  %v1865_v16 = vsel %vm496_vm15, %v5123_v45, 0.0 }
 0xf9b   :  { %4141 = vpow2.f32 %v1861_v52  ;;  %v1854_v9 = vsub.f32 %v1832_v50, %v1849_v22  ;;  %1866 = vadd.xlane.f32.xlu0 %v1865_v16 }
 0xf9d   :  { %v5127_v20 = vpop.eup %4137  ;;  %v1863_v58 = vmul.f32 1.442695, %v1854_v9 }
 0xf9e   :  { %v2148_v27 = vpop.xlane.xlu1 %2147  ;;  %v1868_v29 = vsel %vm496_vm15, %v5127_v20, 0.0 }
 0xf9f   :  { %4143 = vpow2.f32 %v1863_v58  ;;  %v2161_v5 = vsub.f32 %v2123_v56, %v2148_v27  ;;  %1869 = vadd.xlane.f32.xlu1 %v1868_v29 }
 0xfa1   :  { %v5131_v19 = vpop.eup %4139  ;;  %v2166_v31 = vmul.f32 1.442695, %v2161_v5 }
 0xfa2   :  { %v2151_v2 = vpop.xlane.xlu0 %2150  ;;  %v1871_v63 = vsel %vm496_vm15, %v5131_v19, 0.0 }
 0xfa3   :  { %4145 = vpow2.f32 %v2166_v31  ;;  %v2162_v38 = vsub.f32 %v2128_v8, %v2151_v2  ;;  %1872 = vadd.xlane.f32.xlu0 %v1871_v63 }
 0xfa5   :  { %v5135_v25 = vpop.eup %4141  ;;  %v2168_v50 = vmul.f32 1.442695, %v2162_v38 }
 0xfa6   :  { %v2154_v37 = vpop.xlane.xlu1 %2153  ;;  %v1874_v33 = vsel %vm496_vm15, %v5135_v25, 0.0  ;;  %v4012_v49 = vpop.permute.xlu0 %4011 }
 0xfa7   :  { %4147 = vpow2.f32 %v2168_v50  ;;  %v2163_v55 = vsub.f32 %v2133_v35, %v2154_v37  ;;  %1875 = vadd.xlane.f32.xlu1 %v1874_v33  ;;  %v4014_v4 = vunpack.i.h.bf16 %v4012_v49  ;;  %v4013_v14 = vunpack.i.l.bf16 %v4012_v49 }
 0xfa9   :  { %v5139_v56 = vpop.eup %4143  ;;  %v2170_v57 = vmul.f32 1.442695, %v2163_v55  ;;  %v3869_v18 = vpack.c.bf16 %v4014_v4, %v4013_v14  ;;  %v4030_v4 = vpack.i.bf16 %v4970_v44, %v4965_v39 }
 0xfaa   :  { %v4007_v60 = vpop.permute.xlu1 %4006  ;;  %v1877_v59 = vsel %vm509_vm2, %v5139_v56, 0.0 }
 0xfab   :  { %4149 = vpow2.f32 %v2170_v57  ;;  %v4009_v8 = vunpack.i.h.bf16 %v4007_v60  ;;  %v4008_v62 = vunpack.i.l.bf16 %v4007_v60  ;;  %1878 = vadd.xlane.f32.xlu0 %v1877_v59 }
 0xfad   :  { %v5143_v3 = vpop.eup %4145  ;;  %v3866_v36 = vpack.c.bf16 %v4009_v8, %v4008_v62 }
 0xfae   :  { %v2176_v35 = vsel %vm496_vm15, %v5143_v3, 0.0  ;;  %v1899_v46 = vpop.permute.xlu1 %1898 }
 0xfaf   :  { %2177 = vadd.xlane.f32.xlu1 %v2176_v35  ;;  %3867 = vmatpush3.bf16.msra.mxu0 %v3866_v36 }
 0xfb0   :  { %3868 = vmatprep.subr.bf16.mxu0 %v4231_v13 }
 0xfb1   :  { %v5148_v17 = vpop.eup %4147 }
 0xfb2   :  { %v2179_v40 = vsel %vm496_vm15, %v5148_v17, 0.0 }
 0xfb3   :  { %2180 = vadd.xlane.f32.xlu0 %v2179_v40  ;;  %3870 = vmatpush3.bf16.msra.mxu0 %v3869_v18 }
 0xfb4   :  { %3627 = vmatprep.subr.mxu0 %v4233_v15 }
 0xfb5   :  { %v5153_v23 = vpop.eup %4149 }
 0xfb6   :  { %v2182_v21 = vsel %vm496_vm15, %v5153_v23, 0.0 }
 0xfb7   :  { %2183 = vadd.xlane.f32.xlu0 %v2182_v21  ;;  %3628 = vmatpush3.msk.msra.mxu0 %vm582_vm3, %v1899_v46 }
 0xfb8   :  { %3879 = vmatprep.subr.bf16.mxu0 %v4231_v13 }
 0xfc0   :  { %4021 = vrot.lane.b32.xlu1 %v5028_v1, %s4238_s2 }
 0xfc4   :  { %2209 = vrot.lane.b32.xlu1 %v5031_v48, %s4238_s2 }
 0xfc8   :  { %2022 = vrot.lane.b32.xlu1 %v5025_v54, %s4236_s29 }
 0xfcd   :  { %4016 = vrot.lane.b32.xlu0 %v5019_v32, %s4238_s2 }
 0xfd1   :  { %2024 = vrot.lane.b32.xlu0 %v5031_v48, %s4236_s29 }
0x1028   :  { %v1867_v43 = vpop.xlane.xlu0 %1866 }
0x1029   :  { %4151 = vrcp.f32 %v1867_v43 }
0x102c   :  { %v1870_v7 = vpop.xlane.xlu1 %1869 }
0x102d   :  { %4153 = vrcp.f32 %v1870_v7 }
0x1030   :  { %v1873_v12 = vpop.xlane.xlu0 %1872 }
0x1031   :  { %4155 = vrcp.f32 %v1873_v12 }
0x1033   :  { %v4152_v41 = vpop.eup %4151 }
0x1034   :  { %v1881_v1 = vmul.f32 %v4152_v41, %v5123_v45  ;;  %v1876_v52 = vpop.xlane.xlu1 %1875 }
0x1035   :  { %4157 = vrcp.f32 %v1876_v52 }
0x1036   :  { %3630 = vmatmul.mubr.msk.f32.vlgmr.msra.gmra.mrb[50].mxu0 %vm496_vm15, %v1881_v1 }
0x1037   :  { %v4154_v54 = vpop.eup %4153  ;;  %3632 = vmatprep.mubr.msk.f32.mxu0 %vm4232_vm12, %v4233_v15 }
0x1038   :  { %v1879_v32 = vpop.xlane.xlu0 %1878  ;;  %v1883_v48 = vmul.f32 %v4154_v54, %v5127_v20 }
0x1039   :  { %4159 = vrcp.f32 %v1879_v32 }
0x103a   :  { %3633 = vmatmul.mubr.msk.f32.gmra.mrb[52].mxu0 %vm496_vm15, %v1883_v48 }
0x103b   :  { %v4156_v22 = vpop.eup %4155  ;;  %3635 = vmatprep.mubr.msk.f32.mxu0 %vm4232_vm12, %v4233_v15 }
0x103c   :  { %v2178_v16 = vpop.xlane.xlu1 %2177  ;;  %v1885_v45 = vmul.f32 %v4156_v22, %v5131_v19 }
0x103d   :  { %4161 = vrcp.f32 %v2178_v16 }
0x103e   :  { %3636 = vmatmul.mubr.msk.f32.gmra.mrb[54].mxu0 %vm496_vm15, %v1885_v45 }
0x103f   :  { %v4158_v9 = vpop.eup %4157  ;;  %3638 = vmatprep.mubr.msk.f32.mxu0 %vm4232_vm12, %v4233_v15 }
0x1040   :  { %v2181_v58 = vpop.xlane.xlu0 %2180  ;;  %v4022_v27 = vpop.permute.xlu1 %4021  ;;  %v1887_v20 = vmul.f32 %v4158_v9, %v5135_v25 }
0x1041   :  { %4163 = vrcp.f32 %v2181_v58  ;;  %v4024_v50 = vunpack.i.h.bf16 %v4022_v27  ;;  %v4023_v37 = vunpack.i.l.bf16 %v4022_v27 }
0x1042   :  { %3639 = vmatmul.mubr.msk.f32.gmra.mrb[56].mxu0 %vm496_vm15, %v1887_v20 }
0x1043   :  { %v4160_v29 = vpop.eup %4159  ;;  %3641 = vmatprep.mubr.msk.f32.mxu0 %vm4232_vm12, %v4233_v15 }
0x1044   :  { %v2184_v5 = vpop.xlane.xlu0 %2183  ;;  %v2210_v31 = vpop.permute.xlu1 %2209  ;;  %v1889_v19 = vmul.f32 %v4160_v29, %v5139_v56  ;;  %v3883_v56 = vpack.c.bf16 %v4024_v50, %v4023_v37 }
0x1045   :  { %4165 = vrcp.f32 %v2184_v5 }
0x1046   :  { %3642 = vmatmul.mubr.msk.f32.gmra.mrb[58].mxu0 %vm496_vm15, %v1889_v19 }
0x1047   :  { %3679 = vmatprep.mubr.msk.f32.mxu0 %vm4232_vm12, %v4233_v15  ;;  %v4162_v57 = vpop.eup %4161 }
0x1048   :  { %v4017_v2 = vpop.permute.xlu0 %4016  ;;  %v2023_v63 = vpop.permute.xlu1 %2022  ;;  %v2192_v49 = vmul.f32 %v4162_v57, %v5143_v3  ;;  %v4025_v3 = vpack.i.bf16 %v4955_v24, %v4950_v30 }
0x1049   :  { %v4019_v38 = vunpack.i.h.bf16 %v4017_v2  ;;  %v4018_v25 = vunpack.i.l.bf16 %v4017_v2  ;;  %3664 = vmatmul.mubr.msk.f32.gmra.mrb[56].mxu1 %vm385_vm13, %v2023_v63 }
0x104a   :  { %3666 = vmatprep.mubr.msk.f32.mxu1 %vm4232_vm12, %v4233_v15  ;;  %4026 = vrot.lane.b32.xlu1 %v4025_v3, %s4239_s19 }
0x104b   :  { %v3880_v33 = vpack.c.bf16 %v4019_v38, %v4018_v25  ;;  %v4164_v60 = vpop.eup %4163 }
0x104c   :  { %v2025_v55 = vpop.permute.xlu0 %2024  ;;  %v2194_v59 = vmul.f32 %v4164_v60, %v5148_v17 }
0x104d   :  { %3667 = vmatmul.mubr.msk.f32.gmra.mrb[58].mxu1 %vm385_vm13, %v2025_v55  ;;  %3881 = vmatpush3.bf16.msra.mxu0 %v3880_v33 }
0x104e   :  { %3882 = vmatprep.subr.bf16.mxu0 %v4231_v13  ;;  %3702 = vmatprep.mubr.msk.f32.mxu1 %vm4232_vm12, %v4233_v15 }
0x104f   :  { %v4166_v8 = vpop.eup %4165  ;;  %4031 = vrot.lane.b32.xlu1 %v4030_v4, %s4239_s19 }
0x1050   :  { %v2196_v62 = vmul.f32 %v4166_v8, %v5153_v23 }
0x1051   :  { %3884 = vmatpush3.bf16.msra.mxu0 %v3883_v56 }
0x1052   :  { %3677 = vmatprep.subr.mxu0 %v4233_v15 }
0x1055   :  { %3678 = vmatpush3.msk.msra.mxu0 %vm582_vm3, %v2210_v31 }
0x1056   :  { %3680 = vmatmul.mubr.msk.f32.vlgmr.msra.gmra.mrb[60].mxu0 %vm496_vm15, %v2192_v49  ;;  %3891 = vmatprep.subr.bf16.mxu0 %v4231_v13 }
0x1057   :  { %3682 = vmatprep.mubr.msk.f32.mxu0 %vm4232_vm12, %v4233_v15 }
0x105a   :  { %3683 = vmatmul.mubr.msk.f32.gmra.mrb[62].mxu0 %vm496_vm15, %v2194_v59 }
0x105b   :  { %3685 = vmatprep.mubr.msk.f32.mxu0 %vm4232_vm12, %v4233_v15 }
0x105e   :  { %3686 = vmatmul.mubr.msk.f32.gmra.mrb[64].mxu0 %vm496_vm15, %v2196_v62 }
0x105f   :  { %3688 = vmatprep.mubr.msk.f32.mxu0 %vm4232_vm12, %v4233_v15 }
0x10bc   :  { %v4027_v24 = vpop.permute.xlu1 %4026 }
0x10bd   :  { %v4029_v39 = vunpack.i.h.bf16 %v4027_v24  ;;  %v4028_v44 = vunpack.i.l.bf16 %v4027_v24 }
0x10bf   :  { %v3886_v46 = vpack.c.bf16 %v4029_v39, %v4028_v44 }
0x10c1   :  { %3887 = vmatpush3.bf16.msra.mxu1 %v3886_v46  ;;  %v4032_v41 = vpop.permute.xlu1 %4031 }
0x10c2   :  { %3888 = vmatprep.subr.bf16.mxu1 %v4231_v13  ;;  %v4034_v1 = vunpack.i.h.bf16 %v4032_v41  ;;  %v4033_v52 = vunpack.i.l.bf16 %v4032_v41 }
0x10c4   :  { %v3889_v48 = vpack.c.bf16 %v4034_v1, %v4033_v52 }
0x10c6   :  { %3890 = vmatpush3.bf16.msra.mxu1 %v3889_v48 }
0x10c7   :  { %3897 = vmatprep.subr.bf16.mxu1 %v4231_v13 }
0x1109   :  { %v1987_v14 = vpop.f32.mrb[50].mxu0 }
0x110a   :  { %2011 = vst.msk [vmem:[#allocation2] sm:$0xff] %vm385_vm13, %v1987_v14  ;;  %v3631_v36 = vpop.f32.mrb[51].mxu0 }
0x110d   :  { %v1992_v35 = vpop.f32.mrb[52].mxu0 }
0x110e   :  { %2012 = vst.msk [vmem:[#allocation2 + $0x8] sm:$0xff] %vm385_vm13, %v1992_v35  ;;  %v3634_v17 = vpop.f32.mrb[53].mxu0 }
0x1111   :  { %v1997_v18 = vpop.f32.mrb[54].mxu0 }
0x1112   :  { %2013 = vst.msk [vmem:[#allocation2 + $0x10] sm:$0xff] %vm385_vm13, %v1997_v18  ;;  %v3637_v40 = vpop.f32.mrb[55].mxu0 }
0x1115   :  { %v2002_v30 = vpop.f32.mrb[56].mxu0 }
0x1116   :  { %2014 = vst.msk [vmem:[#allocation2 + $0x18] sm:$0xff] %vm385_vm13, %v2002_v30  ;;  %v3640_v23 = vpop.f32.mrb[57].mxu0 }
0x1119   :  { %v2007_v21 = vpop.f32.mrb[58].mxu0 }
0x111a   :  { %2015 = vst.msk [vmem:[#allocation2 + $0x20] sm:$0xf] %vm679_vm4, %v2007_v21  ;;  %v3643_v43 = vpop.f32.mrb[59].mxu0 }
0x111c   :  { %v2137_v7 = vpop.f32.mrb[56].mxu1 }
0x111d   :  { %v3665_v12 = vpop.f32.mrb[57].mxu1  ;;  %v2138_v5 = vadd.f32 %v5103_v0, %v2137_v7 }
0x111f   :  { %v2155_v31 = vsel %vm496_vm15, %v2138_v5, -inf }
0x1120   :  { %v2142_v54 = vpop.f32.mrb[58].mxu1 }
0x1121   :  { %v3668_v32 = vpop.f32.mrb[59].mxu1  ;;  %v2143_v20 = vadd.f32 %v5110_v47, %v2142_v54 }
0x1123   :  { %v2158_v29 = vsel %vm509_vm2, %v2143_v20, -inf }
0x1129   :  { %v2298_v22 = vpop.f32.mrb[60].mxu0 }
0x112a   :  { %2327 = vrot.lane.b32.xlu0 %v2298_v22, %s4240_s20  ;;  %v3681_v16 = vpop.f32.mrb[61].mxu0 }
0x112d   :  { %v2303_v45 = vpop.f32.mrb[62].mxu0 }
0x112e   :  { %2329 = vrot.lane.b32.xlu0 %v2303_v45, %s4240_s20  ;;  %v3684_v9 = vpop.f32.mrb[63].mxu0 }
0x1131   :  { %v2308_v58 = vpop.f32.mrb[64].mxu0 }
0x1132   :  { %2369 = vrot.lane.b32.xlu0 %v5015_v51, %s4239_s19  ;;  %2331 = vrot.lane.b32.xlu1 %v2308_v58, %s4240_s20  ;;  %v3687_v27 = vpop.f32.mrb[65].mxu0 }
0x1151   :  { %2159 = vmax.xlane.f32.xlu0 %v2158_v29  ;;  %v5270_v29 = vrot.slane %v5010_v28, %v1216_v34  ;;  %v3178_v34 = vld [vmem:[%s5445_s5 + $0x78] sm:$0xff] }
0x1156   :  { %2156 = vmax.xlane.f32.xlu1 %v2155_v31  ;;  %v3176_v31 = vld [vmem:[%s5445_s5 + $0x68] sm:$0xff] }
0x119c   :  { %v2328_v19 = vpop.permute.xlu0 %2327 }
0x119d   :  { %2342 = vst.msk [vmem:[#allocation2] sm:$0xff] %vm1007_vm5, %v2328_v19  ;;  %v3177_v19 = vld [vmem:[%s5445_s5 + $0x70] sm:$0xff] }
0x11a0   :  { %v2330_v2 = vpop.permute.xlu0 %2329 }
0x11a1   :  { %2343 = vst.msk [vmem:[#allocation2 + $0x8] sm:$0xff] %vm1007_vm5, %v2330_v2 }
0x11a4   :  { %v2332_v51 = vpop.permute.xlu1 %2331  ;;  %v2347_v63 = vld [vmem:[#allocation2] sm:$0xff]  ;;  %v5245_v38 = vpop.permute.xlu0 %2369 }
0x11a5   :  { %2344 = vst.msk [vmem:[#allocation2 + $0x10] sm:$0xff] %vm1007_vm5, %v2332_v51  ;;  %3703 = vmatmul.mubr.msk.f32.vlgmr.msra.gmra.mrb[60].mxu1 %vm40_vm0, %v2347_v63  ;;  %v3895_v51 = vpack.c.bf16 %v3178_v34, %v3177_v19 }
0x11a6   :  { %3705 = vmatprep.mubr.msk.f32.mxu1 %vm4232_vm12, %v4233_v15 }
0x11a8   :  { %v2348_v0 = vld [vmem:[#allocation2 + $0x8] sm:$0xff] }
0x11a9   :  { %3706 = vmatmul.mubr.msk.f32.gmra.mrb[62].mxu1 %vm40_vm0, %v2348_v0 }
0x11aa   :  { %3708 = vmatprep.mubr.msk.f32.mxu1 %vm4232_vm12, %v4233_v15 }
0x11ac   :  { %v2349_v47 = vld [vmem:[#allocation2 + $0x10] sm:$0xff] }
0x11ad   :  { %3709 = vmatmul.mubr.msk.f32.gmra.mrb[64].mxu1 %vm40_vm0, %v2349_v47 }
0x11ae   :  { %3711 = vmatprep.mubr.msk.f32.mxu1 %vm4232_vm12, %v4233_v15 }
0x11de   :  { %v2160_v37 = vpop.xlane.xlu0 %2159 }
0x11df   :  { %v2165_v33 = vsub.f32 %v2143_v20, %v2160_v37 }
0x11e1   :  { %v2174_v56 = vmul.f32 1.442695, %v2165_v33 }
0x11e3   :  { %v2157_v25 = vpop.xlane.xlu1 %2156 }
0x11e4   :  { %v2164_v50 = vsub.f32 %v2138_v5, %v2157_v25  ;;  %v3175_v5 = vld [vmem:[%s5445_s5 + $0x60] sm:$0xff] }
0x11e5   :  { %v3892_v2 = vpack.c.bf16 %v3176_v31, %v3175_v5 }
0x11e6   :  { %v2172_v55 = vmul.f32 1.442695, %v2164_v50 }
0x11e7   :  { %3893 = vmatpush3.bf16.msra.mxu0 %v3892_v2 }
0x11e8   :  { %4167 = vpow2.f32 %v2172_v55  ;;  %3894 = vmatprep.subr.bf16.mxu0 %v4231_v13 }
0x11e9   :  { %4169 = vpow2.f32 %v2174_v56 }
0x11eb   :  { %3896 = vmatpush3.bf16.msra.mxu0 %v3895_v51 }
0x11ec   :  { %3909 = vmatprep.subr.bf16.mxu0 %v4231_v13 }
0x11f2   :  { %v4168_v40 = vpop.eup %4167 }
0x11f3   :  { %v2185_v30 = vsel %vm496_vm15, %v4168_v40, 0.0  ;;  %v4170_v23 = vpop.eup %4169 }
0x11f4   :  { %v2188_v39 = vsel %vm509_vm2, %v4170_v23, 0.0 }
0x1278   :  { %v2453_v57 = vpop.f32.mrb[60].mxu1 }
0x1279   :  { %v2454_v49 = vadd.f32 %v2453_v57, %v5245_v38  ;;  %v3704_v60 = vpop.f32.mrb[61].mxu1 }
0x127b   :  { %v2477_v59 = vadd.f32 %v2454_v49, %v4977_v6 }
0x127c   :  { %v2458_v8 = vpop.f32.mrb[62].mxu1 }
0x127d   :  { %v2459_v62 = vadd.f32 %v2458_v8, %v5245_v38  ;;  %v3707_v3 = vpop.f32.mrb[63].mxu1  ;;  %v2482_v4 = vsel %vm40_vm0, %v2477_v59, 0.0 }
0x127e   :  { %2483 = vadd.xlane.f32.xlu0 %v2482_v4 }
0x127f   :  { %v2478_v14 = vadd.f32 %v2459_v62, %v4983_v11 }
0x1280   :  { %v2463_v36 = vpop.f32.mrb[64].mxu1 }
0x1281   :  { %v2464_v35 = vadd.f32 %v2463_v36, %v5245_v38  ;;  %v3710_v17 = vpop.f32.mrb[65].mxu1  ;;  %v2485_v18 = vsel %vm40_vm0, %v2478_v14, 0.0 }
0x1282   :  { %2486 = vadd.xlane.f32.xlu1 %v2485_v18 }
0x1283   :  { %v2479_v6 = vadd.f32 %v2464_v35, %v4989_v61 }
0x1285   :  { %v2488_v24 = vsel %vm40_vm0, %v2479_v6, 0.0 }
0x1286   :  { %2186 = vadd.xlane.f32.xlu1 %v2185_v30  ;;  %2489 = vadd.xlane.f32.xlu0 %v2488_v24 }
0x128a   :  { %2189 = vadd.xlane.f32.xlu0 %v2188_v39  ;;  %v3179_v39 = vld [vmem:[%s5445_s5 + $0x80] sm:$0xff] }
0x130b   :  { %v2484_v11 = vpop.xlane.xlu0 %2483 }
0x130c   :  { %v2497_v44 = vmul.f32 0.03125, %v2484_v11  ;;  %v3182_v11 = vld [vmem:[%s5445_s5 + $0x98] sm:$0xff] }
0x130e   :  { %v2502_v46 = vsub.f32 %v2477_v59, %v2497_v44 }
0x130f   :  { %v2487_v21 = vpop.xlane.xlu1 %2486 }
0x1310   :  { %v2498_v43 = vmul.f32 0.03125, %v2487_v21  ;;  %v2507_v7 = vmul.f32 %v2502_v46, %v2502_v46  ;;  %v3184_v21 = vld [vmem:[%s5445_s5 + $0xa8] sm:$0xff] }
0x1312   :  { %v2503_v12 = vsub.f32 %v2478_v14, %v2498_v43  ;;  %v2512_v41 = vsel %vm40_vm0, %v2507_v7, 0.0  ;;  %v3185_v7 = vld [vmem:[%s5445_s5 + $0xb0] sm:$0xff] }
0x1313   :  { %2513 = vadd.xlane.f32.xlu1 %v2512_v41  ;;  %v2187_v61 = vpop.xlane.xlu1 %2186  ;;  %v2490_v1 = vpop.xlane.xlu0 %2489 }
0x1314   :  { %4171 = vrcp.f32 %v2187_v61  ;;  %v2499_v52 = vmul.f32 0.03125, %v2490_v1  ;;  %v2508_v54 = vmul.f32 %v2503_v12, %v2503_v12 }
0x1316   :  { %v2504_v32 = vsub.f32 %v2479_v6, %v2499_v52  ;;  %v2515_v48 = vsel %vm40_vm0, %v2508_v54, 0.0  ;;  %v5314_v6 = vrot.slane %v5010_v28, %v1246_v42  ;;  %v3898_v42 = vpack.c.bf16 %v3180_v53, %v3179_v39  ;;  %v3181_v28 = vld [vmem:[%s5445_s5 + $0x90] sm:$0xff] }
0x1317   :  { %2516 = vadd.xlane.f32.xlu0 %v2515_v48  ;;  %v2190_v22 = vpop.xlane.xlu0 %2189  ;;  %v3901_v44 = vpack.c.bf16 %v3182_v11, %v3181_v28 }
0x1318   :  { %4173 = vrcp.f32 %v2190_v22  ;;  %v2509_v16 = vmul.f32 %v2504_v32, %v2504_v32  ;;  %3899 = vmatpush3.bf16.msra.mxu1 %v3898_v42 }
0x1319   :  { %3900 = vmatprep.subr.bf16.mxu1 %v4231_v13 }
0x131a   :  { %v2518_v45 = vsel %vm40_vm0, %v2509_v16, 0.0 }
0x131b   :  { %2519 = vadd.xlane.f32.xlu1 %v2518_v45 }
0x131c   :  { %3902 = vmatpush3.bf16.msra.mxu1 %v3901_v44 }
0x131d   :  { %3903 = vmatprep.subr.bf16.mxu1 %v4231_v13 }
0x131e   :  { %v4172_v9 = vpop.eup %4171 }
0x131f   :  { %v2198_v58 = vmul.f32 %v4172_v9, %v4168_v40 }
0x1321   :  { %3689 = vmatmul.mubr.msk.f32.gmra.mrb[66].mxu0 %vm496_vm15, %v2198_v58 }
0x1322   :  { %v4174_v27 = vpop.eup %4173  ;;  %3691 = vmatprep.mubr.msk.f32.mxu0 %vm4232_vm12, %v4233_v15 }
0x1323   :  { %v2200_v20 = vmul.f32 %v4174_v27, %v4170_v23 }
0x1325   :  { %3692 = vmatmul.mubr.msk.f32.gmra.mrb[68].mxu0 %vm496_vm15, %v2200_v20 }
0x1326   :  { %3725 = vmatprep.mubr.msk.f32.mxu0 %vm4232_vm12, %v4233_v15 }
0x132d   :  { %2557 = vrot.lane.b32.xlu0 %v5270_v29, %s4234_s3 }
0x1331   :  { %2733 = vrot.lane.b32.xlu0 %v5314_v6, %s4237_s30 }
0x13a0   :  { %v2514_v63 = vpop.xlane.xlu1 %2513 }
0x13a1   :  { %v2527_v0 = vmul.f32 0.03125, %v2514_v63 }
0x13a3   :  { %v2532_v47 = vadd.f32 1e-05, %v2527_v0 }
0x13a4   :  { %v2517_v25 = vpop.xlane.xlu0 %2516 }
0x13a5   :  { %4175 = vrsqrt.f32 %v2532_v47  ;;  %v2528_v50 = vmul.f32 0.03125, %v2517_v25 }
0x13a7   :  { %v2533_v37 = vadd.f32 1e-05, %v2528_v50 }
0x13a8   :  { %v2520_v33 = vpop.xlane.xlu1 %2519  ;;  %v5288_v60 = vpop.permute.xlu0 %2557 }
0x13a9   :  { %4177 = vrsqrt.f32 %v2533_v37  ;;  %v2529_v55 = vmul.f32 0.03125, %v2520_v33 }
0x13ab   :  { %v2534_v56 = vadd.f32 1e-05, %v2529_v55 }
0x13ad   :  { %4179 = vrsqrt.f32 %v2534_v56 }
0x13af   :  { %v4176_v57 = vpop.eup %4175 }
0x13b0   :  { %v2542_v49 = vmul.f32 %v4176_v57, %v2502_v46  ;;  %v3183_v46 = vld [vmem:[%s5445_s5 + $0xa0] sm:$0xff] }
0x13b1   :  { %v3904_v43 = vpack.c.bf16 %v3184_v21, %v3183_v46 }
0x13b2   :  { %v2551_v59 = vmul.f32 %v5270_v29, %v2542_v49 }
0x13b3   :  { %v4178_v8 = vpop.eup %4177  ;;  %3905 = vmatpush3.bf16.msra.mxu1 %v3904_v43  ;;  %v2734_v43 = vpop.permute.xlu0 %2733 }
0x13b4   :  { %v5292_v62 = vadd.f32 %v5288_v60, %v2551_v59  ;;  %v2543_v3 = vmul.f32 %v4178_v8, %v2503_v12  ;;  %3906 = vmatprep.subr.bf16.mxu1 %v4231_v13  ;;  %v3186_v12 = vld [vmem:[%s5445_s5 + $0xb8] sm:$0xff] }
0x13b5   :  { %v3907_v41 = vpack.c.bf16 %v3186_v12, %v3185_v7 }
0x13b6   :  { %3726 = vmatmul.mubr.msk.f32.vlgmr.msra.gmra.mrb[70].mxu0 %vm40_vm0, %v5292_v62  ;;  %v2552_v4 = vmul.f32 %v5270_v29, %v2543_v3 }
0x13b7   :  { %v4180_v14 = vpop.eup %4179  ;;  %3728 = vmatprep.mubr.msk.f32.mxu0 %vm4232_vm12, %v4233_v15  ;;  %3908 = vmatpush3.bf16.msra.mxu1 %v3907_v41 }
0x13b8   :  { %v2561_v36 = vadd.f32 %v5288_v60, %v2552_v4  ;;  %v2544_v35 = vmul.f32 %v4180_v14, %v2504_v32 }
0x13ba   :  { %3729 = vmatmul.mubr.msk.f32.gmra.mrb[72].mxu0 %vm40_vm0, %v2561_v36  ;;  %v2553_v17 = vmul.f32 %v5270_v29, %v2544_v35 }
0x13bb   :  { %3731 = vmatprep.mubr.msk.f32.mxu0 %vm4232_vm12, %v4233_v15 }
0x13bc   :  { %v5305_v18 = vadd.f32 %v5288_v60, %v2553_v17 }
0x13be   :  { %3732 = vmatmul.mubr.msk.f32.gmra.mrb[74].mxu0 %vm40_vm0, %v5305_v18 }
0x13bf   :  { %3734 = vmatprep.mubr.msk.f32.mxu0 %vm4232_vm12, %v4233_v15 }
0x13f4   :  { %v2313_v40 = vpop.f32.mrb[66].mxu0 }
0x13f5   :  { %v3690_v30 = vpop.f32.mrb[67].mxu0  ;;  %2333 = vrot.lane.b32.xlu1 %v2313_v40, %s4240_s20 }
0x13f8   :  { %v2318_v24 = vpop.f32.mrb[68].mxu0 }
0x13f9   :  { %2335 = vrot.lane.b32.xlu1 %v2318_v24, %s4240_s20  ;;  %v3693_v23 = vpop.f32.mrb[69].mxu0 }
0x1467   :  { %v2334_v61 = vpop.permute.xlu1 %2333 }
0x1468   :  { %2345 = vst.msk [vmem:[#allocation2 + $0x18] sm:$0xff] %vm1007_vm5, %v2334_v61 }
0x146b   :  { %v2336_v1 = vpop.permute.xlu1 %2335 }
0x146c   :  { %2346 = vst.msk [vmem:[#allocation2 + $0x20] sm:$0xf] %vm1012_vm6, %v2336_v1 }
0x146f   :  { %v2350_v52 = vld [vmem:[#allocation2 + $0x18] sm:$0xff] }
0x1470   :  { %3712 = vmatmul.mubr.msk.f32.gmra.mrb[66].mxu1 %vm40_vm0, %v2350_v52 }
0x1471   :  { %3714 = vmatprep.mubr.msk.f32.mxu1 %vm4232_vm12, %v4233_v15 }
0x1473   :  { %v2351_v54 = vld [vmem:[#allocation2 + $0x20] sm:$0xf] }
0x1474   :  { %3715 = vmatmul.mubr.msk.f32.gmra.mrb[68].mxu1 %vm40_vm0, %v2351_v54 }
0x1475   :  { %3756 = vmatprep.mubr.msk.f32.mxu1 %vm4232_vm12, %v4233_v15 }
0x1489   :  { %v2663_v32 = vpop.f32.mrb[70].mxu0 }
0x148a   :  { %v2664_v48 = vadd.f32 %v2663_v32, %v5314_v6  ;;  %v3727_v22 = vpop.f32.mrb[71].mxu0 }
0x148c   :  { %v2687_v16 = vmul.f32 %v2664_v48, %v2664_v48 }
0x148d   :  { %v2668_v45 = vpop.f32.mrb[72].mxu0 }
0x148e   :  { %v2692_v9 = vmul.f32 %v2687_v16, %v2664_v48  ;;  %v2669_v58 = vadd.f32 %v2668_v45, %v5314_v6  ;;  %v3730_v27 = vpop.f32.mrb[73].mxu0 }
0x1490   :  { %v2697_v20 = vmul.f32 0.044715, %v2692_v9  ;;  %v2688_v5 = vmul.f32 %v2669_v58, %v2669_v58 }
0x1491   :  { %v2673_v31 = vpop.f32.mrb[74].mxu0 }
0x1492   :  { %v2702_v19 = vadd.f32 %v2697_v20, %v2664_v48  ;;  %v2693_v2 = vmul.f32 %v2688_v5, %v2669_v58  ;;  %v2674_v34 = vadd.f32 %v2673_v31, %v5314_v6  ;;  %v3733_v51 = vpop.f32.mrb[75].mxu0 }
0x1494   :  { %v2707_v63 = vmul.f32 0.7978846, %v2702_v19  ;;  %v2698_v0 = vmul.f32 0.044715, %v2693_v2  ;;  %v2689_v47 = vmul.f32 %v2674_v34, %v2674_v34 }
0x1496   :  { %4181 = vtanh.f32 %v2707_v63  ;;  %v2703_v25 = vadd.f32 %v2698_v0, %v2669_v58  ;;  %v2694_v50 = vmul.f32 %v2689_v47, %v2674_v34 }
0x1498   :  { %v2708_v37 = vmul.f32 0.7978846, %v2703_v25  ;;  %v2699_v33 = vmul.f32 0.044715, %v2694_v50 }
0x149a   :  { %4183 = vtanh.f32 %v2708_v37  ;;  %v2704_v55 = vadd.f32 %v2699_v33, %v2674_v34  ;;  %v2881_v37 = vld [vmem:[%s5447_s7] sm:$0xff]  ;;  %v2882_v33 = vld [vmem:[%s5447_s7 + $0x8] sm:$0xff] }
0x149c   :  { %v2709_v56 = vmul.f32 0.7978846, %v2704_v55  ;;  %v3910_v55 = vpack.c.bf16 %v2882_v33, %v2881_v37 }
0x149e   :  { %4185 = vtanh.f32 %v2709_v56  ;;  %3911 = vmatpush3.bf16.msra.mxu0 %v3910_v55  ;;  %v2883_v56 = vld [vmem:[%s5447_s7 + $0x10] sm:$0xff] }
0x149f   :  { %3912 = vmatprep.subr.bf16.mxu0 %v4231_v13 }
0x14a0   :  { %v4182_v57 = vpop.eup %4181 }
0x14a1   :  { %v2717_v49 = vadd.f32 1.0, %v4182_v57  ;;  %v2884_v57 = vld [vmem:[%s5447_s7 + $0x18] sm:$0xff] }
0x14a3   :  { %v2722_v59 = vmul.f32 0.5, %v2717_v49  ;;  %v3913_v49 = vpack.c.bf16 %v2884_v57, %v2883_v56 }
0x14a4   :  { %v4184_v8 = vpop.eup %4183 }
0x14a5   :  { %v2727_v3 = vmul.f32 %v2722_v59, %v2664_v48  ;;  %v2718_v4 = vadd.f32 1.0, %v4184_v8  ;;  %3914 = vmatpush3.bf16.msra.mxu0 %v3913_v49  ;;  %v4035_v59 = vpack.i.bf16 %v2882_v33, %v2881_v37  ;;  %v4040_v8 = vpack.i.bf16 %v2884_v57, %v2883_v56 }
0x14a6   :  { %3915 = vmatprep.subr.bf16.mxu0 %v4231_v13 }
0x14a7   :  { %3757 = vmatmul.mubr.msk.f32.vlgmr.msra.gmra.mrb[70].mxu1 %vm1402_vm7, %v2727_v3  ;;  %v2723_v14 = vmul.f32 0.5, %v2718_v4 }
0x14a8   :  { %v4186_v36 = vpop.eup %4185  ;;  %3759 = vmatprep.mubr.msk.f32.mxu1 %vm4232_vm12, %v4233_v15 }
0x14a9   :  { %v2728_v35 = vmul.f32 %v2723_v14, %v2669_v58  ;;  %v2719_v17 = vadd.f32 1.0, %v4186_v36 }
0x14ab   :  { %3760 = vmatmul.mubr.msk.f32.gmra.mrb[72].mxu1 %vm1402_vm7, %v2728_v35  ;;  %v2724_v40 = vmul.f32 0.5, %v2719_v17 }
0x14ac   :  { %3762 = vmatprep.mubr.msk.f32.mxu1 %vm4232_vm12, %v4233_v15 }
0x14ad   :  { %v2729_v30 = vmul.f32 %v2724_v40, %v2674_v34 }
0x14af   :  { %3763 = vmatmul.mubr.msk.f32.gmra.mrb[74].mxu1 %vm1402_vm7, %v2729_v30 }
0x14b0   :  { %3765 = vmatprep.mubr.msk.f32.mxu1 %vm4232_vm12, %v4233_v15 }
0x1543   :  { %v2468_v24 = vpop.f32.mrb[66].mxu1 }
0x1544   :  { %v2469_v23 = vadd.f32 %v2468_v24, %v5245_v38  ;;  %v3713_v39 = vpop.f32.mrb[67].mxu1 }
0x1546   :  { %v2480_v53 = vadd.f32 %v2469_v23, %v4995_v10 }
0x1547   :  { %v2473_v42 = vpop.f32.mrb[68].mxu1 }
0x1548   :  { %v2474_v28 = vadd.f32 %v2473_v42, %v5245_v38  ;;  %v3716_v11 = vpop.f32.mrb[69].mxu1  ;;  %v2491_v44 = vsel %vm40_vm0, %v2480_v53, 0.0 }
0x1549   :  { %2492 = vadd.xlane.f32.xlu1 %v2491_v44 }
0x154a   :  { %v2481_v46 = vadd.f32 %v2474_v28, %v5001_v26 }
0x154c   :  { %v2494_v21 = vsel %vm53_vm1, %v2481_v46, 0.0 }
0x154d   :  { %2495 = vadd.xlane.f32.xlu0 %v2494_v21 }
0x157a   :  { %v2817_v7 = vpop.f32.mrb[70].mxu1 }
0x157b   :  { %v2818_v12 = vadd.f32 %v2817_v7, %v2734_v43  ;;  %v3758_v41 = vpop.f32.mrb[71].mxu1 }
0x157d   :  { %v2838_v61 = vadd.f32 %v2818_v12, %v5292_v62 }
0x157e   :  { %v2822_v1 = vpop.f32.mrb[72].mxu1 }
0x157f   :  { %v3761_v10 = vpop.f32.mrb[73].mxu1  ;;  %v2840_v52 = vsel %vm40_vm0, %v2838_v61, 0.0 }
0x1580   :  { %2841 = vadd.xlane.f32.xlu1 %v2840_v52 }
0x1582   :  { %v2826_v38 = vpop.f32.mrb[74].mxu1 }
0x1583   :  { %v2827_v54 = vadd.f32 %v2826_v38, %v2734_v43  ;;  %v3764_v32 = vpop.f32.mrb[75].mxu1 }
0x1585   :  { %v2839_v48 = vadd.f32 %v2827_v54, %v5305_v18 }
0x1587   :  { %v2843_v26 = vsel %vm40_vm0, %v2839_v48, 0.0 }
0x1588   :  { %2844 = vadd.xlane.f32.xlu0 %v2843_v26 }
0x15d6   :  { %v2493_v22 = vpop.xlane.xlu1 %2492 }
0x15d7   :  { %v2500_v16 = vmul.f32 0.03125, %v2493_v22 }
0x15d9   :  { %v2505_v45 = vsub.f32 %v2480_v53, %v2500_v16 }
0x15da   :  { %v2496_v9 = vpop.xlane.xlu0 %2495 }
0x15db   :  { %v2501_v58 = vmul.f32 0.03125, %v2496_v9  ;;  %v2510_v27 = vmul.f32 %v2505_v45, %v2505_v45 }
0x15dd   :  { %v2506_v62 = vsub.f32 %v2481_v46, %v2501_v58  ;;  %v2521_v20 = vsel %vm40_vm0, %v2510_v27, 0.0 }
0x15de   :  { %2522 = vadd.xlane.f32.xlu0 %v2521_v20 }
0x15df   :  { %v2511_v5 = vmul.f32 %v2506_v62, %v2506_v62 }
0x15e1   :  { %v2524_v31 = vsel %vm53_vm1, %v2511_v5, 0.0  ;;  %vm2879_vm1 = vcmask 1040384  }
0x15e2   :  { %2525 = vadd.xlane.f32.xlu1 %v2524_v31 }
0x160d   :  { %v2842_v19 = vpop.xlane.xlu1 %2841 }
0x160e   :  { %v2846_v2 = vmul.f32 0.03125, %v2842_v19 }
0x1610   :  { %v2848_v18 = vsub.f32 %v2838_v61, %v2846_v2 }
0x1612   :  { %v2850_v34 = vmul.f32 %v2848_v18, %v2848_v18 }
0x1614   :  { %v2852_v51 = vsel %vm40_vm0, %v2850_v34, 0.0 }
0x1615   :  { %2853 = vadd.xlane.f32.xlu1 %v2852_v51  ;;  %v2845_v63 = vpop.xlane.xlu0 %2844 }
0x1616   :  { %v2847_v0 = vmul.f32 0.03125, %v2845_v63 }
0x1618   :  { %v2849_v47 = vsub.f32 %v2839_v48, %v2847_v0 }
0x161a   :  { %v2851_v25 = vmul.f32 %v2849_v47, %v2849_v47 }
0x161c   :  { %v2855_v50 = vsel %vm40_vm0, %v2851_v25, 0.0 }
0x161d   :  { %2856 = vadd.xlane.f32.xlu0 %v2855_v50 }
0x1626   :  { %2871 = vrot.lane.b32.xlu1 %v5270_v29, %s4239_s19 }
0x162a   :  { %4036 = vrot.lane.b32.xlu1 %v4035_v59, %s4234_s3 }
0x1633   :  { %2866 = vrot.lane.b32.xlu0 %v5270_v29, %s4237_s30 }
0x1637   :  { %4041 = vrot.lane.b32.xlu0 %v4040_v8, %s4234_s3 }
0x166b   :  { %v2523_v3 = vpop.xlane.xlu0 %2522 }
0x166c   :  { %v2530_v4 = vmul.f32 0.03125, %v2523_v3 }
0x166e   :  { %v2535_v14 = vadd.f32 1e-05, %v2530_v4  ;;  %v3197_v4 = vld [vmem:[%s5448_s8 + $0x2] ss:$0 sm:$0xff] }
0x166f   :  { %v2526_v36 = vpop.xlane.xlu1 %2525 }
0x1670   :  { %4187 = vrsqrt.f32 %v2535_v14  ;;  %v2531_v35 = vmul.f32 0.03125, %v2526_v36 }
0x1672   :  { %v2536_v17 = vadd.f32 1e-05, %v2531_v35 }
0x1674   :  { %4189 = vrsqrt.f32 %v2536_v17 }
0x167a   :  { %v4188_v40 = vpop.eup %4187 }
0x167b   :  { %v2545_v30 = vmul.f32 %v4188_v40, %v2505_v45 }
0x167d   :  { %v2554_v24 = vmul.f32 %v5270_v29, %v2545_v30 }
0x167e   :  { %v4190_v23 = vpop.eup %4189 }
0x167f   :  { %v2563_v39 = vadd.f32 %v5288_v60, %v2554_v24  ;;  %v2546_v53 = vmul.f32 %v4190_v23, %v2506_v62 }
0x1681   :  { %3735 = vmatmul.mubr.msk.f32.gmra.mrb[76].mxu0 %vm40_vm0, %v2563_v39  ;;  %v2555_v42 = vmul.f32 %v5270_v29, %v2546_v53 }
0x1682   :  { %3737 = vmatprep.mubr.msk.f32.mxu0 %vm4232_vm12, %v4233_v15 }
0x1683   :  { %v2564_v28 = vadd.f32 %v5288_v60, %v2555_v42 }
0x1685   :  { %3738 = vmatmul.mubr.msk.f32.gmra.mrb[78].mxu0 %vm40_vm0, %v2564_v28 }
0x1686   :  { %3779 = vmatprep.mubr.msk.f32.mxu0 %vm4232_vm12, %v4233_v15 }
0x16a2   :  { %v2854_v11 = vpop.xlane.xlu1 %2853 }
0x16a3   :  { %v2858_v44 = vmul.f32 0.03125, %v2854_v11 }
0x16a5   :  { %v2860_v46 = vadd.f32 1e-05, %v2858_v44 }
0x16a6   :  { %v2872_v52 = vpop.permute.xlu1 %2871 }
0x16a7   :  { %4191 = vrsqrt.f32 %v2860_v46 }
0x16aa   :  { %v2857_v21 = vpop.xlane.xlu0 %2856  ;;  %v4037_v26 = vpop.permute.xlu1 %4036 }
0x16ab   :  { %v2859_v43 = vmul.f32 0.03125, %v2857_v21  ;;  %v4039_v16 = vunpack.i.h.bf16 %v4037_v26  ;;  %v4038_v45 = vunpack.i.l.bf16 %v4037_v26 }
0x16ad   :  { %v2861_v7 = vadd.f32 1e-05, %v2859_v43  ;;  %v3916_v27 = vpack.c.bf16 %v4039_v16, %v4038_v45 }
0x16ae   :  { %v2867_v61 = vpop.permute.xlu0 %2866 }
0x16af   :  { %4193 = vrsqrt.f32 %v2861_v7 }
0x16b1   :  { %v4192_v12 = vpop.eup %4191 }
0x16b2   :  { %v2864_v29 = vmul.f32 %v4192_v12, %v2848_v18  ;;  %v4042_v22 = vpop.permute.xlu0 %4041 }
0x16b3   :  { %v4044_v9 = vunpack.i.h.bf16 %v4042_v22  ;;  %v4043_v58 = vunpack.i.l.bf16 %v4042_v22 }
0x16b4   :  { %v2869_v10 = vmul.f32 %v2867_v61, %v2864_v29 }
0x16b5   :  { %v3919_v62 = vpack.c.bf16 %v4044_v9, %v4043_v58 }
0x16b6   :  { %v2874_v54 = vadd.f32 %v2872_v52, %v2869_v10 }
0x16b9   :  { %v4194_v41 = vpop.eup %4193 }
0x16ba   :  { %v2865_v1 = vmul.f32 %v4194_v41, %v2849_v47 }
0x16bc   :  { %v2870_v60 = vmul.f32 %v2867_v61, %v2865_v1 }
0x16be   :  { %v2875_v38 = vadd.f32 %v2872_v52, %v2870_v60 }
0x16c0   :  { %v2877_v32 = vrot.slane %v2875_v38, 1 }
0x16c2   :  { %v2880_v48 = vsel %vm2879_vm1, %v2874_v54, %v2877_v32 }
0x16c3   :  { %3780 = vmatmul.mubr.msk.f32.vlgmr.msra.gmra.mrb[80].mxu0 %vm40_vm0, %v2880_v48 }
0x16c4   :  { %3790 = vmatprep.mubr.msk.f32.mxu0 %vm4232_vm12, %v4233_v15  ;;  %3917 = vmatpush3.bf16.msra.mxu0 %v3916_v27 }
0x16c5   :  { %3918 = vmatprep.subr.bf16.mxu0 %v4231_v13 }
0x16c8   :  { %3920 = vmatpush3.bf16.msra.mxu0 %v3919_v62 }
0x1754   :  { %v2678_v20 = vpop.f32.mrb[76].mxu0 }
0x1755   :  { %v2679_v5 = vadd.f32 %v2678_v20, %v5314_v6  ;;  %v3736_v31 = vpop.f32.mrb[77].mxu0 }
0x1757   :  { %v2690_v19 = vmul.f32 %v2679_v5, %v2679_v5 }
0x1758   :  { %v2683_v2 = vpop.f32.mrb[78].mxu0 }
0x1759   :  { %v2695_v18 = vmul.f32 %v2690_v19, %v2679_v5  ;;  %v2684_v34 = vadd.f32 %v2683_v2, %v5314_v6  ;;  %v3739_v51 = vpop.f32.mrb[79].mxu0 }
0x175b   :  { %v2700_v63 = vmul.f32 0.044715, %v2695_v18  ;;  %v2691_v0 = vmul.f32 %v2684_v34, %v2684_v34 }
0x175d   :  { %v2705_v47 = vadd.f32 %v2700_v63, %v2679_v5  ;;  %v2696_v25 = vmul.f32 %v2691_v0, %v2684_v34 }
0x175f   :  { %v2710_v50 = vmul.f32 0.7978846, %v2705_v47  ;;  %v2701_v37 = vmul.f32 0.044715, %v2696_v25 }
0x1761   :  { %4195 = vtanh.f32 %v2710_v50  ;;  %v2706_v33 = vadd.f32 %v2701_v37, %v2684_v34 }
0x1763   :  { %v2711_v13 = vmul.f32 0.7978846, %v2706_v33 }
0x1765   :  { %4197 = vtanh.f32 %v2711_v13 }
0x176b   :  { %v4196_v55 = vpop.eup %4195 }
0x176c   :  { %v2720_v56 = vadd.f32 1.0, %v4196_v55 }
0x176e   :  { %v2725_v57 = vmul.f32 0.5, %v2720_v56 }
0x176f   :  { %v4198_v49 = vpop.eup %4197 }
0x1770   :  { %v2730_v59 = vmul.f32 %v2725_v57, %v2679_v5  ;;  %v2721_v8 = vadd.f32 1.0, %v4198_v49 }
0x1772   :  { %3766 = vmatmul.mubr.msk.f32.gmra.mrb[76].mxu1 %vm1402_vm7, %v2730_v59  ;;  %v2726_v6 = vmul.f32 0.5, %v2721_v8 }
0x1773   :  { %3768 = vmatprep.mubr.msk.f32.mxu1 %vm4232_vm12, %v4233_v15  ;;  %v3199_v15 = vld [vmem:[%s5448_s8 + $0x3] ss:$0 sm:$0xff] }
0x1774   :  { %v2731_v3 = vmul.f32 %v2726_v6, %v2684_v34 }
0x1776   :  { %3769 = vmatmul.mubr.msk.f32.gmra.mrb[78].mxu1 %vm1402_vm7, %v2731_v3 }
0x1796   :  { %v2960_v14 = vpop.f32.mrb[80].mxu0 }
0x1797   :  { %v2961_v36 = vadd.f32 %v3197_v4, %v2960_v14  ;;  %v3781_v35 = vpop.f32.mrb[81].mxu0 }
0x1799   :  { %4199 = vtanh.f32 %v2961_v36 }
0x17a3   :  { %v4200_v17 = vpop.eup %4199 }
0x17a4   :  { %3791 = vmatmul.mubr.msk.f32.vlgmr.msra.gmra.mrb[82].mxu0 %vm40_vm0, %v4200_v17 }
0x1845   :  { %v2831_v40 = vpop.f32.mrb[76].mxu1 }
0x1846   :  { %v3767_v30 = vpop.f32.mrb[77].mxu1 }
0x1849   :  { %v2835_v24 = vpop.f32.mrb[78].mxu1 }
0x184a   :  { %v3770_v23 = vpop.f32.mrb[79].mxu1 }
0x1877   :  { %v3054_v39 = vpop.f32.mrb[82].mxu0 }
0x1878   :  { %v3055_v53 = vadd.f32 %v3199_v15, %v3054_v39  ;;  %v3792_v42 = vpop.f32.mrb[83].mxu0 }
0x187a   :  { %3059 = vst.msk [vmem:[#allocation3] sm:$0x3] %vm3058_vm8, %v3055_v53 }
0x187b   :  { %4217 = shalt.err (!%p4214_p4)
}
0x187c   :  { %s4218_s18 = scalar_lea.hbm %s5449_s9, 32 }
0x187d   :  { %p4219_p5 = scmp.ne.s32.totalorder %s5449_s9, %s4218_s18  ;;  %p4222_p6 = scmp.lt.u32.totalorder %s4218_s18, %s5449_s9 }
0x187f   :  { %p4224_p7 = pnand %p4222_p6, %p4219_p5 }
0x1881   :  { %4227 = shalt.err (!%p4224_p7)
}
0x1882   :  { %3069 = dma.vmem_to_hbm [thread:$0]  %s3067_s15, 32, %s5449_s9, [#allocation4]  }
0x1883   :  { %4228 = dma.done.wait [#allocation4], 32  }
0x1884   :  { %4229 = vsyncadd [#allocation4], 4294967264 }
0x1885   :  { %3073 = vsyncpa [#allocation4], 1 }

</bundles_post_ra>
